<compile_context>
chip_gen: v5e
topology: v5e:2x2
jax: 0.10.0
libtpu: 0.0.40
codegen_flags: <defaults>
</compile_context>

<pallas_src>
import jax
import jax.numpy as jnp
from jax.experimental import pallas as pl
from jax.experimental.pallas import tpu as pltpu

INPUT_DIM = 3
INPUT_DIM_PAD = 4          # pad the 3-wide fan-in to 4 (nice sublane alignment after packing)
NUM_HIDDEN_LAYERS = 8
HIDDEN_DIM = 32
OUTPUT_DIM = 1
DEFAULT_TILE_B = 4096      # logical batch rows per grid step (sweep 2048-8192)


def _round_up(n, m):
    return ((n + m - 1) // m) * m


def _default_pack():
    """Batch chunks packed per MXU pass: 8 for 256-wide MXUs (v6e/v7x), 4 for 128-wide."""
    try:
        kind = jax.devices()[0].device_kind.lower()
    except Exception:
        return 8
    for old in ("v2", "v3", "v4", "v5"):
        if old in kind:
            return 4
    return 8


def _kron_eye(w, pack, dtype):
    """kron(w, eye(pack)) along the last two dims (supports a leading layer axis)."""
    eye = jnp.eye(pack, dtype=jnp.float32)
    wk = jnp.einsum('...oi,pq->...opiq', w.astype(jnp.float32), eye)
    new_shape = w.shape[:-2] + (w.shape[-2] * pack, w.shape[-1] * pack)
    return wk.reshape(new_shape).astype(dtype)


def pack_params(params, pack):
    """Pack weights/biases for block-diagonal batch-chunk processing.

    Row convention: packed row index = feature * pack + chunk.
    Weights -> kron(W, I_pack) in bf16 (MXU operands); biases repeated per chunk, f32.
    """
    w_in, b_in, w_hid, b_hid, w_out, b_out = params
    w_in_p = jnp.pad(w_in, ((0, 0), (0, INPUT_DIM_PAD - INPUT_DIM)))   # zero fan-in pad
    w_in_k = _kron_eye(w_in_p, pack, jnp.bfloat16)                      # (32P, 4P)
    w_hid_k = _kron_eye(w_hid, pack, jnp.bfloat16)                      # (7, 32P, 32P)
    w_out_k = _kron_eye(w_out, pack, jnp.bfloat16)                      # (P, 32P)
    b_in_k = jnp.repeat(b_in.astype(jnp.float32), pack, axis=0)         # (32P, 1)
    b_hid_k = jnp.repeat(b_hid.astype(jnp.float32), pack, axis=1)       # (7, 32P, 1)
    b_out_k = jnp.repeat(b_out.astype(jnp.float32), pack, axis=0)       # (P, 1)
    return w_in_k, b_in_k, w_hid_k, b_hid_k, w_out_k, b_out_k


def mlp_kernel(x_ref, w_in_ref, b_in_ref, w_hid_ref, b_hid_ref,
               w_out_ref, b_out_ref, o_ref):
    # All activations are (32*PACK, tile_cols): PACK batch chunks on sublanes, batch on lanes.
    # Input layer: (32P, 4P)bf16 @ (4P, tile_cols)bf16 -> f32, + bias, ReLU.
    h = jnp.dot(w_in_ref[...], x_ref[...], preferred_element_type=jnp.float32)
    h = jnp.maximum(h + b_in_ref[...], 0.0)

    # 7 hidden layers (statically unrolled): each is ONE dense (32P, 32P) MXU tile that
    # processes PACK batch chunks per pass.  Matmul operands bf16, accumulate/elementwise f32.
    for i in range(NUM_HIDDEN_LAYERS - 1):
        h = jnp.dot(w_hid_ref[i], h.astype(jnp.bfloat16),
                    preferred_element_type=jnp.float32)
        h = jnp.maximum(h + b_hid_ref[i], 0.0)

    # Output layer: (P, 32P) @ (32P, tile_cols) + bias, sigmoid.
    # exp -> EUP, approximate reciprocal -> EUP (no VPU divide). Lane-dense (P, tile_cols) store.
    z = jnp.dot(w_out_ref[...], h.astype(jnp.bfloat16),
                preferred_element_type=jnp.float32)
    z = z + b_out_ref[...]
    o_ref[...] = pl.reciprocal(1.0 + jnp.exp(-z), approx=True)


def mlp_forward(x, params, tile_b=DEFAULT_TILE_B, pack=None):
    """x: (batch, 3) float32 -> (batch, 1) float32 sigmoid outputs."""
    if pack is None:
        pack = _default_pack()
    batch = x.shape[0]

    # Lane quantum: a tile of `pack * 128` logical rows maps to 128 lane-dense packed columns.
    lane_q = pack * 128
    b_min = _round_up(batch, lane_q)
    tile_b = _round_up(min(tile_b, b_min), lane_q)          # padding waste bounded by < 1 tile
    n_tiles = -(-b_min // tile_b)
    # Prefer >= 2 "parallel" batch tiles so both TensorCores get work on 2-TC parts (v7x).
    if n_tiles == 1 and b_min >= 2 * lane_q:
        tile_b = _round_up(b_min // 2, lane_q)
        n_tiles = -(-b_min // tile_b)
    b_pad = n_tiles * tile_b
    n_cols = b_pad // pack           # packed lane extent of the whole batch
    tile_cols = tile_b // pack       # packed lane columns per grid step

    # Single fused relayout: transpose -> pad -> chunk-pack -> bf16 (8 B/row in HBM).
    # Packing convention: packed[f*pack + p, j] = x^T[f, p * n_cols + j].
    x_t = jnp.pad(x.astype(jnp.float32).T,
                  ((0, INPUT_DIM_PAD - INPUT_DIM), (0, b_pad - batch)))
    x_packed = x_t.reshape(INPUT_DIM_PAD * pack, n_cols).astype(jnp.bfloat16)

    w_in_k, b_in_k, w_hid_k, b_hid_k, w_out_k, b_out_k = pack_params(params, pack)

    grid_spec = pltpu.PrefetchScalarGridSpec(
        num_scalar_prefetch=0,
        grid=(n_tiles,),
        in_specs=[
            # x tile: streamed / double-buffered over the batch grid.
            pl.BlockSpec((INPUT_DIM_PAD * pack, tile_cols), lambda i: (0, i)),
            # Weights & biases: constant index maps -> VMEM-resident across grid steps.
            pl.BlockSpec((HIDDEN_DIM * pack, INPUT_DIM_PAD * pack), lambda i: (0, 0)),
            pl.BlockSpec((HIDDEN_DIM * pack, 1), lambda i: (0, 0)),
            pl.BlockSpec((NUM_HIDDEN_LAYERS - 1, HIDDEN_DIM * pack, HIDDEN_DIM * pack),
                         lambda i: (0, 0, 0)),
            pl.BlockSpec((NUM_HIDDEN_LAYERS - 1, HIDDEN_DIM * pack, 1),
                         lambda i: (0, 0, 0)),
            pl.BlockSpec((OUTPUT_DIM * pack, HIDDEN_DIM * pack), lambda i: (0, 0)),
            pl.BlockSpec((OUTPUT_DIM * pack, 1), lambda i: (0, 0)),
        ],
        out_specs=pl.BlockSpec((OUTPUT_DIM * pack, tile_cols), lambda i: (0, i)),
    )

    out_packed = pl.pallas_call(
        mlp_kernel,
        out_shape=jax.ShapeDtypeStruct((OUTPUT_DIM * pack, n_cols), jnp.float32),
        grid_spec=grid_spec,
        compiler_params=pltpu.CompilerParams(
            dimension_semantics=("parallel",),      # independent batch tiles
            vmem_limit_bytes=32 * 1024 * 1024,      # conservative for v7x's 64 MiB VMEM
        ),
    )(x_packed, w_in_k, b_in_k, w_hid_k, b_hid_k, w_out_k, b_out_k)

    # Undo chunk-packing with a pure row-major reshape (no output transpose/relayout):
    # flat index p * n_cols + j == original padded batch row.
    return out_packed.reshape(-1)[:batch].reshape(batch, OUTPUT_DIM)


def init_params(key):
    """Deterministic init mimicking PyTorch Linear's U(-1/sqrt(fan_in), 1/sqrt(fan_in)).

    Weights use PyTorch layout (out_features, in_features); biases are (out_features, 1).
    """
    ks = jax.random.split(key, 6)

    def uni(k, shape, fan_in):
        bound = 1.0 / jnp.sqrt(float(fan_in))
        return jax.random.uniform(k, shape, jnp.float32, -bound, bound)

    w_in = uni(ks[0], (HIDDEN_DIM, INPUT_DIM), INPUT_DIM)
    b_in = uni(ks[1], (HIDDEN_DIM, 1), INPUT_DIM)
    w_hid = uni(ks[2], (NUM_HIDDEN_LAYERS - 1, HIDDEN_DIM, HIDDEN_DIM), HIDDEN_DIM)
    b_hid = uni(ks[3], (NUM_HIDDEN_LAYERS - 1, HIDDEN_DIM, 1), HIDDEN_DIM)
    w_out = uni(ks[4], (OUTPUT_DIM, HIDDEN_DIM), HIDDEN_DIM)
    b_out = uni(ks[5], (OUTPUT_DIM, 1), HIDDEN_DIM)
    return (w_in, b_in, w_hid, b_hid, w_out, b_out)


def mlp_reference(x, params):
    """Pure-JAX f32 reference of the same forward pass (batch-major orientation)."""
    w_in, b_in, w_hid, b_hid, w_out, b_out = params
    h = jnp.maximum(x @ w_in.T + b_in[:, 0], 0.0)
    for i in range(NUM_HIDDEN_LAYERS - 1):
        h = jnp.maximum(h @ w_hid[i].T + b_hid[i, :, 0], 0.0)
    z = h @ w_out.T + b_out[:, 0]
    return 1.0 / (1.0 + jnp.exp(-z))


if __name__ == "__main__":
    key = jax.random.PRNGKey(0)
    k_x, k_p = jax.random.split(key)

    batch = 8
    x = jax.random.normal(k_x, (batch, INPUT_DIM), jnp.float32)
    params = init_params(k_p)

    out = jax.block_until_ready(mlp_forward(x, params))
    ref = mlp_reference(x, params)

    assert out.shape == (batch, OUTPUT_DIM)
    # Kernel uses bf16 MXU operands + approximate reciprocal; reference is pure f32.
    # Post-sigmoid outputs are bounded in (0, 1), so a 5e-3 tolerance comfortably covers
    # the bf16 rounding (~0.2% per layer) while still catching real bugs.
    assert jnp.allclose(out, ref, atol=5e-3, rtol=5e-3), "mismatch vs JAX reference"

    print("KERNEL_OK")
</pallas_src>

<mosaic_0001>
module attributes {stable_mosaic.version = 11 : i64} {
  func.func @mlp_kernel(%arg0: i32, %arg1: memref<32x128xbf16, #tpu.memory_space<vmem>>, %arg2: memref<256x32xbf16, #tpu.memory_space<vmem>>, %arg3: memref<256x1xf32, #tpu.memory_space<vmem>>, %arg4: memref<7x256x256xbf16, #tpu.memory_space<vmem>>, %arg5: memref<7x256x1xf32, #tpu.memory_space<vmem>>, %arg6: memref<8x256xbf16, #tpu.memory_space<vmem>>, %arg7: memref<8x1xf32, #tpu.memory_space<vmem>>, %arg8: memref<8x128xf32, #tpu.memory_space<vmem>>) attributes {dimension_semantics = [#tpu.dimension_semantics<parallel>], iteration_bounds = array<i64: 1>, scalar_prefetch = 0 : i64, scratch_operands = 0 : i64, tpu.core_type = #tpu.core_type<tc>, window_params = [{transform_indices = @transform_0, window_bounds = array<i64: 32, 128>}, {pipeline_mode = #tpu.pipeline_mode<synchronous>, transform_indices = @transform_1, window_bounds = array<i64: 256, 32>}, {pipeline_mode = #tpu.pipeline_mode<synchronous>, transform_indices = @transform_2, window_bounds = array<i64: 256, 1>}, {pipeline_mode = #tpu.pipeline_mode<synchronous>, transform_indices = @transform_3, window_bounds = array<i64: 7, 256, 256>}, {pipeline_mode = #tpu.pipeline_mode<synchronous>, transform_indices = @transform_4, window_bounds = array<i64: 7, 256, 1>}, {pipeline_mode = #tpu.pipeline_mode<synchronous>, transform_indices = @transform_5, window_bounds = array<i64: 8, 256>}, {pipeline_mode = #tpu.pipeline_mode<synchronous>, transform_indices = @transform_6, window_bounds = array<i64: 8, 1>}, {transform_indices = @transform_7, window_bounds = array<i64: 8, 128>}]} {
    %c0 = arith.constant 0 : index
    %c0_0 = arith.constant 0 : index
    %0 = vector.load %arg2[%c0, %c0_0] : memref<256x32xbf16, #tpu.memory_space<vmem>>, vector<256x32xbf16>
    %c0_1 = arith.constant 0 : index
    %c0_2 = arith.constant 0 : index
    %1 = vector.load %arg1[%c0_1, %c0_2] : memref<32x128xbf16, #tpu.memory_space<vmem>>, vector<32x128xbf16>
    %cst = arith.constant dense<0.000000e+00> : vector<256x128xf32>
    %2 = tpu.matmul %0, %1, %cst {dimension_numbers = #tpu.dot_dimension_numbers<[1], [0], [0], [1], [0, 0, 1, 1], [], []>} : vector<256x32xbf16>, vector<32x128xbf16>, vector<256x128xf32> -> vector<256x128xf32>
    %c0_3 = arith.constant 0 : index
    %c0_4 = arith.constant 0 : index
    %3 = vector.load %arg3[%c0_3, %c0_4] : memref<256x1xf32, #tpu.memory_space<vmem>>, vector<256x1xf32>
    %4 = vector.broadcast %3 : vector<256x1xf32> to vector<256x128xf32>
    %5 = arith.addf %2, %4 : vector<256x128xf32>
    %cst_5 = arith.constant 0.000000e+00 : f32
    %6 = vector.broadcast %cst_5 : f32 to vector<256x128xf32>
    %7 = arith.maximumf %5, %6 : vector<256x128xf32>
    %c0_6 = arith.constant 0 : index
    %c0_7 = arith.constant 0 : index
    %c0_8 = arith.constant 0 : index
    %8 = vector.load %arg4[%c0_6, %c0_7, %c0_8] : memref<7x256x256xbf16, #tpu.memory_space<vmem>>, vector<1x256x256xbf16>
    %9 = vector.shape_cast %8 : vector<1x256x256xbf16> to vector<256x256xbf16>
    %10 = arith.truncf %7 : vector<256x128xf32> to vector<256x128xbf16>
    %cst_9 = arith.constant dense<0.000000e+00> : vector<256x128xf32>
    %11 = tpu.matmul %9, %10, %cst_9 {dimension_numbers = #tpu.dot_dimension_numbers<[1], [0], [0], [1], [0, 0, 1, 1], [], []>} : vector<256x256xbf16>, vector<256x128xbf16>, vector<256x128xf32> -> vector<256x128xf32>
    %c0_10 = arith.constant 0 : index
    %c0_11 = arith.constant 0 : index
    %c0_12 = arith.constant 0 : index
    %12 = vector.load %arg5[%c0_10, %c0_11, %c0_12] : memref<7x256x1xf32, #tpu.memory_space<vmem>>, vector<1x256x1xf32>
    %13 = vector.shape_cast %12 : vector<1x256x1xf32> to vector<256x1xf32>
    %14 = vector.broadcast %13 : vector<256x1xf32> to vector<256x128xf32>
    %15 = arith.addf %11, %14 : vector<256x128xf32>
    %cst_13 = arith.constant 0.000000e+00 : f32
    %16 = vector.broadcast %cst_13 : f32 to vector<256x128xf32>
    %17 = arith.maximumf %15, %16 : vector<256x128xf32>
    %c1 = arith.constant 1 : index
    %c0_14 = arith.constant 0 : index
    %c0_15 = arith.constant 0 : index
    %18 = vector.load %arg4[%c1, %c0_14, %c0_15] : memref<7x256x256xbf16, #tpu.memory_space<vmem>>, vector<1x256x256xbf16>
    %19 = vector.shape_cast %18 : vector<1x256x256xbf16> to vector<256x256xbf16>
    %20 = arith.truncf %17 : vector<256x128xf32> to vector<256x128xbf16>
    %cst_16 = arith.constant dense<0.000000e+00> : vector<256x128xf32>
    %21 = tpu.matmul %19, %20, %cst_16 {dimension_numbers = #tpu.dot_dimension_numbers<[1], [0], [0], [1], [0, 0, 1, 1], [], []>} : vector<256x256xbf16>, vector<256x128xbf16>, vector<256x128xf32> -> vector<256x128xf32>
    %c1_17 = arith.constant 1 : index
    %c0_18 = arith.constant 0 : index
    %c0_19 = arith.constant 0 : index
    %22 = vector.load %arg5[%c1_17, %c0_18, %c0_19] : memref<7x256x1xf32, #tpu.memory_space<vmem>>, vector<1x256x1xf32>
    %23 = vector.shape_cast %22 : vector<1x256x1xf32> to vector<256x1xf32>
    %24 = vector.broadcast %23 : vector<256x1xf32> to vector<256x128xf32>
    %25 = arith.addf %21, %24 : vector<256x128xf32>
    %cst_20 = arith.constant 0.000000e+00 : f32
    %26 = vector.broadcast %cst_20 : f32 to vector<256x128xf32>
    %27 = arith.maximumf %25, %26 : vector<256x128xf32>
    %c2 = arith.constant 2 : index
    %c0_21 = arith.constant 0 : index
    %c0_22 = arith.constant 0 : index
    %28 = vector.load %arg4[%c2, %c0_21, %c0_22] : memref<7x256x256xbf16, #tpu.memory_space<vmem>>, vector<1x256x256xbf16>
    %29 = vector.shape_cast %28 : vector<1x256x256xbf16> to vector<256x256xbf16>
    %30 = arith.truncf %27 : vector<256x128xf32> to vector<256x128xbf16>
    %cst_23 = arith.constant dense<0.000000e+00> : vector<256x128xf32>
    %31 = tpu.matmul %29, %30, %cst_23 {dimension_numbers = #tpu.dot_dimension_numbers<[1], [0], [0], [1], [0, 0, 1, 1], [], []>} : vector<256x256xbf16>, vector<256x128xbf16>, vector<256x128xf32> -> vector<256x128xf32>
    %c2_24 = arith.constant 2 : index
    %c0_25 = arith.constant 0 : index
    %c0_26 = arith.constant 0 : index
    %32 = vector.load %arg5[%c2_24, %c0_25, %c0_26] : memref<7x256x1xf32, #tpu.memory_space<vmem>>, vector<1x256x1xf32>
    %33 = vector.shape_cast %32 : vector<1x256x1xf32> to vector<256x1xf32>
    %34 = vector.broadcast %33 : vector<256x1xf32> to vector<256x128xf32>
    %35 = arith.addf %31, %34 : vector<256x128xf32>
    %cst_27 = arith.constant 0.000000e+00 : f32
    %36 = vector.broadcast %cst_27 : f32 to vector<256x128xf32>
    %37 = arith.maximumf %35, %36 : vector<256x128xf32>
    %c3 = arith.constant 3 : index
    %c0_28 = arith.constant 0 : index
    %c0_29 = arith.constant 0 : index
    %38 = vector.load %arg4[%c3, %c0_28, %c0_29] : memref<7x256x256xbf16, #tpu.memory_space<vmem>>, vector<1x256x256xbf16>
    %39 = vector.shape_cast %38 : vector<1x256x256xbf16> to vector<256x256xbf16>
    %40 = arith.truncf %37 : vector<256x128xf32> to vector<256x128xbf16>
    %cst_30 = arith.constant dense<0.000000e+00> : vector<256x128xf32>
    %41 = tpu.matmul %39, %40, %cst_30 {dimension_numbers = #tpu.dot_dimension_numbers<[1], [0], [0], [1], [0, 0, 1, 1], [], []>} : vector<256x256xbf16>, vector<256x128xbf16>, vector<256x128xf32> -> vector<256x128xf32>
    %c3_31 = arith.constant 3 : index
    %c0_32 = arith.constant 0 : index
    %c0_33 = arith.constant 0 : index
    %42 = vector.load %arg5[%c3_31, %c0_32, %c0_33] : memref<7x256x1xf32, #tpu.memory_space<vmem>>, vector<1x256x1xf32>
    %43 = vector.shape_cast %42 : vector<1x256x1xf32> to vector<256x1xf32>
    %44 = vector.broadcast %43 : vector<256x1xf32> to vector<256x128xf32>
    %45 = arith.addf %41, %44 : vector<256x128xf32>
    %cst_34 = arith.constant 0.000000e+00 : f32
    %46 = vector.broadcast %cst_34 : f32 to vector<256x128xf32>
    %47 = arith.maximumf %45, %46 : vector<256x128xf32>
    %c4 = arith.constant 4 : index
    %c0_35 = arith.constant 0 : index
    %c0_36 = arith.constant 0 : index
    %48 = vector.load %arg4[%c4, %c0_35, %c0_36] : memref<7x256x256xbf16, #tpu.memory_space<vmem>>, vector<1x256x256xbf16>
    %49 = vector.shape_cast %48 : vector<1x256x256xbf16> to vector<256x256xbf16>
    %50 = arith.truncf %47 : vector<256x128xf32> to vector<256x128xbf16>
    %cst_37 = arith.constant dense<0.000000e+00> : vector<256x128xf32>
    %51 = tpu.matmul %49, %50, %cst_37 {dimension_numbers = #tpu.dot_dimension_numbers<[1], [0], [0], [1], [0, 0, 1, 1], [], []>} : vector<256x256xbf16>, vector<256x128xbf16>, vector<256x128xf32> -> vector<256x128xf32>
    %c4_38 = arith.constant 4 : index
    %c0_39 = arith.constant 0 : index
    %c0_40 = arith.constant 0 : index
    %52 = vector.load %arg5[%c4_38, %c0_39, %c0_40] : memref<7x256x1xf32, #tpu.memory_space<vmem>>, vector<1x256x1xf32>
    %53 = vector.shape_cast %52 : vector<1x256x1xf32> to vector<256x1xf32>
    %54 = vector.broadcast %53 : vector<256x1xf32> to vector<256x128xf32>
    %55 = arith.addf %51, %54 : vector<256x128xf32>
    %cst_41 = arith.constant 0.000000e+00 : f32
    %56 = vector.broadcast %cst_41 : f32 to vector<256x128xf32>
    %57 = arith.maximumf %55, %56 : vector<256x128xf32>
    %c5 = arith.constant 5 : index
    %c0_42 = arith.constant 0 : index
    %c0_43 = arith.constant 0 : index
    %58 = vector.load %arg4[%c5, %c0_42, %c0_43] : memref<7x256x256xbf16, #tpu.memory_space<vmem>>, vector<1x256x256xbf16>
    %59 = vector.shape_cast %58 : vector<1x256x256xbf16> to vector<256x256xbf16>
    %60 = arith.truncf %57 : vector<256x128xf32> to vector<256x128xbf16>
    %cst_44 = arith.constant dense<0.000000e+00> : vector<256x128xf32>
    %61 = tpu.matmul %59, %60, %cst_44 {dimension_numbers = #tpu.dot_dimension_numbers<[1], [0], [0], [1], [0, 0, 1, 1], [], []>} : vector<256x256xbf16>, vector<256x128xbf16>, vector<256x128xf32> -> vector<256x128xf32>
    %c5_45 = arith.constant 5 : index
    %c0_46 = arith.constant 0 : index
    %c0_47 = arith.constant 0 : index
    %62 = vector.load %arg5[%c5_45, %c0_46, %c0_47] : memref<7x256x1xf32, #tpu.memory_space<vmem>>, vector<1x256x1xf32>
    %63 = vector.shape_cast %62 : vector<1x256x1xf32> to vector<256x1xf32>
    %64 = vector.broadcast %63 : vector<256x1xf32> to vector<256x128xf32>
    %65 = arith.addf %61, %64 : vector<256x128xf32>
    %cst_48 = arith.constant 0.000000e+00 : f32
    %66 = vector.broadcast %cst_48 : f32 to vector<256x128xf32>
    %67 = arith.maximumf %65, %66 : vector<256x128xf32>
    %c6 = arith.constant 6 : index
    %c0_49 = arith.constant 0 : index
    %c0_50 = arith.constant 0 : index
    %68 = vector.load %arg4[%c6, %c0_49, %c0_50] : memref<7x256x256xbf16, #tpu.memory_space<vmem>>, vector<1x256x256xbf16>
    %69 = vector.shape_cast %68 : vector<1x256x256xbf16> to vector<256x256xbf16>
    %70 = arith.truncf %67 : vector<256x128xf32> to vector<256x128xbf16>
    %cst_51 = arith.constant dense<0.000000e+00> : vector<256x128xf32>
    %71 = tpu.matmul %69, %70, %cst_51 {dimension_numbers = #tpu.dot_dimension_numbers<[1], [0], [0], [1], [0, 0, 1, 1], [], []>} : vector<256x256xbf16>, vector<256x128xbf16>, vector<256x128xf32> -> vector<256x128xf32>
    %c6_52 = arith.constant 6 : index
    %c0_53 = arith.constant 0 : index
    %c0_54 = arith.constant 0 : index
    %72 = vector.load %arg5[%c6_52, %c0_53, %c0_54] : memref<7x256x1xf32, #tpu.memory_space<vmem>>, vector<1x256x1xf32>
    %73 = vector.shape_cast %72 : vector<1x256x1xf32> to vector<256x1xf32>
    %74 = vector.broadcast %73 : vector<256x1xf32> to vector<256x128xf32>
    %75 = arith.addf %71, %74 : vector<256x128xf32>
    %cst_55 = arith.constant 0.000000e+00 : f32
    %76 = vector.broadcast %cst_55 : f32 to vector<256x128xf32>
    %77 = arith.maximumf %75, %76 : vector<256x128xf32>
    %c0_56 = arith.constant 0 : index
    %c0_57 = arith.constant 0 : index
    %78 = vector.load %arg6[%c0_56, %c0_57] : memref<8x256xbf16, #tpu.memory_space<vmem>>, vector<8x256xbf16>
    %79 = arith.truncf %77 : vector<256x128xf32> to vector<256x128xbf16>
    %cst_58 = arith.constant dense<0.000000e+00> : vector<8x128xf32>
    %80 = tpu.matmul %78, %79, %cst_58 {dimension_numbers = #tpu.dot_dimension_numbers<[1], [0], [0], [1], [0, 0, 1, 1], [], []>} : vector<8x256xbf16>, vector<256x128xbf16>, vector<8x128xf32> -> vector<8x128xf32>
    %c0_59 = arith.constant 0 : index
    %c0_60 = arith.constant 0 : index
    %81 = vector.load %arg7[%c0_59, %c0_60] : memref<8x1xf32, #tpu.memory_space<vmem>>, vector<8x1xf32>
    %82 = vector.broadcast %81 : vector<8x1xf32> to vector<8x128xf32>
    %83 = arith.addf %80, %82 : vector<8x128xf32>
    %cst_61 = arith.constant 0.000000e+00 : f32
    %84 = vector.broadcast %cst_61 : f32 to vector<8x128xf32>
    %85 = arith.subf %84, %83 : vector<8x128xf32>
    %86 = math.exp %85 : vector<8x128xf32>
    %cst_62 = arith.constant 1.000000e+00 : f32
    %87 = vector.broadcast %cst_62 : f32 to vector<8x128xf32>
    %88 = arith.addf %87, %86 : vector<8x128xf32>
    %89 = tpu.reciprocal %88 {approx = true} : vector<8x128xf32> -> vector<8x128xf32>
    %c0_63 = arith.constant 0 : index
    %c0_64 = arith.constant 0 : index
    %90 = vector.load %arg8[%c0_63, %c0_64] : memref<8x128xf32, #tpu.memory_space<vmem>>, vector<8x128xf32>
    tpu.vector_store %arg8[%c0_63, %c0_64], %89 {strides = array<i32>} : memref<8x128xf32, #tpu.memory_space<vmem>>, vector<8x128xf32>,
    return
  }
  func.func @transform_0(%arg0: i32) -> (i32, i32) {
    %c0_i32 = arith.constant 0 : i32
    %c0_i32_0 = arith.constant 0 : i32
    return %c0_i32, %arg0 : i32, i32
  }
  func.func @transform_1(%arg0: i32) -> (i32, i32) {
    %c0_i32 = arith.constant 0 : i32
    %c0_i32_0 = arith.constant 0 : i32
    %c0_i32_1 = arith.constant 0 : i32
    return %c0_i32, %c0_i32_0 : i32, i32
  }
  func.func @transform_2(%arg0: i32) -> (i32, i32) {
    %c0_i32 = arith.constant 0 : i32
    %c0_i32_0 = arith.constant 0 : i32
    %c0_i32_1 = arith.constant 0 : i32
    return %c0_i32, %c0_i32_0 : i32, i32
  }
  func.func @transform_3(%arg0: i32) -> (i32, i32, i32) {
    %c0_i32 = arith.constant 0 : i32
    %c0_i32_0 = arith.constant 0 : i32
    %c0_i32_1 = arith.constant 0 : i32
    %c0_i32_2 = arith.constant 0 : i32
    return %c0_i32, %c0_i32_0, %c0_i32_1 : i32, i32, i32
  }
  func.func @transform_4(%arg0: i32) -> (i32, i32, i32) {
    %c0_i32 = arith.constant 0 : i32
    %c0_i32_0 = arith.constant 0 : i32
    %c0_i32_1 = arith.constant 0 : i32
    %c0_i32_2 = arith.constant 0 : i32
    return %c0_i32, %c0_i32_0, %c0_i32_1 : i32, i32, i32
  }
  func.func @transform_5(%arg0: i32) -> (i32, i32) {
    %c0_i32 = arith.constant 0 : i32
    %c0_i32_0 = arith.constant 0 : i32
    %c0_i32_1 = arith.constant 0 : i32
    return %c0_i32, %c0_i32_0 : i32, i32
  }
  func.func @transform_6(%arg0: i32) -> (i32, i32) {
    %c0_i32 = arith.constant 0 : i32
    %c0_i32_0 = arith.constant 0 : i32
    %c0_i32_1 = arith.constant 0 : i32
    return %c0_i32, %c0_i32_0 : i32, i32
  }
  func.func @transform_7(%arg0: i32) -> (i32, i32) {
    %c0_i32 = arith.constant 0 : i32
    %c0_i32_0 = arith.constant 0 : i32
    return %c0_i32, %arg0 : i32, i32
  }
}

</mosaic_0001>

<bundles_post_ra>
// kernel: tpu_custom_call.1
= control target key start
LH: loop header
LB: loop body
LE: loop exit
PB: predicated region body
PF: predicated region fallthrough
CT: control target
= control target key end

     0   :  { %v6541_v3 = vmov 0   ;;  %s9932_s0 = inlined_call_operand.vmem [shape: bf16[32,128], index: 0, kind: input, shape index: {}]   ;;  %s9933_s1 = inlined_call_operand.vmem [shape: bf16[256,32], index: 1, kind: input, shape index: {}]   ;;  %s9934_s2 = inlined_call_operand.vmem [shape: f32[256,1], index: 2, kind: input, shape index: {}]   ;;  %s9935_s3 = inlined_call_operand.vmem [shape: bf16[7,256,256], index: 3, kind: input, shape index: {}]   ;;  %s9936_s4 = inlined_call_operand.vmem [shape: f32[7,256,1], index: 4, kind: input, shape index: {}]   ;;  %s9937_s5 = inlined_call_operand.vmem [shape: bf16[8,256], index: 5, kind: input, shape index: {}]   ;;  %s9938_s6 = inlined_call_operand.vmem [shape: f32[8,1], index: 6, kind: input, shape index: {}]   ;;  %s9939_s7 = inlined_call_operand.hbm [shape: f32[8,128], index: 7, kind: output, shape index: {}]  }
   0x1   :  { %v94_v0 = vld [vmem:[%s9934_s2 + $0xf0] sm:$0xff]  ;;  %v92_v1 = vld [vmem:[%s9934_s2 + $0xe0] sm:$0xff]  ;;  %6510 = vset.pattern.permute.xlu2 %v6541_v3  ;;  %6509 = vset.pattern.permute.xlu1 %v6541_v3  ;;  %v6263_v4 = vld [vmem:[%s9932_s0 + $0x8] sm:$0xff] }
   0x2   :  { %v78_v2 = vld [vmem:[%s9934_s2 + $0x70] sm:$0xff]  ;;  %6508 = vset.pattern.permute.xlu0 %v6541_v3  ;;  %238 = vperm.xlu2 %6510, %v92_v1   ;;  %v6262_v5 = vld [vmem:[%s9932_s0] sm:$0xff] }
   0x3   :  { %248 = vperm.xlu0 %6508, %v94_v0   ;;  %168 = vperm.xlu1 %6509, %v78_v2  }
   0x4   :  { %403 = vmatpush.bf16.msra.mxu0 %v6263_v4  ;;  %6488 = vmatpush.bf16.msra.mxu3 %v6263_v4 }
   0x5   :  { %12 = vsyncpa [#allocation3], 0  ;;  %v93_v6 = vld [vmem:[%s9934_s2 + $0xe8] sm:$0xff]  ;;  %v95_v7 = vld [vmem:[%s9934_s2 + $0xf8] sm:$0xff]  ;;  %vm348_vm0 = vcmask 261120   ;;  %s4869_s25 = sshll.u32 %s9939_s7, 4  ;;  %s4870_s25 = int_to_ptr.hbm [resolvable:$true] %s4869_s25 }
   0x6   :  { %v79_v8 = vld [vmem:[%s9934_s2 + $0x78] sm:$0xff]  ;;  %v6246_v9 = vld [vmem:[%s9933_s1] sm:$0xff]  ;;  %v90_v10 = vld [vmem:[%s9934_s2 + $0xd0] sm:$0xff] }
   0x7   :  { %v77_v11 = vld [vmem:[%s9934_s2 + $0x68] sm:$0xff]  ;;  %v76_v12 = vld [vmem:[%s9934_s2 + $0x60] sm:$0xff]  ;;  %v75_v13 = vld [vmem:[%s9934_s2 + $0x58] sm:$0xff] }
   0x8   :  { %404 = vmatpush.bf16.msra.mxu0 %v6262_v5  ;;  %6489 = vmatpush.bf16.msra.mxu3 %v6262_v5  ;;  %v91_v14 = vld [vmem:[%s9934_s2 + $0xd8] sm:$0xff]  ;;  %v74_v15 = vld [vmem:[%s9934_s2 + $0x50] sm:$0xff]  ;;  %v6247_v16 = vld [vmem:[%s9933_s1 + $0x8] sm:$0xff] }
   0x9   :  { %v72_v17 = vld [vmem:[%s9934_s2 + $0x40] sm:$0xff]  ;;  %v89_v19 = vld [vmem:[%s9934_s2 + $0xc8] sm:$0xff]  ;;  %v87_v20 = vld [vmem:[%s9934_s2 + $0xb8] sm:$0xff] }
   0xa   :  { %243 = vperm.xlu2 %6510, %v93_v6   ;;  %v88_v18 = vld [vmem:[%s9934_s2 + $0xc0] sm:$0xff]  ;;  %v86_v21 = vld [vmem:[%s9934_s2 + $0xb0] sm:$0xff]  ;;  %v73_v22 = vld [vmem:[%s9934_s2 + $0x48] sm:$0xff] }
   0xb   :  { %253 = vperm.xlu0 %6508, %v95_v7   ;;  %173 = vperm.xlu1 %6509, %v79_v8   ;;  %v6248_v23 = vld [vmem:[%s9933_s1 + $0x10] sm:$0xff]  ;;  %v84_v24 = vld [vmem:[%s9934_s2 + $0xa0] sm:$0xff]  ;;  %v71_v25 = vld [vmem:[%s9934_s2 + $0x38] sm:$0xff] }
   0xc   :  { %4950 = vmatmul.msk.bf16.vlgmr.msra.gmra.mxu0 %vm348_vm0, %v6246_v9  ;;  %v70_v26 = vld [vmem:[%s9934_s2 + $0x30] sm:$0xff]  ;;  %v69_v27 = vld [vmem:[%s9934_s2 + $0x28] sm:$0xff]  ;;  %v68_v29 = vld [vmem:[%s9934_s2 + $0x20] sm:$0xff] }
   0xd   :  { %v85_v28 = vld [vmem:[%s9934_s2 + $0xa8] sm:$0xff]  ;;  %v6249_v30 = vld [vmem:[%s9933_s1 + $0x18] sm:$0xff]  ;;  %v66_v31 = vld [vmem:[%s9934_s2 + $0x10] sm:$0xff] }
   0xe   :  { %v82_v32 = vld [vmem:[%s9934_s2 + $0x90] sm:$0xff]  ;;  %v83_v33 = vld [vmem:[%s9934_s2 + $0x98] sm:$0xff]  ;;  %v81_v34 = vld [vmem:[%s9934_s2 + $0x88] sm:$0xff] }
   0xf   :  { %v80_v35 = vld [vmem:[%s9934_s2 + $0x80] sm:$0xff]  ;;  %v67_v36 = vld [vmem:[%s9934_s2 + $0x18] sm:$0xff]  ;;  %v580_v38 = vld [vmem:[%s9936_s4 + $0x70] sm:$0xff] }
  0x10   :  { %v6250_v37 = vld [vmem:[%s9933_s1 + $0x20] sm:$0xff]  ;;  %v65_v39 = vld [vmem:[%s9934_s2 + $0x8] sm:$0xff]  ;;  %v581_v43 = vld [vmem:[%s9936_s4 + $0x78] sm:$0xff] }
  0x11   :  { %v64_v40 = vld [vmem:[%s9934_s2] sm:$0xff]  ;;  %v579_v41 = vld [vmem:[%s9936_s4 + $0x68] sm:$0xff]  ;;  %v596_v45 = vld [vmem:[%s9936_s4 + $0xf0] sm:$0xff] }
  0x12   :  { %228 = vperm.xlu2 %6510, %v90_v10   ;;  %v578_v42 = vld [vmem:[%s9936_s4 + $0x60] sm:$0xff]  ;;  %v6251_v44 = vld [vmem:[%s9933_s1 + $0x28] sm:$0xff]  ;;  %v577_v46 = vld [vmem:[%s9936_s4 + $0x58] sm:$0xff] }
  0x13   :  { %163 = vperm.xlu1 %6509, %v77_v11   ;;  %158 = vperm.xlu0 %6508, %v76_v12   ;;  %v576_v47 = vld [vmem:[%s9936_s4 + $0x50] sm:$0xff]  ;;  %v575_v48 = vld [vmem:[%s9936_s4 + $0x48] sm:$0xff]  ;;  %v574_v50 = vld [vmem:[%s9936_s4 + $0x40] sm:$0xff] }
  0x14   :  { %v597_v51 = vld [vmem:[%s9936_s4 + $0xf8] sm:$0xff]  ;;  %v6252_v52 = vld [vmem:[%s9933_s1 + $0x30] sm:$0xff]  ;;  %v595_v55 = vld [vmem:[%s9936_s4 + $0xe8] sm:$0xff] }
  0x15   :  { %v6260_v53 = vld [vmem:[%s9933_s1 + $0x70] sm:$0xff]  ;;  %v594_v56 = vld [vmem:[%s9936_s4 + $0xe0] sm:$0xff]  ;;  %v593_v60 = vld [vmem:[%s9936_s4 + $0xd8] sm:$0xff] }
  0x16   :  { %4964 = vmatmul.msk.bf16.vlgmr.msra.gmra.mxu3 %vm348_vm0, %v6260_v53  ;;  %v572_v54 = vld [vmem:[%s9936_s4 + $0x30] sm:$0xff]  ;;  %v573_v62 = vld [vmem:[%s9936_s4 + $0x38] sm:$0xff]  ;;  %v590_v4 = vld [vmem:[%s9936_s4 + $0xc0] sm:$0xff] }
  0x17   :  { %v592_v61 = vld [vmem:[%s9936_s4 + $0xd0] sm:$0xff]  ;;  %v6253_v63 = vld [vmem:[%s9933_s1 + $0x38] sm:$0xff]  ;;  %v571_v5 = vld [vmem:[%s9936_s4 + $0x28] sm:$0xff] }
  0x18   :  { %v6261_v1 = vld [vmem:[%s9933_s1 + $0x78] sm:$0xff]  ;;  %v570_v6 = vld [vmem:[%s9936_s4 + $0x20] sm:$0xff]  ;;  %v568_v11 = vld [vmem:[%s9936_s4 + $0x10] sm:$0xff] }
  0x19   :  { %v569_v10 = vld [vmem:[%s9936_s4 + $0x18] sm:$0xff]  ;;  %v591_v12 = vld [vmem:[%s9936_s4 + $0xc8] sm:$0xff] }
  0x1a   :  { %153 = vperm.xlu2 %6510, %v75_v13   ;;  %v6254_v13 = vld [vmem:[%s9933_s1 + $0x40] sm:$0xff] }
  0x1b   :  { %233 = vperm.xlu0 %6508, %v91_v14   ;;  %148 = vperm.xlu1 %6509, %v74_v15  }
  0x1c   :  { %4951 = vmatmul.msk.bf16.gmra.mxu0 %vm348_vm0, %v6247_v16 }
  0x22   :  { %138 = vperm.xlu2 %6510, %v72_v17   ;;  %v566_v17 = vld [vmem:[%s9936_s4] sm:$0xff] }
  0x23   :  { %218 = vperm.xlu0 %6508, %v88_v18   ;;  %223 = vperm.xlu1 %6509, %v89_v19   ;;  %v589_v19 = vld [vmem:[%s9936_s4 + $0xb8] sm:$0xff] }
  0x26   :  { %4965 = vmatmul.msk.bf16.gmra.mxu3 %vm348_vm0, %v6261_v1 }
  0x2a   :  { %213 = vperm.xlu2 %6510, %v87_v20   ;;  %v588_v20 = vld [vmem:[%s9936_s4 + $0xb0] sm:$0xff] }
  0x2b   :  { %208 = vperm.xlu1 %6509, %v86_v21   ;;  %143 = vperm.xlu0 %6508, %v73_v22  }
  0x2c   :  { %4952 = vmatmul.msk.bf16.gmra.mxu0 %vm348_vm0, %v6248_v23 }
  0x32   :  { %198 = vperm.xlu2 %6510, %v84_v24   ;;  %v587_v24 = vld [vmem:[%s9936_s4 + $0xa8] sm:$0xff] }
  0x33   :  { %133 = vperm.xlu1 %6509, %v71_v25   ;;  %128 = vperm.xlu0 %6508, %v70_v26   ;;  %v586_v25 = vld [vmem:[%s9936_s4 + $0xa0] sm:$0xff]  ;;  %v567_v26 = vld [vmem:[%s9936_s4 + $0x8] sm:$0xff] }
  0x3a   :  { %123 = vperm.xlu2 %6510, %v69_v27   ;;  %v6255_v27 = vld [vmem:[%s9933_s1 + $0x48] sm:$0xff] }
  0x3b   :  { %203 = vperm.xlu0 %6508, %v85_v28   ;;  %118 = vperm.xlu1 %6509, %v68_v29  }
  0x3c   :  { %4953 = vmatmul.msk.bf16.gmra.mxu0 %vm348_vm0, %v6249_v30 }
  0x42   :  { %108 = vperm.xlu2 %6510, %v66_v31  }
  0x43   :  { %188 = vperm.xlu0 %6508, %v82_v32   ;;  %193 = vperm.xlu1 %6509, %v83_v33   ;;  %v582_v32 = vld [vmem:[%s9936_s4 + $0x80] sm:$0xff]  ;;  %v585_v33 = vld [vmem:[%s9936_s4 + $0x98] sm:$0xff] }
  0x4a   :  { %183 = vperm.xlu2 %6510, %v81_v34   ;;  %v584_v34 = vld [vmem:[%s9936_s4 + $0x90] sm:$0xff] }
  0x4b   :  { %178 = vperm.xlu1 %6509, %v80_v35   ;;  %113 = vperm.xlu0 %6508, %v67_v36  }
  0x4c   :  { %4954 = vmatmul.msk.bf16.gmra.mxu0 %vm348_vm0, %v6250_v37 }
  0x52   :  { %670 = vperm.xlu2 %6510, %v580_v38  }
  0x53   :  { %103 = vperm.xlu1 %6509, %v65_v39   ;;  %98 = vperm.xlu0 %6508, %v64_v40   ;;  %v5157_v39 = vld [vmem:[%s9936_s4 + $0x1f8] sm:$0xff]  ;;  %v5156_v40 = vld [vmem:[%s9936_s4 + $0x1f0] sm:$0xff] }
  0x5a   :  { %665 = vperm.xlu2 %6510, %v579_v41   ;;  %v583_v41 = vld [vmem:[%s9936_s4 + $0x88] sm:$0xff] }
  0x5b   :  { %660 = vperm.xlu1 %6509, %v578_v42   ;;  %675 = vperm.xlu0 %6508, %v581_v43   ;;  %v6256_v42 = vld [vmem:[%s9933_s1 + $0x50] sm:$0xff] }
  0x5c   :  { %4955 = vmatmul.msk.bf16.gmra.mxu0 %vm348_vm0, %v6251_v44  ;;  %v6733_v49 = vpop.permute.xlu2 %238 }
  0x62   :  { %750 = vperm.xlu2 %6510, %v596_v45  }
  0x63   :  { %655 = vperm.xlu1 %6509, %v577_v46   ;;  %650 = vperm.xlu0 %6508, %v576_v47   ;;  %v5154_v47 = vld [vmem:[%s9936_s4 + $0x1e0] sm:$0xff] }
  0x64   :  { %v6758_v57 = vpop.permute.xlu2 %243 }
  0x6a   :  { %645 = vperm.xlu2 %6510, %v575_v48   ;;  %v5141_v48 = vld [vmem:[%s9936_s4 + $0x178] sm:$0xff] }
  0x6b   :  { %640 = vperm.xlu1 %6509, %v574_v50   ;;  %755 = vperm.xlu0 %6508, %v597_v51   ;;  %v5140_v50 = vld [vmem:[%s9936_s4 + $0x170] sm:$0xff] }
  0x6c   :  { %4956 = vmatmul.msk.bf16.gmra.mxu0 %vm348_vm0, %v6252_v52  ;;  %v6776_v0 = vpop.permute.xlu2 %228 }
  0x72   :  { %630 = vperm.xlu2 %6510, %v572_v54   ;;  %v5139_v54 = vld [vmem:[%s9936_s4 + $0x168] sm:$0xff] }
  0x73   :  { %745 = vperm.xlu1 %6509, %v595_v55   ;;  %740 = vperm.xlu0 %6508, %v594_v56   ;;  %v5138_v55 = vld [vmem:[%s9936_s4 + $0x160] sm:$0xff]  ;;  %v5155_v56 = vld [vmem:[%s9936_s4 + $0x1e8] sm:$0xff] }
  0x74   :  { %v6800_v9 = vpop.permute.xlu2 %153 }
  0x75   :  { %v6760_v58 = vpop.permute.xlu0 %248  ;;  %v6762_v59 = vpop.permute.xlu1 %168 }
  0x7a   :  { %735 = vperm.xlu2 %6510, %v593_v60   ;;  %v6257_v60 = vld [vmem:[%s9933_s1 + $0x58] sm:$0xff] }
  0x7b   :  { %730 = vperm.xlu1 %6509, %v592_v61   ;;  %635 = vperm.xlu0 %6508, %v573_v62  }
  0x7c   :  { %4957 = vmatmul.msk.bf16.gmra.mxu0 %vm348_vm0, %v6253_v63  ;;  %v6824_v18 = vpop.permute.xlu2 %138 }
  0x7d   :  { %v6782_v2 = vpop.permute.xlu0 %253  ;;  %v6784_v3 = vpop.permute.xlu1 %173 }
  0x82   :  { %720 = vperm.xlu2 %6510, %v590_v4  }
  0x83   :  { %625 = vperm.xlu1 %6509, %v571_v5   ;;  %620 = vperm.xlu0 %6508, %v570_v6   ;;  %v5136_v6 = vld [vmem:[%s9936_s4 + $0x150] sm:$0xff] }
  0x84   :  { %v6850_v29 = vpop.permute.xlu2 %213 }
  0x85   :  { %v6796_v7 = vpop.permute.xlu1 %163  ;;  %v6798_v8 = vpop.permute.xlu0 %158 }
  0x89   :  { %v6814_v14 = vpop.f32.mrf.mxu0 }
  0x8a   :  { %615 = vperm.xlu2 %6510, %v569_v10  }
  0x8b   :  { %610 = vperm.xlu1 %6509, %v568_v11   ;;  %725 = vperm.xlu0 %6508, %v591_v12   ;;  %v5153_v12 = vld [vmem:[%s9936_s4 + $0x1d8] sm:$0xff] }
  0x8c   :  { %4958 = vmatmul.msk.bf16.gmra.mxu0 %vm348_vm0, %v6254_v13  ;;  %v6866_v36 = vpop.permute.xlu2 %198  ;;  %v5152_v13 = vld [vmem:[%s9936_s4 + $0x1d0] sm:$0xff] }
  0x8d   :  { %v6817_v15 = vpop.permute.xlu0 %233  ;;  %v6819_v16 = vpop.permute.xlu1 %148 }
  0x91   :  { %v6832_v21 = vpop.f32.mrf.mxu0 }
  0x92   :  { %600 = vperm.xlu2 %6510, %v566_v17  }
  0x93   :  { %715 = vperm.xlu1 %6509, %v589_v19   ;;  %710 = vperm.xlu0 %6508, %v588_v20  }
  0x94   :  { %v6891_v46 = vpop.permute.xlu2 %123 }
  0x95   :  { %v6834_v22 = vpop.permute.xlu0 %218  ;;  %v6836_v23 = vpop.permute.xlu1 %223 }
  0x99   :  { %v411_v28 = vpop.f32.mrf.mxu0 }
  0x9a   :  { %705 = vperm.xlu2 %6510, %v587_v24  }
  0x9b   :  { %700 = vperm.xlu1 %6509, %v586_v25   ;;  %605 = vperm.xlu0 %6508, %v567_v26  }
  0x9c   :  { %4959 = vmatmul.msk.bf16.gmra.mxu0 %vm348_vm0, %v6255_v27  ;;  %v109_v61 = vpop.permute.xlu2 %108  ;;  %v5151_v27 = vld [vmem:[%s9936_s4 + $0x1c8] sm:$0xff] }
  0x9d   :  { %v6853_v30 = vpop.permute.xlu1 %208  ;;  %v6855_v31 = vpop.permute.xlu0 %143  ;;  %v412_v63 = vadd.f32 %v411_v28, %v109_v61  ;;  %v5146_v61 = vld [vmem:[%s9936_s4 + $0x1a0] sm:$0xff] }
  0x9f   :  { %v488_v10 = vmax.f32 %v412_v63, 0.0 }
  0xa1   :  { %v413_v35 = vpop.f32.mrf.mxu0 }
  0xa2   :  { %680 = vperm.xlu2 %6510, %v582_v32  }
  0xa3   :  { %695 = vperm.xlu1 %6509, %v585_v33   ;;  %690 = vperm.xlu0 %6508, %v584_v34   ;;  %v5150_v33 = vld [vmem:[%s9936_s4 + $0x1c0] sm:$0xff]  ;;  %v5137_v34 = vld [vmem:[%s9936_s4 + $0x158] sm:$0xff] }
  0xa5   :  { %v6868_v37 = vpop.permute.xlu1 %133  ;;  %v6870_v38 = vpop.permute.xlu0 %128 }
  0xa9   :  { %v6884_v43 = vpop.f32.mrf.mxu0 }
  0xaa   :  { %1367 = vperm.xlu2 %6510, %v5157_v39   ;;  %v5148_v39 = vld [vmem:[%s9936_s4 + $0x1b0] sm:$0xff] }
  0xab   :  { %1362 = vperm.xlu1 %6509, %v5156_v40   ;;  %685 = vperm.xlu0 %6508, %v583_v41   ;;  %v5135_v40 = vld [vmem:[%s9936_s4 + $0x148] sm:$0xff]  ;;  %v5134_v41 = vld [vmem:[%s9936_s4 + $0x140] sm:$0xff] }
  0xac   :  { %4960 = vmatmul.msk.bf16.gmra.mxu0 %vm348_vm0, %v6256_v42 }
  0xad   :  { %v6887_v44 = vpop.permute.xlu0 %203  ;;  %v6889_v45 = vpop.permute.xlu1 %118 }
  0xb1   :  { %v6902_v51 = vpop.f32.mrf.mxu0 }
  0xb2   :  { %1352 = vperm.xlu2 %6510, %v5154_v47   ;;  %v5133_v47 = vld [vmem:[%s9936_s4 + $0x138] sm:$0xff] }
  0xb3   :  { %1287 = vperm.xlu1 %6509, %v5141_v48   ;;  %1282 = vperm.xlu0 %6508, %v5140_v50   ;;  %v5132_v48 = vld [vmem:[%s9936_s4 + $0x130] sm:$0xff]  ;;  %v5149_v50 = vld [vmem:[%s9936_s4 + $0x1b8] sm:$0xff] }
  0xb5   :  { %v6904_v52 = vpop.permute.xlu0 %188  ;;  %v6906_v53 = vpop.permute.xlu1 %193 }
  0xb9   :  { %v6920_v62 = vpop.f32.mrf.mxu0 }
  0xba   :  { %1277 = vperm.xlu2 %6510, %v5139_v54   ;;  %v6259_v54 = vld [vmem:[%s9933_s1 + $0x68] sm:$0xff] }
  0xbb   :  { %1272 = vperm.xlu1 %6509, %v5138_v55   ;;  %1357 = vperm.xlu0 %6508, %v5155_v56   ;;  %v5130_v56 = vld [vmem:[%s9936_s4 + $0x120] sm:$0xff] }
  0xbc   :  { %4961 = vmatmul.msk.bf16.gmra.mxu0 %vm348_vm0, %v6257_v60  ;;  %v5147_v60 = vld [vmem:[%s9936_s4 + $0x1a8] sm:$0xff] }
  0xbd   :  { %v6923_v1 = vpop.permute.xlu1 %178  ;;  %v114_v4 = vpop.permute.xlu0 %113 }
  0xbe   :  { %v414_v5 = vadd.f32 %v413_v35, %v114_v4  ;;  %v5145_v4 = vld [vmem:[%s9936_s4 + $0x198] sm:$0xff] }
  0xc0   :  { %v489_v11 = vmax.f32 %v414_v5, 0.0  ;;  %v5144_v5 = vld [vmem:[%s9936_s4 + $0x190] sm:$0xff] }
  0xc1   :  { %v6934_v17 = vpop.f32.mrf.mxu0 }
  0xc2   :  { %1262 = vperm.xlu2 %6510, %v5136_v6   ;;  %v6936_v19 = vpack.c.bf16 %v489_v11, %v488_v10  ;;  %v5131_v6 = vld [vmem:[%s9936_s4 + $0x128] sm:$0xff]  ;;  %v5142_v11 = vld [vmem:[%s9936_s4 + $0x180] sm:$0xff] }
  0xc3   :  { %1347 = vperm.xlu1 %6509, %v5153_v12   ;;  %1342 = vperm.xlu0 %6508, %v5152_v13   ;;  %v5129_v12 = vld [vmem:[%s9936_s4 + $0x118] sm:$0xff]  ;;  %v5128_v13 = vld [vmem:[%s9936_s4 + $0x110] sm:$0xff] }
  0xc5   :  { %v104_v20 = vpop.permute.xlu1 %103  ;;  %v99_v24 = vpop.permute.xlu0 %98 }
  0xc6   :  { %v409_v25 = vadd.f32 %v6832_v21, %v104_v20  ;;  %v407_v26 = vadd.f32 %v6814_v14, %v99_v24  ;;  %v6258_v21 = vld [vmem:[%s9933_s1 + $0x60] sm:$0xff]  ;;  %v476_v24 = vpop.f32.mrf.mxu3 }
  0xc8   :  { %v487_v28 = vmax.f32 %v409_v25, 0.0  ;;  %v486_v32 = vmax.f32 %v407_v26, 0.0  ;;  %v5127_v25 = vld [vmem:[%s9936_s4 + $0x108] sm:$0xff]  ;;  %v5126_v26 = vld [vmem:[%s9936_s4 + $0x100] sm:$0xff] }
  0xc9   :  { %v6952_v35 = vpop.f32.mrf.mxu0 }
  0xca   :  { %1337 = vperm.xlu2 %6510, %v5151_v27   ;;  %v6954_v14 = vpack.c.bf16 %v487_v28, %v486_v32  ;;  %v5143_v27 = vld [vmem:[%s9936_s4 + $0x188] sm:$0xff] }
  0xcb   :  { %1332 = vperm.xlu1 %6509, %v5150_v33   ;;  %1267 = vperm.xlu0 %6508, %v5137_v34   ;;  %v5330_v33 = vld [vmem:[%s9936_s4 + $0x260] sm:$0xff] }
  0xcc   :  { %4962 = vmatmul.msk.bf16.gmra.mxu0 %vm348_vm0, %v6258_v21  ;;  %v5333_v21 = vld [vmem:[%s9936_s4 + $0x278] sm:$0xff] }
  0xce   :  { %v478_v32 = vpop.f32.mrf.mxu3 }
  0xd1   :  { %v6966_v42 = vpop.f32.mrf.mxu0 }
  0xd2   :  { %1322 = vperm.xlu2 %6510, %v5148_v39   ;;  %v5332_v39 = vld [vmem:[%s9936_s4 + $0x270] sm:$0xff] }
  0xd3   :  { %1257 = vperm.xlu1 %6509, %v5135_v40   ;;  %1252 = vperm.xlu0 %6508, %v5134_v41  }
  0xd6   :  { %v481_v41 = vpop.f32.mrf.mxu3 }
  0xd9   :  { %v431_v55 = vpop.f32.mrf.mxu0 }
  0xda   :  { %1247 = vperm.xlu2 %6510, %v5133_v47  }
  0xdb   :  { %1242 = vperm.xlu1 %6509, %v5132_v48   ;;  %1327 = vperm.xlu0 %6508, %v5149_v50  }
  0xdc   :  { %4963 = vmatmul.msk.bf16.gmra.mxu0 %vm348_vm0, %v6259_v54 }
  0xe1   :  { %v433_v63 = vpop.f32.mrf.mxu0 }
  0xe2   :  { %1232 = vperm.xlu2 %6510, %v5130_v56   ;;  %v434_v56 = vadd.f32 %v433_v63, %v6800_v9  ;;  %v5331_v9 = vld [vmem:[%s9936_s4 + $0x268] sm:$0xff] }
  0xe3   :  { %1317 = vperm.xlu1 %6509, %v5147_v60   ;;  %1312 = vperm.xlu0 %6508, %v5146_v61  }
  0xe4   :  { %v497_v63 = vmax.f32 %v434_v56, 0.0  ;;  %v6265_v56 = vld [vmem:[%s9935_s3 + $0x4] sm:$0xf0] }
  0xe9   :  { %v436_v10 = vpop.f32.mrf.mxu0 }
  0xea   :  { %1307 = vperm.xlu2 %6510, %v5145_v4   ;;  %v437_v50 = vadd.f32 %v436_v10, %v6798_v8  ;;  %v482_v4 = vadd.f32 %v481_v41, %v6760_v58  ;;  %v5328_v8 = vld [vmem:[%s9936_s4 + $0x250] sm:$0xff]  ;;  %v429_v58 = vadd.f32 %v6966_v42, %v6855_v31  ;;  %v477_v10 = vadd.f32 %v476_v24, %v6733_v49  ;;  %v5347_v41 = vld [vmem:[%s9936_s4 + $0x2e8] sm:$0xff] }
  0xeb   :  { %1302 = vperm.xlu1 %6509, %v5144_v5   ;;  %1237 = vperm.xlu0 %6508, %v5131_v6   ;;  %v5329_v5 = vld [vmem:[%s9936_s4 + $0x258] sm:$0xff]  ;;  %v424_v49 = vadd.f32 %v6934_v17, %v6868_v37  ;;  %v5348_v37 = vld [vmem:[%s9936_s4 + $0x2f0] sm:$0xff] }
  0xec   :  { %v495_v42 = vmax.f32 %v429_v58, 0.0  ;;  %v5343_v58 = vld [vmem:[%s9936_s4 + $0x2c8] sm:$0xff] }
  0xf1   :  { %v438_v20 = vpop.f32.mrf.mxu0 }
  0xf2   :  { %1292 = vperm.xlu2 %6510, %v5142_v11   ;;  %v439_v47 = vadd.f32 %v438_v20, %v6796_v7  ;;  %v432_v7 = vadd.f32 %v431_v55, %v6819_v16  ;;  %v483_v16 = vpop.f32.mrf.mxu3  ;;  %v479_v11 = vadd.f32 %v478_v32, %v6758_v57  ;;  %v427_v20 = vadd.f32 %v6952_v35, %v6824_v18  ;;  %v5349_v35 = vld [vmem:[%s9936_s4 + $0x2f8] sm:$0xff] }
  0xf3   :  { %1227 = vperm.xlu1 %6509, %v5129_v12   ;;  %1222 = vperm.xlu0 %6508, %v5128_v13   ;;  %v516_v12 = vmax.f32 %v482_v4, 0.0  ;;  %v484_v13 = vadd.f32 %v483_v16, %v6782_v2  ;;  %v5326_v2 = vld [vmem:[%s9936_s4 + $0x240] sm:$0xff]  ;;  %v419_v32 = vadd.f32 %v6902_v51, %v6891_v46  ;;  %v6267_v16 = vld [vmem:[%s9935_s3 + $0x14] sm:$0xf0] }
  0xf4   :  { %v499_v60 = vmax.f32 %v439_v47, 0.0  ;;  %v494_v18 = vmax.f32 %v427_v20, 0.0  ;;  %v5346_v51 = vld [vmem:[%s9936_s4 + $0x2e0] sm:$0xff] }
  0xf5   :  { %v517_v31 = vmax.f32 %v484_v13, 0.0 }
  0xf7   :  { %v565_v57 = vpack.c.bf16 %v517_v31, %v516_v12  ;;  %v5340_v31 = vld [vmem:[%s9936_s4 + $0x2b0] sm:$0xff] }
  0xf9   :  { %v441_v28 = vpop.f32.mrf.mxu0  ;;  %1007 = vmatpush.bf16.msra.mxu2 %v565_v57 }
  0xfa   :  { %1217 = vperm.xlu2 %6510, %v5127_v25   ;;  %v442_v34 = vadd.f32 %v441_v28, %v6762_v59  ;;  %v496_v25 = vmax.f32 %v432_v7, 0.0  ;;  %v422_v28 = vadd.f32 %v6920_v62, %v6870_v38  ;;  %v554_v38 = vpack.c.bf16 %v495_v42, %v494_v18  ;;  %v6295_v18 = vld [vmem:[%s9935_s3 + $0xf4] sm:$0xf0] }
  0xfb   :  { %1212 = vperm.xlu1 %6509, %v5126_v26   ;;  %1297 = vperm.xlu0 %6508, %v5143_v27   ;;  %v514_v26 = vmax.f32 %v477_v10, 0.0  ;;  %v515_v27 = vmax.f32 %v479_v11, 0.0  ;;  %v4976_v10 = vld [vmem:[%s9935_s3 + $0x10] sm:$0xf]  ;;  %v6293_v11 = vld [vmem:[%s9935_s3 + $0xe4] sm:$0xf0] }
  0xfc   :  { %v500_v59 = vmax.f32 %v442_v34, 0.0  ;;  %v555_v24 = vpack.c.bf16 %v497_v63, %v496_v25  ;;  %v417_v34 = vadd.f32 %v6884_v43, %v6889_v45  ;;  %v5327_v43 = vld [vmem:[%s9936_s4 + $0x248] sm:$0xff]  ;;  %v5342_v63 = vld [vmem:[%s9936_s4 + $0x2c0] sm:$0xff]  ;;  %v4977_v13 = vor.u32 %v6267_v16, %v4976_v10  ;;  %v5341_v25 = vld [vmem:[%s9936_s4 + $0x2b8] sm:$0xff] }
  0xfd   :  { %v564_v62 = vpack.c.bf16 %v515_v27, %v514_v26  ;;  %v5319_v26 = vld [vmem:[%s9936_s4 + $0x208] sm:$0xff]  ;;  %v5318_v27 = vld [vmem:[%s9936_s4 + $0x200] sm:$0xff] }
  0xfe   :  { %v490_v46 = vmax.f32 %v417_v34, 0.0 }
  0xff   :  { %1008 = vmatpush.bf16.msra.mxu2 %v564_v62 }
 0x101   :  { %v443_v40 = vpop.f32.mrf.mxu0 }
 0x102   :  { %v444_v48 = vadd.f32 %v443_v40, %v6784_v3  ;;  %1884 = vperm.xlu2 %6510, %v5330_v33   ;;  %v498_v3 = vmax.f32 %v437_v50, 0.0  ;;  %v493_v33 = vmax.f32 %v424_v49, 0.0  ;;  %v5325_v50 = vld [vmem:[%s9936_s4 + $0x238] sm:$0xff] }
 0x103   :  { %1899 = vperm.xlu1 %6509, %v5333_v21   ;;  %1894 = vperm.xlu0 %6508, %v5332_v39   ;;  %v492_v21 = vmax.f32 %v422_v28, 0.0  ;;  %v491_v39 = vmax.f32 %v419_v32, 0.0  ;;  %v5321_v49 = vld [vmem:[%s9936_s4 + $0x218] sm:$0xff]  ;;  %v5088_v28 = vld [vmem:[%s9935_s3 + $0xf0] sm:$0xf] }
 0x104   :  { %v501_v54 = vmax.f32 %v444_v48, 0.0  ;;  %v556_v55 = vpack.c.bf16 %v499_v60, %v498_v3  ;;  %v5344_v48 = vld [vmem:[%s9936_s4 + $0x2d0] sm:$0xff]  ;;  %v5322_v3 = vld [vmem:[%s9936_s4 + $0x220] sm:$0xff]  ;;  %v5089_v32 = vor.u32 %v6295_v18, %v5088_v28 }
 0x105   :  { %v553_v40 = vpack.c.bf16 %v493_v33, %v492_v21  ;;  %v552_v47 = vpack.c.bf16 %v491_v39, %v490_v46  ;;  %v5072_v60 = vld [vmem:[%s9935_s3 + $0xd0] sm:$0xf]  ;;  %v5337_v33 = vld [vmem:[%s9936_s4 + $0x298] sm:$0xff]  ;;  %v5335_v39 = vld [vmem:[%s9936_s4 + $0x288] sm:$0xff] }
 0x106   :  { %v557_v61 = vpack.c.bf16 %v501_v54, %v500_v59  ;;  %v5324_v59 = vld [vmem:[%s9936_s4 + $0x230] sm:$0xff]  ;;  %v4968_v54 = vld [vmem:[%s9935_s3] sm:$0xf]  ;;  %v6271_v46 = vld [vmem:[%s9935_s3 + $0x34] sm:$0xf0] }
 0x107   :  { %v5540_v21 = vld [vmem:[%s9936_s4 + $0x3f0] sm:$0xff] }
 0x108   :  { %918 = vmatpush.bf16.msra.mxu1 %v557_v61  ;;  %6490 = vmatpush.bf16.msrb.mxu3 %v557_v61  ;;  %v6291_v61 = vld [vmem:[%s9935_s3 + $0xd4] sm:$0xf0] }
 0x109   :  { %v7044_v6 = vpop.f32.mrf.mxu0  ;;  %v5073_v7 = vor.u32 %v6291_v61, %v5072_v60  ;;  %v5538_v61 = vld [vmem:[%s9936_s4 + $0x3e0] sm:$0xff] }
 0x10a   :  { %1879 = vperm.xlu2 %6510, %v5329_v5   ;;  %v4969_v5 = vor.u32 %v6265_v56, %v4968_v54  ;;  %v5522_v54 = vld [vmem:[%s9936_s4 + $0x360] sm:$0xff]  ;;  %v5539_v56 = vld [vmem:[%s9936_s4 + $0x3e8] sm:$0xff] }
 0x10b   :  { %1874 = vperm.xlu1 %6509, %v5328_v8   ;;  %1889 = vperm.xlu0 %6508, %v5331_v9   ;;  %v5345_v8 = vld [vmem:[%s9936_s4 + $0x2d8] sm:$0xff] }
 0x10c   :  { %919 = vmatpush.bf16.msra.mxu1 %v556_v55  ;;  %6491 = vmatpush.bf16.msrb.mxu3 %v556_v55  ;;  %v5080_v55 = vld [vmem:[%s9935_s3 + $0xe0] sm:$0xf] }
 0x10d   :  { %v5081_v20 = vor.u32 %v6293_v11, %v5080_v55  ;;  %v5537_v11 = vld [vmem:[%s9936_s4 + $0x3d8] sm:$0xff] }
 0x110   :  { %920 = vmatpush.bf16.msra.mxu1 %v555_v24  ;;  %6492 = vmatpush.bf16.msrb.mxu3 %v555_v24  ;;  %v5338_v24 = vld [vmem:[%s9936_s4 + $0x2a0] sm:$0xff] }
 0x111   :  { %v7064_v17 = vpop.f32.mrf.mxu0 }
 0x112   :  { %1864 = vperm.xlu2 %6510, %v5326_v2   ;;  %v6269_v2 = vld [vmem:[%s9935_s3 + $0x24] sm:$0xf0] }
 0x113   :  { %1979 = vperm.xlu1 %6509, %v5349_v35   ;;  %1974 = vperm.xlu0 %6508, %v5348_v37  }
 0x114   :  { %921 = vmatpush.bf16.msra.mxu1 %v554_v38  ;;  %6493 = vmatpush.bf16.msrb.mxu3 %v554_v38  ;;  %v5336_v38 = vld [vmem:[%s9936_s4 + $0x290] sm:$0xff] }
 0x118   :  { %922 = vmatpush.bf16.msra.mxu1 %v553_v40  ;;  %6494 = vmatpush.bf16.msrb.mxu3 %v553_v40  ;;  %v5334_v40 = vld [vmem:[%s9936_s4 + $0x280] sm:$0xff] }
 0x119   :  { %v7079_v45 = vpop.f32.mrf.mxu0 }
 0x11a   :  { %1969 = vperm.xlu2 %6510, %v5347_v41   ;;  %v4992_v41 = vld [vmem:[%s9935_s3 + $0x30] sm:$0xf] }
 0x11b   :  { %1964 = vperm.xlu1 %6509, %v5346_v51   ;;  %1869 = vperm.xlu0 %6508, %v5327_v43   ;;  %v4993_v43 = vor.u32 %v6271_v46, %v4992_v41  ;;  %v5516_v41 = vld [vmem:[%s9936_s4 + $0x330] sm:$0xff]  ;;  %v5533_v46 = vld [vmem:[%s9936_s4 + $0x3b8] sm:$0xff] }
 0x11c   :  { %923 = vmatpush.bf16.msra.mxu1 %v552_v47  ;;  %6495 = vmatpush.bf16.msrb.mxu3 %v552_v47  ;;  %v5525_v47 = vld [vmem:[%s9936_s4 + $0x378] sm:$0xff] }
 0x120   :  { %924 = vmatpush.bf16.msra.mxu1 %v6936_v19  ;;  %6496 = vmatpush.bf16.msrb.mxu3 %v6936_v19  ;;  %v5323_v19 = vld [vmem:[%s9936_s4 + $0x228] sm:$0xff] }
 0x121   :  { %v7104_v4 = vpop.f32.mrf.mxu0 }
 0x122   :  { %1954 = vperm.xlu2 %6510, %v5344_v48   ;;  %v5524_v48 = vld [vmem:[%s9936_s4 + $0x370] sm:$0xff] }
 0x123   :  { %1859 = vperm.xlu1 %6509, %v5325_v50   ;;  %1854 = vperm.xlu0 %6508, %v5324_v59   ;;  %v5541_v50 = vld [vmem:[%s9936_s4 + $0x3f8] sm:$0xff] }
 0x124   :  { %925 = vmatpush.bf16.msra.mxu1 %v6954_v14  ;;  %6497 = vmatpush.bf16.msrb.mxu3 %v6954_v14  ;;  %v5320_v14 = vld [vmem:[%s9936_s4 + $0x210] sm:$0xff] }
 0x127   :  { %926 = vmatmul.bf16.vlgmr.msra.gmra.mxu1 %v4969_v5  ;;  %991 = vmatmul.bf16.vlgmr.msrb.gmra.mxu3 %v5073_v7  ;;  %v5000_v5 = vld [vmem:[%s9935_s3 + $0x40] sm:$0xf]  ;;  %v6273_v7 = vld [vmem:[%s9935_s3 + $0x44] sm:$0xf0] }
 0x128   :  { %6498 = vmatpush.bf16.msra.mxu3 %v565_v57  ;;  %v4984_v57 = vld [vmem:[%s9935_s3 + $0x20] sm:$0xf] }
 0x129   :  { %v7117_v9 = vpop.f32.mrf.mxu0  ;;  %v4985_v37 = vor.u32 %v6269_v2, %v4984_v57 }
 0x12a   :  { %1849 = vperm.xlu2 %6510, %v5323_v19  }
 0x12b   :  { %1844 = vperm.xlu1 %6509, %v5322_v3   ;;  %1959 = vperm.xlu0 %6508, %v5345_v8  }
 0x12c   :  { %6499 = vmatpush.bf16.msra.mxu3 %v564_v62  ;;  %v5339_v62 = vld [vmem:[%s9936_s4 + $0x2a8] sm:$0xff] }
 0x131   :  { %v7140_v12 = vpop.f32.mrf.mxu0 }
 0x132   :  { %1834 = vperm.xlu2 %6510, %v5320_v14  }
 0x133   :  { %1949 = vperm.xlu1 %6509, %v5343_v58   ;;  %1944 = vperm.xlu0 %6508, %v5342_v63  }
 0x137   :  { %931 = vmatmul.bf16.gmra.mxu1 %v4977_v13  ;;  %996 = vmatmul.bf16.gmra.mxu3 %v5081_v20  ;;  %v459_v13 = vadd.f32 %v7140_v12, %v6887_v44  ;;  %v5534_v44 = vld [vmem:[%s9936_s4 + $0x3c0] sm:$0xff]  ;;  %v5521_v12 = vld [vmem:[%s9936_s4 + $0x358] sm:$0xff] }
 0x139   :  { %v7151_v42 = vpop.f32.mrf.mxu0 }
 0x13a   :  { %1939 = vperm.xlu2 %6510, %v5341_v25  }
 0x13b   :  { %1934 = vperm.xlu1 %6509, %v5340_v31   ;;  %1839 = vperm.xlu0 %6508, %v5321_v49   ;;  %v454_v49 = vadd.f32 %v7104_v4, %v6906_v53  ;;  %v5520_v53 = vld [vmem:[%s9936_s4 + $0x350] sm:$0xff] }
 0x13c   :  { %v5008_v4 = vld [vmem:[%s9935_s3 + $0x50] sm:$0xf] }
 0x13d   :  { %v505_v2 = vmax.f32 %v454_v49, 0.0  ;;  %v6281_v49 = vld [vmem:[%s9935_s3 + $0x84] sm:$0xf0] }
 0x141   :  { %v463_v35 = vpop.f32.mrf.mxu0 }
 0x142   :  { %1924 = vperm.xlu2 %6510, %v5338_v24   ;;  %v464_v10 = vadd.f32 %v463_v35, %v6850_v29  ;;  %v5523_v29 = vld [vmem:[%s9936_s4 + $0x368] sm:$0xff] }
 0x143   :  { %1829 = vperm.xlu1 %6509, %v5319_v26   ;;  %1824 = vperm.xlu0 %6508, %v5318_v27   ;;  %v452_v26 = vadd.f32 %v7079_v45, %v6904_v52  ;;  %v184_v27 = vpop.permute.xlu2 %183  ;;  %v447_v45 = vadd.f32 %v7044_v6, %v6923_v1  ;;  %v5535_v1 = vld [vmem:[%s9936_s4 + $0x3c8] sm:$0xff]  ;;  %v6264_v6 = vld [vmem:[%s9935_s3 + $0x4] sm:$0xf] }
 0x144   :  { %v509_v20 = vmax.f32 %v464_v10, 0.0  ;;  %v449_v57 = vadd.f32 %v7064_v17, %v184_v27  ;;  %v5518_v17 = vld [vmem:[%s9936_s4 + $0x340] sm:$0xff]  ;;  %v5513_v10 = vld [vmem:[%s9936_s4 + $0x318] sm:$0xff]  ;;  %v5712_v27 = vld [vmem:[%s9936_s4 + $0x450] sm:$0xff] }
 0x145   :  { %v504_v18 = vmax.f32 %v452_v26, 0.0  ;;  %v5511_v26 = vld [vmem:[%s9936_s4 + $0x308] sm:$0xff] }
 0x146   :  { %v503_v35 = vmax.f32 %v449_v57, 0.0  ;;  %v5715_v57 = vld [vmem:[%s9936_s4 + $0x468] sm:$0xff] }
 0x147   :  { %936 = vmatmul.bf16.gmra.mxu1 %v4985_v37  ;;  %1001 = vmatmul.bf16.gmra.mxu3 %v5089_v32  ;;  %v559_v37 = vpack.c.bf16 %v505_v2, %v504_v18  ;;  %v5519_v32 = vld [vmem:[%s9936_s4 + $0x348] sm:$0xff]  ;;  %v5714_v2 = vld [vmem:[%s9936_s4 + $0x460] sm:$0xff]  ;;  %v7408_v18 = vpop.permute.xlu0 %675 }
 0x149   :  { %v466_v34 = vpop.f32.mrf.mxu0 }
 0x14a   :  { %1919 = vperm.xlu2 %6510, %v5337_v33   ;;  %v467_v14 = vadd.f32 %v466_v34, %v6834_v22  ;;  %v5536_v22 = vld [vmem:[%s9936_s4 + $0x3d0] sm:$0xff]  ;;  %v502_v33 = vmax.f32 %v447_v45, 0.0  ;;  %v5074_v34 = vld [vmem:[%s9935_s3 + $0xd8] sm:$0xf0]  ;;  %v6283_v45 = vld [vmem:[%s9935_s3 + $0x94] sm:$0xf0] }
 0x14b   :  { %1914 = vperm.xlu1 %6509, %v5336_v38   ;;  %1929 = vperm.xlu0 %6508, %v5339_v62   ;;  %v4970_v38 = vld [vmem:[%s9935_s3 + $0x8] sm:$0xf0]  ;;  %v6290_v62 = vld [vmem:[%s9935_s3 + $0xd4] sm:$0xf] }
 0x151   :  { %v468_v51 = vpop.f32.mrf.mxu0 }
 0x152   :  { %2586 = vperm.xlu2 %6510, %v5540_v21   ;;  %v469_v3 = vadd.f32 %v468_v51, %v6836_v23  ;;  %v510_v23 = vmax.f32 %v467_v14, 0.0  ;;  %v558_v21 = vpack.c.bf16 %v503_v35, %v502_v33  ;;  %v5532_v51 = vld [vmem:[%s9936_s4 + $0x3b0] sm:$0xff]  ;;  %v5713_v33 = vld [vmem:[%s9936_s4 + $0x458] sm:$0xff] }
 0x153   :  { %1909 = vperm.xlu1 %6509, %v5335_v39   ;;  %1904 = vperm.xlu0 %6508, %v5334_v40   ;;  %v4973_v39 = vor.u32 %v6264_v6, %v4970_v38  ;;  %v5077_v40 = vor.u32 %v6290_v62, %v5074_v34  ;;  %v5024_v14 = vld [vmem:[%s9935_s3 + $0x70] sm:$0xf]  ;;  %v7429_v62 = vpop.permute.xlu0 %650 }
 0x154   :  { %v511_v16 = vmax.f32 %v469_v3, 0.0  ;;  %v5528_v3 = vld [vmem:[%s9936_s4 + $0x390] sm:$0xff] }
 0x156   :  { %v562_v25 = vpack.c.bf16 %v511_v16, %v510_v23  ;;  %v5512_v16 = vld [vmem:[%s9936_s4 + $0x310] sm:$0xff] }
 0x157   :  { %941 = vmatmul.bf16.gmra.mxu1 %v4993_v43  ;;  %v5016_v43 = vld [vmem:[%s9935_s3 + $0x60] sm:$0xf]  ;;  %v6294_v23 = vld [vmem:[%s9935_s3 + $0xf4] sm:$0xf] }
 0x159   :  { %v471_v59 = vpop.f32.mrf.mxu0 }
 0x15a   :  { %2511 = vperm.xlu2 %6510, %v5525_v47   ;;  %v472_v60 = vadd.f32 %v471_v59, %v6776_v0  ;;  %v5001_v0 = vor.u32 %v6273_v7, %v5000_v5  ;;  %v6277_v47 = vld [vmem:[%s9935_s3 + $0x64] sm:$0xf0]  ;;  %v5530_v59 = vld [vmem:[%s9936_s4 + $0x3a0] sm:$0xff]  ;;  %v5082_v5 = vld [vmem:[%s9935_s3 + $0xe8] sm:$0xf0] }
 0x15b   :  { %2506 = vperm.xlu1 %6509, %v5524_v48   ;;  %2591 = vperm.xlu0 %6508, %v5541_v50   ;;  %v5017_v48 = vor.u32 %v6277_v47, %v5016_v43  ;;  %v5531_v50 = vld [vmem:[%s9936_s4 + $0x3a8] sm:$0xff] }
 0x15c   :  { %v512_v58 = vmax.f32 %v472_v60, 0.0  ;;  %v4978_v60 = vld [vmem:[%s9935_s3 + $0x18] sm:$0xf0] }
 0x161   :  { %v473_v19 = vpop.f32.mrf.mxu0 }
 0x162   :  { %v474_v8 = vadd.f32 %v473_v19, %v6817_v15  ;;  %2496 = vperm.xlu2 %6510, %v5522_v54   ;;  %v462_v15 = vadd.f32 %v7151_v42, %v6853_v30  ;;  %v457_v30 = vadd.f32 %v7117_v9, %v6866_v36  ;;  %v507_v42 = vmax.f32 %v459_v13, 0.0  ;;  %v6275_v9 = vld [vmem:[%s9935_s3 + $0x54] sm:$0xf0] }
 0x163   :  { %2581 = vperm.xlu1 %6509, %v5539_v56   ;;  %2576 = vperm.xlu0 %6508, %v5538_v61   ;;  %v5009_v28 = vor.u32 %v6275_v9, %v5008_v4  ;;  %v5517_v54 = vld [vmem:[%s9936_s4 + $0x338] sm:$0xff]  ;;  %v6266_v56 = vld [vmem:[%s9935_s3 + $0x14] sm:$0xf]  ;;  %v6292_v61 = vld [vmem:[%s9935_s3 + $0xe4] sm:$0xf] }
 0x164   :  { %v513_v63 = vmax.f32 %v474_v8, 0.0  ;;  %v508_v31 = vmax.f32 %v462_v15, 0.0  ;;  %v506_v36 = vmax.f32 %v457_v30, 0.0  ;;  %v4981_v7 = vor.u32 %v6266_v56, %v4978_v60  ;;  %v5515_v8 = vld [vmem:[%s9936_s4 + $0x328] sm:$0xff]  ;;  %v5526_v30 = vld [vmem:[%s9936_s4 + $0x380] sm:$0xff] }
 0x165   :  { %v5085_v19 = vor.u32 %v6292_v61, %v5082_v5  ;;  %v4986_v15 = vld [vmem:[%s9935_s3 + $0x28] sm:$0xf0]  ;;  %v6274_v60 = vld [vmem:[%s9935_s3 + $0x54] sm:$0xf]  ;;  %v5010_v61 = vld [vmem:[%s9935_s3 + $0x58] sm:$0xf0] }
 0x166   :  { %v563_v55 = vpack.c.bf16 %v513_v63, %v512_v58  ;;  %v561_v24 = vpack.c.bf16 %v509_v20, %v508_v31  ;;  %v560_v52 = vpack.c.bf16 %v507_v42, %v506_v36  ;;  %v6279_v58 = vld [vmem:[%s9935_s3 + $0x74] sm:$0xf0]  ;;  %v5510_v20 = vld [vmem:[%s9936_s4 + $0x300] sm:$0xff]  ;;  %v6270_v36 = vld [vmem:[%s9935_s3 + $0x34] sm:$0xf] }
 0x167   :  { %946 = vmatmul.bf16.gmra.mxu1 %v5001_v0  ;;  %v5514_v0 = vld [vmem:[%s9936_s4 + $0x320] sm:$0xff]  ;;  %v5025_v63 = vor.u32 %v6279_v58, %v5024_v14  ;;  %v5731_v56 = vld [vmem:[%s9936_s4 + $0x4e8] sm:$0xff]  ;;  %v5729_v14 = vld [vmem:[%s9936_s4 + $0x4d8] sm:$0xff] }
 0x168   :  { %1009 = vmatpush.bf16.msra.mxu2 %v563_v55  ;;  %6500 = vmatpush.bf16.msra.mxu3 %v563_v55  ;;  %v5529_v55 = vld [vmem:[%s9936_s4 + $0x398] sm:$0xff]  ;;  %v5032_v31 = vld [vmem:[%s9935_s3 + $0x80] sm:$0xf]  ;;  %v5728_v58 = vld [vmem:[%s9936_s4 + $0x4d0] sm:$0xff] }
 0x169   :  { %v5033_v42 = vor.u32 %v6281_v49, %v5032_v31 }
 0x16a   :  { %2571 = vperm.xlu2 %6510, %v5537_v11   ;;  %v6268_v11 = vld [vmem:[%s9935_s3 + $0x24] sm:$0xf] }
 0x16b   :  { %2566 = vperm.xlu1 %6509, %v5536_v22   ;;  %2501 = vperm.xlu0 %6508, %v5523_v29   ;;  %v5090_v22 = vld [vmem:[%s9935_s3 + $0xf8] sm:$0xf0]  ;;  %v4989_v29 = vor.u32 %v6268_v11, %v4986_v15 }
 0x16c   :  { %1010 = vmatpush.bf16.msra.mxu2 %v562_v25  ;;  %6501 = vmatpush.bf16.msra.mxu3 %v562_v25  ;;  %v5093_v13 = vor.u32 %v6294_v23, %v5090_v22  ;;  %v5527_v25 = vld [vmem:[%s9936_s4 + $0x388] sm:$0xff]  ;;  %v5726_v22 = vld [vmem:[%s9936_s4 + $0x4c0] sm:$0xff] }
 0x16d   :  { %v5727_v23 = vld [vmem:[%s9936_s4 + $0x4c8] sm:$0xff] }
 0x170   :  { %1011 = vmatpush.bf16.msra.mxu2 %v561_v24  ;;  %6502 = vmatpush.bf16.msra.mxu3 %v561_v24  ;;  %v7372_v24 = vpop.permute.xlu2 %670 }
 0x172   :  { %2556 = vperm.xlu2 %6510, %v5534_v44   ;;  %v5717_v44 = vld [vmem:[%s9936_s4 + $0x478] sm:$0xff] }
 0x173   :  { %2491 = vperm.xlu1 %6509, %v5521_v12   ;;  %2486 = vperm.xlu0 %6508, %v5520_v53   ;;  %v5716_v12 = vld [vmem:[%s9936_s4 + $0x470] sm:$0xff]  ;;  %v4994_v53 = vld [vmem:[%s9935_s3 + $0x38] sm:$0xf0] }
 0x174   :  { %1012 = vmatpush.bf16.msra.mxu2 %v560_v52  ;;  %6503 = vmatpush.bf16.msra.mxu3 %v560_v52  ;;  %v4997_v4 = vor.u32 %v6270_v36, %v4994_v53  ;;  %v5040_v52 = vld [vmem:[%s9935_s3 + $0x90] sm:$0xf]  ;;  %v5064_v36 = vld [vmem:[%s9935_s3 + $0xc0] sm:$0xf]  ;;  %v6289_v53 = vld [vmem:[%s9935_s3 + $0xc4] sm:$0xf0] }
 0x175   :  { %v5041_v35 = vor.u32 %v6283_v45, %v5040_v52  ;;  %v5703_v45 = vld [vmem:[%s9936_s4 + $0x408] sm:$0xff] }
 0x177   :  { %951 = vmatmul.bf16.gmra.mxu1 %v5009_v28  ;;  %v7406_v28 = vpop.permute.xlu1 %660 }
 0x178   :  { %1013 = vmatpush.bf16.msra.mxu2 %v559_v37  ;;  %6504 = vmatpush.bf16.msra.mxu3 %v559_v37  ;;  %v7389_v9 = vpop.permute.xlu2 %665  ;;  %v5733_v37 = vld [vmem:[%s9936_s4 + $0x4f8] sm:$0xff] }
 0x17a   :  { %2481 = vperm.xlu2 %6510, %v5519_v32   ;;  %v5732_v32 = vld [vmem:[%s9936_s4 + $0x4f0] sm:$0xff] }
 0x17b   :  { %2476 = vperm.xlu1 %6509, %v5518_v17   ;;  %2561 = vperm.xlu0 %6508, %v5535_v1   ;;  %v6272_v17 = vld [vmem:[%s9935_s3 + $0x44] sm:$0xf]  ;;  %v5002_v1 = vld [vmem:[%s9935_s3 + $0x48] sm:$0xf0] }
 0x17c   :  { %1014 = vmatpush.bf16.msra.mxu2 %v558_v21  ;;  %6505 = vmatpush.bf16.msra.mxu3 %v558_v21  ;;  %v5005_v34 = vor.u32 %v6272_v17, %v5002_v1  ;;  %v5730_v21 = vld [vmem:[%s9936_s4 + $0x4e0] sm:$0xff] }
 0x17f   :  { %1015 = vmatmul.bf16.vlgmr.msra.gmra.mxu2 %v4973_v39  ;;  %1080 = vmatmul.bf16.vlgmr.msra.gmra.mxu3 %v5077_v40  ;;  %v7427_v38 = vpop.permute.xlu1 %655  ;;  %v5711_v39 = vld [vmem:[%s9936_s4 + $0x448] sm:$0xff]  ;;  %v5710_v40 = vld [vmem:[%s9936_s4 + $0x440] sm:$0xff] }
 0x180   :  { %v7425_v6 = vpop.permute.xlu2 %750 }
 0x182   :  { %2466 = vperm.xlu2 %6510, %v5516_v41   ;;  %v5048_v41 = vld [vmem:[%s9935_s3 + $0xa0] sm:$0xf] }
 0x183   :  { %2551 = vperm.xlu1 %6509, %v5533_v46   ;;  %2546 = vperm.xlu0 %6508, %v5532_v51   ;;  %v6285_v46 = vld [vmem:[%s9935_s3 + $0xa4] sm:$0xf0] }
 0x184   :  { %v5049_v43 = vor.u32 %v6285_v46, %v5048_v41  ;;  %v5723_v46 = vld [vmem:[%s9936_s4 + $0x4a8] sm:$0xff] }
 0x187   :  { %956 = vmatmul.bf16.gmra.mxu1 %v5017_v48  ;;  %v7448_v47 = vpop.permute.xlu1 %640  ;;  %v7450_v48 = vpop.permute.xlu0 %755 }
 0x188   :  { %v7446_v51 = vpop.permute.xlu2 %645 }
 0x18a   :  { %2541 = vperm.xlu2 %6510, %v5531_v50   ;;  %v5709_v50 = vld [vmem:[%s9936_s4 + $0x438] sm:$0xff] }
 0x18b   :  { %2536 = vperm.xlu1 %6509, %v5530_v59   ;;  %2471 = vperm.xlu0 %6508, %v5517_v54   ;;  %v5708_v59 = vld [vmem:[%s9936_s4 + $0x430] sm:$0xff] }
 0x18f   :  { %1020 = vmatmul.bf16.gmra.mxu2 %v4981_v7  ;;  %1085 = vmatmul.bf16.gmra.mxu3 %v5085_v19  ;;  %v5013_v7 = vor.u32 %v6274_v60, %v5010_v61  ;;  %v5719_v61 = vld [vmem:[%s9936_s4 + $0x488] sm:$0xff] }
 0x190   :  { %v7471_v19 = vpop.permute.xlu2 %630 }
 0x192   :  { %2526 = vperm.xlu2 %6510, %v5528_v3   ;;  %v7473_v3 = vpop.permute.xlu1 %745 }
 0x193   :  { %2461 = vperm.xlu1 %6509, %v5515_v8   ;;  %2456 = vperm.xlu0 %6508, %v5514_v0   ;;  %v7475_v8 = vpop.permute.xlu0 %740  ;;  %v5706_v0 = vld [vmem:[%s9936_s4 + $0x420] sm:$0xff] }
 0x197   :  { %961 = vmatmul.bf16.gmra.mxu1 %v5025_v63  ;;  %v5056_v63 = vld [vmem:[%s9935_s3 + $0xb0] sm:$0xf] }
 0x198   :  { %v7496_v15 = vpop.permute.xlu2 %735 }
 0x19a   :  { %2451 = vperm.xlu2 %6510, %v5513_v10   ;;  %v6287_v10 = vld [vmem:[%s9935_s3 + $0xb4] sm:$0xf0] }
 0x19b   :  { %2446 = vperm.xlu1 %6509, %v5512_v16   ;;  %2531 = vperm.xlu0 %6508, %v5529_v55   ;;  %v5057_v55 = vor.u32 %v6287_v10, %v5056_v63 }
 0x19f   :  { %1025 = vmatmul.bf16.gmra.mxu2 %v4989_v29  ;;  %1090 = vmatmul.bf16.gmra.mxu3 %v5093_v13  ;;  %v5707_v29 = vld [vmem:[%s9936_s4 + $0x428] sm:$0xff]  ;;  %v6276_v13 = vld [vmem:[%s9935_s3 + $0x64] sm:$0xf] }
 0x1a2   :  { %2436 = vperm.xlu2 %6510, %v5510_v20   ;;  %v5018_v20 = vld [vmem:[%s9935_s3 + $0x68] sm:$0xf0] }
 0x1a3   :  { %2521 = vperm.xlu1 %6509, %v5527_v25   ;;  %2516 = vperm.xlu0 %6508, %v5526_v30   ;;  %v7513_v25 = vpop.permute.xlu1 %730  ;;  %v7515_v30 = vpop.permute.xlu0 %635  ;;  %v5021_v31 = vor.u32 %v6276_v13, %v5018_v20  ;;  %v5924_v13 = vld [vmem:[%s9936_s4 + $0x5f0] sm:$0xff] }
 0x1a4   :  { %v7469_v5 = vpop.f32.mrf.mxu1 }
 0x1a7   :  { %966 = vmatmul.bf16.gmra.mxu1 %v5033_v42 }
 0x1aa   :  { %3123 = vperm.xlu2 %6510, %v5717_v44   ;;  %v7458_v54 = vpop.f32.mrf.mxu3  ;;  %v5724_v44 = vld [vmem:[%s9936_s4 + $0x4b0] sm:$0xff] }
 0x1ab   :  { %3118 = vperm.xlu1 %6509, %v5716_v12   ;;  %2441 = vperm.xlu0 %6508, %v5511_v26   ;;  %v5705_v12 = vld [vmem:[%s9936_s4 + $0x418] sm:$0xff]  ;;  %v5704_v26 = vld [vmem:[%s9936_s4 + $0x410] sm:$0xff] }
 0x1ac   :  { %v7494_v11 = vpop.f32.mrf.mxu1 }
 0x1af   :  { %1030 = vmatmul.bf16.gmra.mxu2 %v4997_v4  ;;  %v7536_v4 = vpop.permute.xlu2 %720 }
 0x1b2   :  { %3098 = vperm.xlu2 %6510, %v5712_v27   ;;  %v7492_v16 = vpop.f32.mrf.mxu3  ;;  %v7538_v27 = vpop.permute.xlu1 %625 }
 0x1b3   :  { %3113 = vperm.xlu1 %6509, %v5715_v57   ;;  %3108 = vperm.xlu0 %6508, %v5714_v2   ;;  %v7540_v57 = vpop.permute.xlu0 %620  ;;  %v5065_v2 = vor.u32 %v6289_v53, %v5064_v36 }
 0x1b4   :  { %v7519_v42 = vpop.f32.mrf.mxu1 }
 0x1b7   :  { %971 = vmatmul.bf16.gmra.mxu1 %v5041_v35  ;;  %v5702_v35 = vld [vmem:[%s9936_s4 + $0x400] sm:$0xff]  ;;  %v7561_v1 = vpop.permute.xlu2 %615 }
 0x1ba   :  { %3203 = vperm.xlu2 %6510, %v5733_v37   ;;  %v7517_v49 = vpop.f32.mrf.mxu3  ;;  %v5725_v37 = vld [vmem:[%s9936_s4 + $0x4b8] sm:$0xff] }
 0x1bb   :  { %3198 = vperm.xlu1 %6509, %v5732_v32   ;;  %3103 = vperm.xlu0 %6508, %v5713_v33   ;;  %v6278_v32 = vld [vmem:[%s9935_s3 + $0x74] sm:$0xf]  ;;  %v5026_v33 = vld [vmem:[%s9935_s3 + $0x78] sm:$0xf0] }
 0x1bc   :  { %v7559_v17 = vpop.f32.mrf.mxu1 }
 0x1bf   :  { %1035 = vmatmul.bf16.gmra.mxu2 %v5005_v34  ;;  %v5029_v34 = vor.u32 %v6278_v32, %v5026_v33 }
 0x1c2   :  { %3188 = vperm.xlu2 %6510, %v5730_v21   ;;  %v7542_v52 = vpop.f32.mrf.mxu3  ;;  %v7563_v21 = vpop.permute.xlu1 %610 }
 0x1c3   :  { %3093 = vperm.xlu1 %6509, %v5711_v39   ;;  %3088 = vperm.xlu0 %6508, %v5710_v40   ;;  %v7565_v39 = vpop.permute.xlu0 %725  ;;  %v5720_v40 = vld [vmem:[%s9936_s4 + $0x490] sm:$0xff] }
 0x1c7   :  { %976 = vmatmul.bf16.gmra.mxu1 %v5049_v43  ;;  %v5722_v43 = vld [vmem:[%s9936_s4 + $0x4a0] sm:$0xff] }
 0x1ca   :  { %3083 = vperm.xlu2 %6510, %v5709_v50   ;;  %v7570_v41 = vpop.f32.mrf.mxu3  ;;  %v7578_v50 = vpop.f32.mrf.mxu1 }
 0x1cb   :  { %3078 = vperm.xlu1 %6509, %v5708_v59   ;;  %3193 = vperm.xlu0 %6508, %v5731_v56   ;;  %v601_v59 = vpop.permute.xlu2 %600  ;;  %v7580_v56 = vpop.permute.xlu1 %715 }
 0x1cc   :  { %v7582_v60 = vpop.permute.xlu0 %710 }
 0x1cf   :  { %1040 = vmatmul.bf16.gmra.mxu2 %v5013_v7  ;;  %v5718_v7 = vld [vmem:[%s9936_s4 + $0x480] sm:$0xff] }
 0x1d2   :  { %3068 = vperm.xlu2 %6510, %v5706_v0   ;;  %v5721_v0 = vld [vmem:[%s9936_s4 + $0x498] sm:$0xff]  ;;  %v7599_v63 = vpop.f32.mrf.mxu3 }
 0x1d3   :  { %3183 = vperm.xlu1 %6509, %v5729_v14   ;;  %3178 = vperm.xlu0 %6508, %v5728_v58   ;;  %v6280_v14 = vld [vmem:[%s9935_s3 + $0x84] sm:$0xf]  ;;  %v5034_v58 = vld [vmem:[%s9935_s3 + $0x88] sm:$0xf0]  ;;  %v7614_v20 = vpop.permute.xlu1 %700 }
 0x1d4   :  { %v5037_v10 = vor.u32 %v6280_v14, %v5034_v58  ;;  %v5920_v14 = vld [vmem:[%s9936_s4 + $0x5d0] sm:$0xff]  ;;  %v5907_v58 = vld [vmem:[%s9936_s4 + $0x568] sm:$0xff] }
 0x1d7   :  { %981 = vmatmul.bf16.gmra.mxu1 %v5057_v55  ;;  %v7601_v55 = vpop.f32.mrf.mxu1 }
 0x1da   :  { %3173 = vperm.xlu2 %6510, %v5727_v23   ;;  %v7603_v23 = vpop.permute.xlu2 %705 }
 0x1db   :  { %3168 = vperm.xlu1 %6509, %v5726_v22   ;;  %3073 = vperm.xlu0 %6508, %v5707_v29   ;;  %v5908_v22 = vld [vmem:[%s9936_s4 + $0x570] sm:$0xff]  ;;  %v5925_v29 = vld [vmem:[%s9936_s4 + $0x5f8] sm:$0xff] }
 0x1df   :  { %1045 = vmatmul.bf16.gmra.mxu2 %v5021_v31  ;;  %v606_v31 = vpop.permute.xlu0 %605  ;;  %v7619_v53 = vpop.f32.mrf.mxu1 }
 0x1e0   :  { %v930_v33 = vadd.f32 %v7494_v11, %v606_v31 }
 0x1e2   :  { %3158 = vperm.xlu2 %6510, %v5724_v44   ;;  %v928_v44 = vadd.f32 %v7469_v5, %v601_v59  ;;  %v5909_v5 = vld [vmem:[%s9936_s4 + $0x578] sm:$0xff]  ;;  %v7636_v32 = vpop.permute.xlu2 %680 }
 0x1e3   :  { %3063 = vperm.xlu1 %6509, %v5705_v12   ;;  %3058 = vperm.xlu0 %6508, %v5704_v26  }
 0x1e7   :  { %986 = vmatmul.bf16.gmra.mxu1 %v5065_v2  ;;  %v5923_v2 = vld [vmem:[%s9936_s4 + $0x5e8] sm:$0xff] }
 0x1ea   :  { %3053 = vperm.xlu2 %6510, %v5703_v45   ;;  %v5922_v45 = vld [vmem:[%s9936_s4 + $0x5e0] sm:$0xff] }
 0x1eb   :  { %3048 = vperm.xlu1 %6509, %v5702_v35   ;;  %3163 = vperm.xlu0 %6508, %v5725_v37   ;;  %v6282_v35 = vld [vmem:[%s9935_s3 + $0x94] sm:$0xf]  ;;  %v5042_v37 = vld [vmem:[%s9935_s3 + $0x98] sm:$0xf0] }
 0x1ef   :  { %1050 = vmatmul.bf16.gmra.mxu2 %v5029_v34 }
 0x1f2   :  { %3138 = vperm.xlu2 %6510, %v5720_v40  }
 0x1f3   :  { %3153 = vperm.xlu1 %6509, %v5723_v46   ;;  %3148 = vperm.xlu0 %6508, %v5722_v43   ;;  %v7641_v46 = vpop.permute.xlu1 %695  ;;  %v7643_v43 = vpop.permute.xlu0 %690 }
 0x1fa   :  { %3133 = vperm.xlu2 %6510, %v5719_v61   ;;  %v5045_v61 = vor.u32 %v6282_v35, %v5042_v37  ;;  %v5050_v35 = vld [vmem:[%s9935_s3 + $0xa8] sm:$0xf0] }
 0x1fb   :  { %3128 = vperm.xlu1 %6509, %v5718_v7   ;;  %3143 = vperm.xlu0 %6508, %v5721_v0  }
 0x1ff   :  { %1055 = vmatmul.bf16.gmra.mxu2 %v5037_v10  ;;  %v5906_v10 = vld [vmem:[%s9936_s4 + $0x560] sm:$0xff] }
 0x202   :  { %v1016_v12 = vpop.f32.mrf.mxu2  ;;  %v7617_v26 = vpop.f32.mrf.mxu3  ;;  %3730 = vperm.xlu2 %6510, %v5908_v22   ;;  %v933_v22 = vadd.f32 %v7519_v42, %v7563_v21  ;;  %v5904_v42 = vld [vmem:[%s9936_s4 + $0x550] sm:$0xff]  ;;  %v5921_v21 = vld [vmem:[%s9936_s4 + $0x5d8] sm:$0xff] }
 0x203   :  { %v1017_v36 = vadd.f32 %v1016_v12, %v928_v44  ;;  %3815 = vperm.xlu1 %6509, %v5925_v29   ;;  %3810 = vperm.xlu0 %6508, %v5924_v13   ;;  %v7658_v29 = vpop.f32.mrf.mxu1  ;;  %v7662_v12 = vpop.permute.xlu2 %1367 }
 0x204   :  { %9940 = vst [vmem:[#allocation5_spill] sm:$0xff] %v7662_v12 }
 0x205   :  { %v1096_v7 = vmax.f32 %v1017_v36, 0.0  ;;  %v7664_v36 = vpop.permute.xlu1 %1362 }
 0x206   :  { %9941 = vst [vmem:[#allocation6_spill] sm:$0xff] %v7664_v36 }
 0x20a   :  { %v1018_v34 = vpop.f32.mrf.mxu2  ;;  %v7639_v40 = vpop.f32.mrf.mxu3  ;;  %3805 = vperm.xlu2 %6510, %v5923_v2  }
 0x20b   :  { %v1019_v59 = vadd.f32 %v1018_v34, %v930_v33  ;;  %3800 = vperm.xlu1 %6509, %v5922_v45   ;;  %3735 = vperm.xlu0 %6508, %v5909_v5   ;;  %v7666_v2 = vpop.permute.xlu0 %685  ;;  %v5905_v45 = vld [vmem:[%s9936_s4 + $0x558] sm:$0xff]  ;;  %v6284_v5 = vld [vmem:[%s9935_s3 + $0xa4] sm:$0xf] }
 0x20c   :  { %v5053_v34 = vor.u32 %v6284_v5, %v5050_v35  ;;  %v1003_v5 = vadd.f32 %v7570_v41, %v7425_v6  ;;  %v5917_v35 = vld [vmem:[%s9936_s4 + $0x5b8] sm:$0xff] }
 0x20d   :  { %v1097_v0 = vmax.f32 %v1019_v59, 0.0  ;;  %v7685_v59 = vpop.f32.mrf.mxu1  ;;  %v5058_v6 = vld [vmem:[%s9935_s3 + $0xb8] sm:$0xf0] }
 0x20f   :  { %1060 = vmatmul.bf16.gmra.mxu2 %v5045_v61  ;;  %v7648_v11 = vpack.c.bf16 %v1097_v0, %v1096_v7  ;;  %v7687_v61 = vpop.permute.xlu2 %1352  ;;  %v7689_v7 = vpop.permute.xlu1 %1287 }
 0x210   :  { %9942 = vst [vmem:[#allocation7_spill] sm:$0xff] %v7687_v61  ;;  %v998_v61 = vadd.f32 %v7517_v49, %v7475_v8 }
 0x211   :  { %9943 = vst [vmem:[#allocation8_spill] sm:$0xff] %v7689_v7 }
 0x212   :  { %v1021_v13 = vpop.f32.mrf.mxu2  ;;  %v1086_v31 = vpop.f32.mrf.mxu3  ;;  %3790 = vperm.xlu2 %6510, %v5920_v14   ;;  %v5902_v14 = vld [vmem:[%s9936_s4 + $0x540] sm:$0xff] }
 0x213   :  { %v7660_v44 = vadd.f32 %v1021_v13, %v933_v22  ;;  %3725 = vperm.xlu1 %6509, %v5907_v58   ;;  %3720 = vperm.xlu0 %6508, %v5906_v10   ;;  %v7691_v0 = vpop.permute.xlu0 %1282  ;;  %v5919_v58 = vld [vmem:[%s9936_s4 + $0x5c8] sm:$0xff]  ;;  %v5918_v10 = vld [vmem:[%s9936_s4 + $0x5c0] sm:$0xff]  ;;  %v938_v22 = vadd.f32 %v7578_v50, %v7540_v57  ;;  %v5916_v57 = vld [vmem:[%s9936_s4 + $0x5b0] sm:$0xff] }
 0x214   :  { %9944 = vst [vmem:[#allocation9_spill] sm:$0xff] %v7691_v0 }
 0x217   :  { %v7716_v50 = vpop.permute.xlu2 %1277  ;;  %v7727_v41 = vpop.permute.xlu1 %1272 }
 0x218   :  { %9945 = vst [vmem:[#allocation10_spill] sm:$0xff] %v7716_v50 }
 0x219   :  { %9946 = vst [vmem:[#allocation11_spill] sm:$0xff] %v7727_v41 }
 0x21a   :  { %v7683_v37 = vpop.f32.mrf.mxu2  ;;  %v1088_v33 = vpop.f32.mrf.mxu3  ;;  %3715 = vperm.xlu2 %6510, %v5905_v45  }
 0x21b   :  { %3710 = vperm.xlu1 %6509, %v5904_v42   ;;  %3795 = vperm.xlu0 %6508, %v5921_v21   ;;  %v7706_v21 = vpop.f32.mrf.mxu1 }
 0x21f   :  { %1065 = vmatmul.bf16.gmra.mxu2 %v5053_v34  ;;  %v5903_v34 = vld [vmem:[%s9936_s4 + $0x548] sm:$0xff] }
 0x222   :  { %v1026_v13 = vpop.f32.mrf.mxu2  ;;  %v1091_v45 = vpop.f32.mrf.mxu3  ;;  %3700 = vperm.xlu2 %6510, %v5902_v14   ;;  %v6286_v14 = vld [vmem:[%s9935_s3 + $0xb4] sm:$0xf] }
 0x223   :  { %v7704_v42 = vadd.f32 %v1026_v13, %v938_v22  ;;  %3785 = vperm.xlu1 %6509, %v5919_v58   ;;  %3780 = vperm.xlu0 %6508, %v5918_v10   ;;  %v7729_v58 = vpop.permute.xlu0 %1357  ;;  %v1000_v10 = vadd.f32 %v7542_v52, %v7473_v3  ;;  %v1005_v22 = vadd.f32 %v7599_v63, %v7450_v48 }
 0x224   :  { %9947 = vst [vmem:[#allocation12_spill] sm:$0xff] %v7729_v58  ;;  %v1092_v13 = vadd.f32 %v1091_v45, %v1003_v5  ;;  %v5061_v41 = vor.u32 %v6286_v14, %v5058_v6  ;;  %v995_v58 = vadd.f32 %v7492_v16, %v7496_v15  ;;  %v1087_v3 = vadd.f32 %v1086_v31, %v998_v61  ;;  %v5901_v16 = vld [vmem:[%s9936_s4 + $0x538] sm:$0xff]  ;;  %v5900_v15 = vld [vmem:[%s9936_s4 + $0x530] sm:$0xff]  ;;  %v7758_v61 = vpop.permute.xlu1 %1347  ;;  %v5066_v14 = vld [vmem:[%s9935_s3 + $0xc8] sm:$0xf0] }
 0x225   :  { %v1089_v7 = vadd.f32 %v1088_v33, %v1000_v10  ;;  %v993_v48 = vadd.f32 %v7458_v54, %v7513_v25  ;;  %v7747_v33 = vpop.f32.mrf.mxu1  ;;  %v943_v54 = vadd.f32 %v7619_v53, %v7471_v19  ;;  %9948 = vst [vmem:[#allocation13_spill] sm:$0xff] %v7758_v61  ;;  %v5898_v53 = vld [vmem:[%s9936_s4 + $0x520] sm:$0xff]  ;;  %v6117_v61 = vld [vmem:[%s9936_s4 + $0x6f8] sm:$0xff] }
 0x226   :  { %v1126_v52 = vmax.f32 %v1092_v13, 0.0  ;;  %v1084_v8 = vadd.f32 %v7639_v40, %v995_v58  ;;  %v1124_v40 = vmax.f32 %v1087_v3, 0.0  ;;  %v5896_v3 = vld [vmem:[%s9936_s4 + $0x510] sm:$0xff] }
 0x227   :  { %v1125_v49 = vmax.f32 %v1089_v7, 0.0  ;;  %v1082_v25 = vadd.f32 %v7617_v26, %v993_v48  ;;  %v5899_v26 = vld [vmem:[%s9936_s4 + $0x528] sm:$0xff]  ;;  %v5912_v48 = vld [vmem:[%s9936_s4 + $0x590] sm:$0xff] }
 0x229   :  { %v1175_v5 = vpack.c.bf16 %v1125_v49, %v1124_v40 }
 0x22a   :  { %v7737_v12 = vpop.f32.mrf.mxu2  ;;  %v1093_v36 = vpop.f32.mrf.mxu3  ;;  %3775 = vperm.xlu2 %6510, %v5917_v35  }
 0x22b   :  { %v1094_v50 = vadd.f32 %v1093_v36, %v1005_v22  ;;  %3770 = vperm.xlu1 %6509, %v5916_v57   ;;  %3705 = vperm.xlu0 %6508, %v5903_v34   ;;  %v5914_v36 = vld [vmem:[%s9936_s4 + $0x5a0] sm:$0xff]  ;;  %v7760_v7 = vpop.permute.xlu0 %1342  ;;  %v7764_v35 = vpop.permute.xlu2 %1262  ;;  %v1122_v57 = vmax.f32 %v1082_v25, 0.0 }
 0x22c   :  { %9949 = vst [vmem:[#allocation14_spill] sm:$0xff] %v7760_v7  ;;  %v6288_v34 = vld [vmem:[%s9935_s3 + $0xc4] sm:$0xf]  ;;  %v7785_v10 = vpop.permute.xlu1 %1332 }
 0x22d   :  { %v1127_v0 = vmax.f32 %v1094_v50, 0.0  ;;  %9950 = vst [vmem:[#allocation15_spill] sm:$0xff] %v7764_v35  ;;  %v5915_v50 = vld [vmem:[%s9936_s4 + $0x5a8] sm:$0xff]  ;;  %v7781_v6 = vpop.f32.mrf.mxu1  ;;  %v5069_v58 = vor.u32 %v6288_v34, %v5066_v14 }
 0x22e   :  { %9951 = vst [vmem:[#allocation16_spill] sm:$0xff] %v7785_v10  ;;  %v6099_v34 = vld [vmem:[%s9936_s4 + $0x668] sm:$0xff] }
 0x22f   :  { %1070 = vmatmul.bf16.gmra.mxu2 %v5061_v41  ;;  %v1176_v63 = vpack.c.bf16 %v1127_v0, %v1126_v52  ;;  %v1123_v0 = vmax.f32 %v1084_v8, 0.0  ;;  %v5913_v52 = vld [vmem:[%s9936_s4 + $0x598] sm:$0xff]  ;;  %v948_v8 = vadd.f32 %v7685_v59, %v7448_v47  ;;  %v5910_v47 = vld [vmem:[%s9936_s4 + $0x580] sm:$0xff] }
 0x230   :  { %v5897_v59 = vld [vmem:[%s9936_s4 + $0x518] sm:$0xff] }
 0x231   :  { %1619 = vmatpush.bf16.msrb.mxu0 %v1176_v63  ;;  %v1174_v19 = vpack.c.bf16 %v1123_v0, %v1122_v57  ;;  %v6100_v0 = vld [vmem:[%s9936_s4 + $0x670] sm:$0xff]  ;;  %v5894_v57 = vld [vmem:[%s9936_s4 + $0x500] sm:$0xff] }
 0x232   :  { %v1031_v31 = vpop.f32.mrf.mxu2  ;;  %3760 = vperm.xlu2 %6510, %v5914_v36  }
 0x233   :  { %v7762_v45 = vadd.f32 %v1031_v31, %v943_v54  ;;  %3695 = vperm.xlu1 %6509, %v5901_v16   ;;  %3690 = vperm.xlu0 %6508, %v5900_v15   ;;  %v7787_v22 = vpop.permute.xlu0 %1267  ;;  %v7789_v13 = vpop.permute.xlu2 %1337  ;;  %v5911_v54 = vld [vmem:[%s9936_s4 + $0x588] sm:$0xff] }
 0x234   :  { %9952 = vst [vmem:[#allocation17_spill] sm:$0xff] %v7787_v22  ;;  %v7806_v16 = vpop.permute.xlu1 %1257 }
 0x235   :  { %1620 = vmatpush.bf16.msrb.mxu0 %v1175_v5  ;;  %9953 = vst [vmem:[#allocation18_spill] sm:$0xff] %v7789_v13  ;;  %v7804_v36 = vpop.f32.mrf.mxu1  ;;  %v5895_v5 = vld [vmem:[%s9936_s4 + $0x508] sm:$0xff]  ;;  %v6090_v13 = vld [vmem:[%s9936_s4 + $0x620] sm:$0xff] }
 0x236   :  { %9954 = vst [vmem:[#allocation19_spill] sm:$0xff] %v7806_v16  ;;  %v958_v35 = vadd.f32 %v7804_v36, %v7406_v28  ;;  %v6112_v28 = vld [vmem:[%s9936_s4 + $0x6d0] sm:$0xff] }
 0x239   :  { %1621 = vmatpush.bf16.msrb.mxu0 %v1174_v19 }
 0x23a   :  { %v7783_v41 = vpop.f32.mrf.mxu2  ;;  %3685 = vperm.xlu2 %6510, %v5899_v26  }
 0x23b   :  { %3680 = vperm.xlu1 %6509, %v5898_v53   ;;  %3765 = vperm.xlu0 %6508, %v5915_v50   ;;  %v7808_v15 = vpop.permute.xlu0 %1252  ;;  %v7813_v25 = vpop.permute.xlu2 %1322 }
 0x23c   :  { %9955 = vst [vmem:[#allocation20_spill] sm:$0xff] %v7808_v15  ;;  %v7832_v19 = vpop.permute.xlu1 %1242 }
 0x23d   :  { %9956 = vst [vmem:[#allocation21_spill] sm:$0xff] %v7813_v25  ;;  %v959_v31 = vpop.f32.mrf.mxu1  ;;  %v6115_v25 = vld [vmem:[%s9936_s4 + $0x6e8] sm:$0xff] }
 0x23e   :  { %9957 = vst [vmem:[#allocation22_spill] sm:$0xff] %v7832_v19 }
 0x23f   :  { %1075 = vmatmul.bf16.gmra.mxu2 %v5069_v58  ;;  %v6098_v58 = vld [vmem:[%s9936_s4 + $0x660] sm:$0xff] }
 0x242   :  { %v1036_v49 = vpop.f32.mrf.mxu2  ;;  %3670 = vperm.xlu2 %6510, %v5896_v3   ;;  %v6101_v3 = vld [vmem:[%s9936_s4 + $0x678] sm:$0xff] }
 0x243   :  { %v7802_v63 = vadd.f32 %v1036_v49, %v948_v8  ;;  %3755 = vperm.xlu1 %6509, %v5913_v52   ;;  %3750 = vperm.xlu0 %6508, %v5912_v48   ;;  %v7834_v26 = vpop.permute.xlu0 %1327  ;;  %v7836_v53 = vpop.permute.xlu2 %1247 }
 0x244   :  { %9958 = vst [vmem:[#allocation23_spill] sm:$0xff] %v7834_v26  ;;  %v7849_v48 = vpop.permute.xlu1 %1317 }
 0x245   :  { %9959 = vst [vmem:[#allocation24_spill] sm:$0xff] %v7836_v53  ;;  %v962_v14 = vpop.f32.mrf.mxu1  ;;  %v955_v53 = vadd.f32 %v7781_v6, %v7427_v38  ;;  %v6088_v38 = vld [vmem:[%s9936_s4 + $0x610] sm:$0xff] }
 0x246   :  { %9960 = vst [vmem:[#allocation25_spill] sm:$0xff] %v7849_v48  ;;  %v6092_v48 = vld [vmem:[%s9936_s4 + $0x630] sm:$0xff]  ;;  %v963_v10 = vadd.f32 %v962_v14, %v7372_v24 }
 0x24a   :  { %v7821_v40 = vpop.f32.mrf.mxu2  ;;  %3745 = vperm.xlu2 %6510, %v5911_v54   ;;  %v6094_v54 = vld [vmem:[%s9936_s4 + $0x640] sm:$0xff] }
 0x24b   :  { %3740 = vperm.xlu1 %6509, %v5910_v47   ;;  %3675 = vperm.xlu0 %6508, %v5897_v59   ;;  %v7851_v8 = vpop.permute.xlu0 %1312  ;;  %v7853_v49 = vpop.permute.xlu2 %1232  ;;  %v6097_v47 = vld [vmem:[%s9936_s4 + $0x658] sm:$0xff]  ;;  %v6096_v59 = vld [vmem:[%s9936_s4 + $0x650] sm:$0xff] }
 0x24c   :  { %9961 = vst [vmem:[#allocation26_spill] sm:$0xff] %v7851_v8  ;;  %v6114_v8 = vld [vmem:[%s9936_s4 + $0x6e0] sm:$0xff] }
 0x252   :  { %v7838_v50 = vpop.f32.mrf.mxu2  ;;  %4342 = vperm.xlu2 %6510, %v6100_v0   ;;  %v964_v0 = vpop.f32.mrf.mxu1 }
 0x253   :  { %3665 = vperm.xlu1 %6509, %v5895_v5   ;;  %3660 = vperm.xlu0 %6508, %v5894_v57   ;;  %v7864_v57 = vpop.permute.xlu1 %1302  ;;  %v965_v24 = vadd.f32 %v964_v0, %v7408_v18  ;;  %v953_v18 = vadd.f32 %v7747_v33, %v7429_v62 }
 0x254   :  { %9962 = vst [vmem:[#allocation27_spill] sm:$0xff] %v7864_v57  ;;  %v6091_v57 = vld [vmem:[%s9936_s4 + $0x628] sm:$0xff] }
 0x255   :  { %v1042_v33 = vadd.f32 %v7838_v50, %v953_v18 }
 0x257   :  { %v1106_v50 = vmax.f32 %v1042_v33, 0.0 }
 0x25a   :  { %v1043_v52 = vpop.f32.mrf.mxu2  ;;  %4337 = vperm.xlu2 %6510, %v6099_v34   ;;  %v7866_v34 = vpop.permute.xlu0 %1237 }
 0x25b   :  { %4332 = vperm.xlu1 %6509, %v6098_v58   ;;  %4347 = vperm.xlu0 %6508, %v6101_v3   ;;  %v7868_v58 = vpop.permute.xlu2 %1307  ;;  %v6093_v3 = vld [vmem:[%s9936_s4 + $0x638] sm:$0xff]  ;;  %v7879_v26 = vpop.permute.xlu1 %1227 }
 0x25c   :  { %9963 = vst [vmem:[#allocation28_spill] sm:$0xff] %v7868_v58 }
 0x262   :  { %v1046_v5 = vpop.f32.mrf.mxu2  ;;  %4312 = vperm.xlu2 %6510, %v6094_v54   ;;  %v6095_v54 = vld [vmem:[%s9936_s4 + $0x648] sm:$0xff]  ;;  %v7881_v58 = vpop.permute.xlu0 %1222 }
 0x263   :  { %4327 = vperm.xlu1 %6509, %v6097_v47   ;;  %4322 = vperm.xlu0 %6508, %v6096_v59   ;;  %v967_v59 = vpop.f32.mrf.mxu1  ;;  %v7886_v7 = vpop.permute.xlu2 %1292 }
 0x264   :  { %9964 = vst [vmem:[#allocation29_spill] sm:$0xff] %v7886_v7  ;;  %v7906_v7 = vpop.permute.xlu1 %1212  ;;  %v968_v62 = vadd.f32 %v967_v59, %v7636_v32  ;;  %v945_v32 = vadd.f32 %v7658_v29, %v7515_v30  ;;  %v6113_v59 = vld [vmem:[%s9936_s4 + $0x6d8] sm:$0xff]  ;;  %v940_v30 = vadd.f32 %v7601_v55, %v7538_v27  ;;  %v1104_v29 = vmax.f32 %v7802_v63, 0.0 }
 0x265   :  { %v935_v27 = vadd.f32 %v7559_v17, %v7561_v1  ;;  %v1102_v55 = vmax.f32 %v7762_v45, 0.0  ;;  %v6110_v17 = vld [vmem:[%s9936_s4 + $0x6c0] sm:$0xff]  ;;  %v1100_v1 = vmax.f32 %v7704_v42, 0.0 }
 0x267   :  { %v1024_v18 = vadd.f32 %v7683_v37, %v935_v27 }
 0x26a   :  { %v1048_v47 = vpop.f32.mrf.mxu2  ;;  %4307 = vperm.xlu2 %6510, %v6093_v3  }
 0x26b   :  { %4302 = vperm.xlu1 %6509, %v6092_v48   ;;  %4317 = vperm.xlu0 %6508, %v6095_v54   ;;  %v6116_v48 = vld [vmem:[%s9936_s4 + $0x6f0] sm:$0xff]  ;;  %v7894_v54 = vpop.f32.mrf.mxu1 }
 0x272   :  { %v1051_v3 = vpop.f32.mrf.mxu2  ;;  %4292 = vperm.xlu2 %6510, %v6090_v13   ;;  %v960_v13 = vadd.f32 %v959_v31, %v7389_v9 }
 0x273   :  { %4427 = vperm.xlu1 %6509, %v6117_v61   ;;  %4422 = vperm.xlu0 %6508, %v6116_v48   ;;  %v7908_v61 = vpop.permute.xlu0 %1297  ;;  %v1052_v14 = vadd.f32 %v1051_v3, %v963_v10  ;;  %v7912_v48 = vpop.permute.xlu2 %1217  ;;  %v1044_v10 = vadd.f32 %v1043_v52, %v955_v53 }
 0x274   :  { %9965 = vst [vmem:[#allocation30_spill] sm:$0xff] %v7908_v61  ;;  %v1049_v22 = vadd.f32 %v1048_v47, %v960_v13  ;;  %v1047_v61 = vadd.f32 %v1046_v5, %v958_v35  ;;  %v972_v36 = vpop.f32.mrf.mxu1  ;;  %v950_v35 = vadd.f32 %v7706_v21, %v7446_v51  ;;  %v6086_v47 = vld [vmem:[%s9936_s4 + $0x600] sm:$0xff] }
 0x275   :  { %v1110_v19 = vmax.f32 %v1052_v14, 0.0  ;;  %v1107_v53 = vmax.f32 %v1044_v10, 0.0  ;;  %v973_v45 = vadd.f32 %v972_v36, %v7643_v43  ;;  %v6107_v43 = vld [vmem:[%s9936_s4 + $0x6a8] sm:$0xff] }
 0x276   :  { %v1109_v31 = vmax.f32 %v1049_v22, 0.0  ;;  %v1108_v6 = vmax.f32 %v1047_v61, 0.0  ;;  %v1029_v61 = vadd.f32 %v7737_v12, %v940_v30 }
 0x278   :  { %v1167_v51 = vpack.c.bf16 %v1109_v31, %v1108_v6  ;;  %v1101_v10 = vmax.f32 %v1029_v61, 0.0  ;;  %v6108_v31 = vld [vmem:[%s9936_s4 + $0x6b0] sm:$0xff]  ;;  %v6103_v61 = vld [vmem:[%s9936_s4 + $0x688] sm:$0xff] }
 0x27a   :  { %v1053_v16 = vpop.f32.mrf.mxu2  ;;  %4417 = vperm.xlu2 %6510, %v6115_v25  }
 0x27b   :  { %v1054_v15 = vadd.f32 %v1053_v16, %v965_v24  ;;  %4412 = vperm.xlu1 %6509, %v6114_v8   ;;  %4297 = vperm.xlu0 %6508, %v6091_v57   ;;  %v6089_v16 = vld [vmem:[%s9936_s4 + $0x618] sm:$0xff]  ;;  %v7935_v25 = vpop.permute.xlu0 %1894  ;;  %v7940_v21 = vpop.permute.xlu2 %1884  ;;  %v1034_v8 = vadd.f32 %v7783_v41, %v945_v32  ;;  %v1166_v57 = vpack.c.bf16 %v1107_v53, %v1106_v50  ;;  %v6297_v53 = vld [vmem:[%s9935_s3 + $0x104] sm:$0xf0] }
 0x27c   :  { %v7957_v41 = vpop.f32.mrf.mxu1 }
 0x27d   :  { %v1111_v9 = vmax.f32 %v1054_v15, 0.0  ;;  %v7933_v15 = vpop.permute.xlu1 %1899  ;;  %v1103_v13 = vmax.f32 %v1034_v8, 0.0  ;;  %v6102_v8 = vld [vmem:[%s9936_s4 + $0x680] sm:$0xff] }
 0x27f   :  { %v1168_v0 = vpack.c.bf16 %v1111_v9, %v1110_v19  ;;  %v1039_v19 = vadd.f32 %v7821_v40, %v950_v35  ;;  %v6087_v40 = vld [vmem:[%s9936_s4 + $0x608] sm:$0xff]  ;;  %v1164_v12 = vpack.c.bf16 %v1103_v13, %v1102_v55  ;;  %v5168_v13 = vld [vmem:[%s9935_s3 + $0x110] sm:$0xf] }
 0x281   :  { %1530 = vmatpush.bf16.msrb.mxu3 %v1168_v0  ;;  %v1105_v5 = vmax.f32 %v1039_v19, 0.0  ;;  %v6111_v0 = vld [vmem:[%s9936_s4 + $0x6c8] sm:$0xff]  ;;  %v5160_v19 = vld [vmem:[%s9935_s3 + $0x100] sm:$0xf] }
 0x282   :  { %v1056_v22 = vpop.f32.mrf.mxu2  ;;  %4402 = vperm.xlu2 %6510, %v6112_v28   ;;  %v1099_v28 = vmax.f32 %v1024_v18, 0.0  ;;  %v5161_v32 = vor.u32 %v6297_v53, %v5160_v19  ;;  %v6303_v19 = vld [vmem:[%s9935_s3 + $0x134] sm:$0xf0] }
 0x283   :  { %v7938_v52 = vadd.f32 %v1056_v22, %v968_v62  ;;  %4287 = vperm.xlu1 %6509, %v6089_v16   ;;  %4282 = vperm.xlu0 %6508, %v6088_v38   ;;  %v1165_v24 = vpack.c.bf16 %v1105_v5, %v1104_v29  ;;  %v7964_v9 = vpop.permute.xlu0 %1889  ;;  %v7969_v63 = vpop.permute.xlu2 %1879  ;;  %v1163_v38 = vpack.c.bf16 %v1101_v10, %v1100_v1  ;;  %v1098_v62 = vmax.f32 %v7660_v44, 0.0  ;;  %v6106_v22 = vld [vmem:[%s9936_s4 + $0x6a0] sm:$0xff]  ;;  %v6109_v44 = vld [vmem:[%s9936_s4 + $0x6b8] sm:$0xff] }
 0x284   :  { %v7985_v35 = vpop.f32.mrf.mxu1  ;;  %v6105_v5 = vld [vmem:[%s9936_s4 + $0x698] sm:$0xff]  ;;  %v4817_v29 = vld [vmem:[%s9938_s6] sm:$0xff] }
 0x285   :  { %1531 = vmatpush.bf16.msrb.mxu3 %v1167_v51  ;;  %v7962_v14 = vpop.permute.xlu1 %1874  ;;  %v1162_v42 = vpack.c.bf16 %v1099_v28, %v1098_v62 }
 0x289   :  { %1532 = vmatpush.bf16.msrb.mxu3 %v1166_v57  ;;  %v6104_v57 = vld [vmem:[%s9936_s4 + $0x690] sm:$0xff] }
 0x28a   :  { %v7959_v3 = vpop.f32.mrf.mxu2  ;;  %4277 = vperm.xlu2 %6510, %v6087_v40  }
 0x28b   :  { %4272 = vperm.xlu1 %6509, %v6086_v47   ;;  %4407 = vperm.xlu0 %6508, %v6113_v59   ;;  %v7990_v6 = vpop.permute.xlu0 %1974  ;;  %v7995_v36 = vpop.permute.xlu2 %1864 }
 0x28c   :  { %v979_v50 = vpop.f32.mrf.mxu1 }
 0x28d   :  { %1533 = vmatpush.bf16.msrb.mxu3 %v1165_v24  ;;  %v7988_v33 = vpop.permute.xlu1 %1979  ;;  %v6299_v24 = vld [vmem:[%s9935_s3 + $0x114] sm:$0xf0] }
 0x28e   :  { %v5169_v10 = vor.u32 %v6299_v24, %v5168_v13 }
 0x291   :  { %1534 = vmatpush.bf16.msrb.mxu3 %v1164_v12 }
 0x292   :  { %v1061_v37 = vpop.f32.mrf.mxu2  ;;  %4382 = vperm.xlu2 %6510, %v6108_v31  }
 0x293   :  { %v7983_v16 = vadd.f32 %v1061_v37, %v973_v45  ;;  %4397 = vperm.xlu1 %6509, %v6111_v0   ;;  %4392 = vperm.xlu0 %6508, %v6110_v17   ;;  %v8023_v47 = vpop.permute.xlu0 %1869  ;;  %v8025_v59 = vpop.permute.xlu2 %1969  ;;  %v5176_v0 = vld [vmem:[%s9935_s3 + $0x120] sm:$0xf]  ;;  %v6301_v17 = vld [vmem:[%s9935_s3 + $0x124] sm:$0xf0] }
 0x294   :  { %v982_v30 = vpop.f32.mrf.mxu1  ;;  %v5177_v37 = vor.u32 %v6301_v17, %v5176_v0 }
 0x295   :  { %1535 = vmatpush.bf16.msrb.mxu3 %v1163_v38  ;;  %v8021_v40 = vpop.permute.xlu1 %1964 }
 0x299   :  { %1536 = vmatpush.bf16.msrb.mxu3 %v1162_v42 }
 0x29a   :  { %v8009_v51 = vpop.f32.mrf.mxu2  ;;  %4377 = vperm.xlu2 %6510, %v6107_v43  }
 0x29b   :  { %4372 = vperm.xlu1 %6509, %v6106_v22   ;;  %4387 = vperm.xlu0 %6508, %v6109_v44   ;;  %v8041_v18 = vpop.permute.xlu0 %1854  ;;  %v5184_v44 = vld [vmem:[%s9935_s3 + $0x130] sm:$0xf] }
 0x29c   :  { %v984_v12 = vpop.f32.mrf.mxu1 }
 0x29d   :  { %1537 = vmatpush.bf16.msrb.mxu3 %v7648_v11  ;;  %v8039_v55 = vpop.permute.xlu1 %1859  ;;  %v985_v42 = vadd.f32 %v984_v12, %v7580_v56  ;;  %v975_v12 = vadd.f32 %v7957_v41, %v7641_v46  ;;  %v5192_v46 = vld [vmem:[%s9935_s3 + $0x140] sm:$0xf]  ;;  %v6305_v41 = vld [vmem:[%s9935_s3 + $0x144] sm:$0xf0] }
 0x2a0   :  { %1538 = vmatmul.bf16.vlgmr.msrb.gmra.mxu3 %v5161_v32  ;;  %v983_v32 = vadd.f32 %v982_v30, %v7582_v60  ;;  %v1064_v30 = vadd.f32 %v8009_v51, %v975_v12  ;;  %v5194_v12 = vld [vmem:[%s9935_s3 + $0x148] sm:$0xf0] }
 0x2a2   :  { %v1066_v11 = vpop.f32.mrf.mxu2  ;;  %4352 = vperm.xlu2 %6510, %v6102_v8  }
 0x2a3   :  { %4367 = vperm.xlu1 %6509, %v6105_v5   ;;  %4362 = vperm.xlu0 %6508, %v6104_v57   ;;  %v5185_v57 = vor.u32 %v6303_v19, %v5184_v44  ;;  %v6309_v44 = vld [vmem:[%s9935_s3 + $0x164] sm:$0xf0] }
 0x2a4   :  { %v987_v45 = vpop.f32.mrf.mxu1 }
 0x2a5   :  { %v988_v62 = vadd.f32 %v987_v45, %v7536_v4  ;;  %v980_v4 = vadd.f32 %v979_v50, %v7603_v23  ;;  %v970_v50 = vadd.f32 %v7894_v54, %v7666_v2  ;;  %v5193_v2 = vor.u32 %v6305_v41, %v5192_v46  ;;  %v6317_v46 = vld [vmem:[%s9935_s3 + $0x1a4] sm:$0xf0] }
 0x2a6   :  { %v1112_v54 = vmax.f32 %v7938_v52, 0.0  ;;  %v6307_v52 = vld [vmem:[%s9935_s3 + $0x154] sm:$0xf0] }
 0x2aa   :  { %v1068_v27 = vpop.f32.mrf.mxu2 }
 0x2ab   :  { %4820 = vperm.xlu1 %6509, %v4817_v29   ;;  %4357 = vperm.xlu0 %6508, %v6103_v61   ;;  %v978_v61 = vadd.f32 %v7985_v35, %v7614_v20  ;;  %v1069_v13 = vadd.f32 %v1068_v27, %v980_v4  ;;  %v1059_v20 = vadd.f32 %v7959_v3, %v970_v50  ;;  %v1115_v35 = vmax.f32 %v1064_v30, 0.0  ;;  %v6296_v3 = vld [vmem:[%s9935_s3 + $0x104] sm:$0xf]  ;;  %v5232_v30 = vld [vmem:[%s9935_s3 + $0x190] sm:$0xf] }
 0x2ac   :  { %v989_v38 = vpop.f32.mrf.mxu1 }
 0x2ad   :  { %v990_v43 = vadd.f32 %v989_v38, %v7565_v39  ;;  %v1067_v0 = vadd.f32 %v1066_v11, %v978_v61  ;;  %v1117_v17 = vmax.f32 %v1069_v13, 0.0  ;;  %v1113_v51 = vmax.f32 %v1059_v20, 0.0  ;;  %v5224_v61 = vld [vmem:[%s9935_s3 + $0x180] sm:$0xf]  ;;  %v6313_v13 = vld [vmem:[%s9935_s3 + $0x184] sm:$0xf0] }
 0x2ae   :  { %v5202_v20 = vld [vmem:[%s9935_s3 + $0x158] sm:$0xf0] }
 0x2af   :  { %v1169_v45 = vpack.c.bf16 %v1113_v51, %v1112_v54 }
 0x2b0   :  { %1543 = vmatmul.bf16.gmra.mxu3 %v5169_v10 }
 0x2b2   :  { %v1071_v31 = vpop.f32.mrf.mxu2 }
 0x2b3   :  { %v1072_v56 = vadd.f32 %v1071_v31, %v983_v32  ;;  %v1116_v31 = vmax.f32 %v1067_v0, 0.0  ;;  %v5178_v32 = vld [vmem:[%s9935_s3 + $0x128] sm:$0xf0] }
 0x2b5   :  { %v1118_v60 = vmax.f32 %v1072_v56, 0.0  ;;  %v1171_v27 = vpack.c.bf16 %v1117_v17, %v1116_v31  ;;  %v6302_v56 = vld [vmem:[%s9935_s3 + $0x134] sm:$0xf]  ;;  %v6315_v17 = vld [vmem:[%s9935_s3 + $0x194] sm:$0xf0] }
 0x2b6   :  { %v5233_v50 = vor.u32 %v6315_v17, %v5232_v30  ;;  %v6306_v31 = vld [vmem:[%s9935_s3 + $0x154] sm:$0xf] }
 0x2ba   :  { %v1073_v1 = vpop.f32.mrf.mxu2 }
 0x2bb   :  { %v1074_v8 = vadd.f32 %v1073_v1, %v985_v42  ;;  %v1114_v1 = vmax.f32 %v7983_v16, 0.0  ;;  %v5162_v16 = vld [vmem:[%s9935_s3 + $0x108] sm:$0xf0]  ;;  %v5170_v42 = vld [vmem:[%s9935_s3 + $0x118] sm:$0xf0] }
 0x2bd   :  { %v1119_v24 = vmax.f32 %v1074_v8, 0.0  ;;  %v1170_v11 = vpack.c.bf16 %v1115_v35, %v1114_v1  ;;  %v5205_v35 = vor.u32 %v6306_v31, %v5202_v20  ;;  %v5240_v1 = vld [vmem:[%s9935_s3 + $0x1a0] sm:$0xf] }
 0x2be   :  { %v5241_v41 = vor.u32 %v6317_v46, %v5240_v1  ;;  %v5272_v1 = vld [vmem:[%s9935_s3 + $0x1e0] sm:$0xf]  ;;  %v6325_v46 = vld [vmem:[%s9935_s3 + $0x1e4] sm:$0xf0] }
 0x2bf   :  { %v1172_v23 = vpack.c.bf16 %v1119_v24, %v1118_v60  ;;  %v5225_v24 = vor.u32 %v6313_v13, %v5224_v61  ;;  %v6323_v61 = vld [vmem:[%s9935_s3 + $0x1d4] sm:$0xf0] }
 0x2c0   :  { %1548 = vmatmul.bf16.gmra.mxu3 %v5177_v37  ;;  %v5165_v37 = vor.u32 %v6296_v3, %v5162_v16  ;;  %v5248_v16 = vld [vmem:[%s9935_s3 + $0x1b0] sm:$0xf] }
 0x2c2   :  { %v1076_v28 = vpop.f32.mrf.mxu2 }
 0x2c3   :  { %v1077_v22 = vadd.f32 %v1076_v28, %v988_v62  ;;  %v5200_v28 = vld [vmem:[%s9935_s3 + $0x150] sm:$0xf]  ;;  %v6298_v62 = vld [vmem:[%s9935_s3 + $0x114] sm:$0xf] }
 0x2c4   :  { %v5201_v38 = vor.u32 %v6307_v52, %v5200_v28  ;;  %v6310_v28 = vld [vmem:[%s9935_s3 + $0x174] sm:$0xf]  ;;  %v5218_v52 = vld [vmem:[%s9935_s3 + $0x178] sm:$0xf0] }
 0x2c5   :  { %v1120_v29 = vmax.f32 %v1077_v22, 0.0  ;;  %v5208_v22 = vld [vmem:[%s9935_s3 + $0x160] sm:$0xf] }
 0x2c6   :  { %v5209_v19 = vor.u32 %v6309_v44, %v5208_v22 }
 0x2ca   :  { %v1078_v53 = vpop.f32.mrf.mxu2 }
 0x2cb   :  { %v1079_v5 = vadd.f32 %v1078_v53, %v990_v43  ;;  %v5173_v43 = vor.u32 %v6298_v62, %v5170_v42  ;;  %v6300_v53 = vld [vmem:[%s9935_s3 + $0x124] sm:$0xf]  ;;  %v5256_v42 = vld [vmem:[%s9935_s3 + $0x1c0] sm:$0xf] }
 0x2cc   :  { %v5181_v8 = vor.u32 %v6300_v53, %v5178_v32  ;;  %v5226_v53 = vld [vmem:[%s9935_s3 + $0x188] sm:$0xf0] }
 0x2cd   :  { %v1121_v39 = vmax.f32 %v1079_v5, 0.0  ;;  %v5216_v5 = vld [vmem:[%s9935_s3 + $0x170] sm:$0xf] }
 0x2cf   :  { %v1173_v10 = vpack.c.bf16 %v1121_v39, %v1120_v29  ;;  %v5186_v29 = vld [vmem:[%s9935_s3 + $0x138] sm:$0xf0] }
 0x2d0   :  { %1553 = vmatmul.bf16.gmra.mxu3 %v5185_v57  ;;  %v6311_v57 = vld [vmem:[%s9935_s3 + $0x174] sm:$0xf0]  ;;  %v5189_v39 = vor.u32 %v6302_v56, %v5186_v29 }
 0x2d1   :  { %1622 = vmatpush.bf16.msrb.mxu0 %v1173_v10  ;;  %v5217_v4 = vor.u32 %v6311_v57, %v5216_v5  ;;  %v6304_v10 = vld [vmem:[%s9935_s3 + $0x144] sm:$0xf] }
 0x2d2   :  { %v5197_v0 = vor.u32 %v6304_v10, %v5194_v12  ;;  %v6314_v12 = vld [vmem:[%s9935_s3 + $0x194] sm:$0xf] }
 0x2d5   :  { %1623 = vmatpush.bf16.msrb.mxu0 %v1172_v23 }
 0x2d9   :  { %1624 = vmatpush.bf16.msrb.mxu0 %v1171_v27 }
 0x2dd   :  { %1625 = vmatpush.bf16.msrb.mxu0 %v1170_v11  ;;  %v6308_v11 = vld [vmem:[%s9935_s3 + $0x164] sm:$0xf] }
 0x2e0   :  { %1558 = vmatmul.bf16.gmra.mxu3 %v5193_v2  ;;  %v5210_v2 = vld [vmem:[%s9935_s3 + $0x168] sm:$0xf0] }
 0x2e1   :  { %1626 = vmatpush.bf16.msrb.mxu0 %v1169_v45  ;;  %v5213_v54 = vor.u32 %v6308_v11, %v5210_v2  ;;  %v6319_v45 = vld [vmem:[%s9935_s3 + $0x1b4] sm:$0xf0]  ;;  %v5273_v11 = vor.u32 %v6325_v46, %v5272_v1  ;;  %v6316_v2 = vld [vmem:[%s9935_s3 + $0x1a4] sm:$0xf] }
 0x2e4   :  { %1627 = vmatmul.bf16.vlgmr.msrb.gmra.mxu0 %v5165_v37  ;;  %v5249_v37 = vor.u32 %v6319_v45, %v5248_v16 }
 0x2f0   :  { %1563 = vmatmul.bf16.gmra.mxu3 %v5201_v38  ;;  %v5221_v38 = vor.u32 %v6310_v28, %v5218_v52 }
 0x2f4   :  { %1632 = vmatmul.bf16.gmra.mxu0 %v5173_v43  ;;  %v6321_v43 = vld [vmem:[%s9935_s3 + $0x1c4] sm:$0xf0] }
 0x2f5   :  { %v5257_v44 = vor.u32 %v6321_v43, %v5256_v42  ;;  %v5280_v42 = vld [vmem:[%s9935_s3 + $0x1f0] sm:$0xf]  ;;  %v6327_v43 = vld [vmem:[%s9935_s3 + $0x1f4] sm:$0xf0] }
 0x300   :  { %1568 = vmatmul.bf16.gmra.mxu3 %v5209_v19  ;;  %v6312_v19 = vld [vmem:[%s9935_s3 + $0x184] sm:$0xf] }
 0x304   :  { %1637 = vmatmul.bf16.gmra.mxu0 %v5181_v8  ;;  %v5229_v8 = vor.u32 %v6312_v19, %v5226_v53  ;;  %v5281_v19 = vor.u32 %v6327_v43, %v5280_v42  ;;  %v6326_v42 = vld [vmem:[%s9935_s3 + $0x1f4] sm:$0xf]  ;;  %v5282_v43 = vld [vmem:[%s9935_s3 + $0x1f8] sm:$0xf0] }
 0x310   :  { %1573 = vmatmul.bf16.gmra.mxu3 %v5217_v4 }
 0x314   :  { %1642 = vmatmul.bf16.gmra.mxu0 %v5189_v39  ;;  %v5264_v39 = vld [vmem:[%s9935_s3 + $0x1d0] sm:$0xf] }
 0x315   :  { %v5265_v10 = vor.u32 %v6323_v61, %v5264_v39  ;;  %v9967_v61 = vld [vmem:[#allocation24_spill] sm:$0xff] }
 0x320   :  { %1578 = vmatmul.bf16.gmra.mxu3 %v5225_v24 }
 0x323   :  { %v1539_v60 = vpop.f32.mrf.mxu3 }
 0x324   :  { %1647 = vmatmul.bf16.gmra.mxu0 %v5197_v0  ;;  %v1540_v32 = vadd.f32 %v1539_v60, %v7906_v7 }
 0x32b   :  { %v1541_v23 = vpop.f32.mrf.mxu3 }
 0x32c   :  { %v1542_v56 = vadd.f32 %v1541_v23, %v7912_v48  ;;  %v5234_v48 = vld [vmem:[%s9935_s3 + $0x198] sm:$0xf0] }
 0x32d   :  { %v5237_v17 = vor.u32 %v6314_v12, %v5234_v48  ;;  %v6320_v48 = vld [vmem:[%s9935_s3 + $0x1c4] sm:$0xf] }
 0x330   :  { %1583 = vmatmul.bf16.gmra.mxu3 %v5233_v50 }
 0x333   :  { %v1544_v27 = vpop.f32.mrf.mxu3 }
 0x334   :  { %1652 = vmatmul.bf16.gmra.mxu0 %v5205_v35  ;;  %v1545_v30 = vadd.f32 %v1544_v27, %v7881_v58 }
 0x33b   :  { %v1546_v51 = vpop.f32.mrf.mxu3 }
 0x33c   :  { %v1547_v31 = vadd.f32 %v1546_v51, %v7879_v26  ;;  %v5242_v26 = vld [vmem:[%s9935_s3 + $0x1a8] sm:$0xf0] }
 0x33d   :  { %v5245_v16 = vor.u32 %v6316_v2, %v5242_v26  ;;  %v6324_v26 = vld [vmem:[%s9935_s3 + $0x1e4] sm:$0xf] }
 0x340   :  { %1588 = vmatmul.bf16.gmra.mxu3 %v5241_v41 }
 0x343   :  { %v1549_v3 = vpop.f32.mrf.mxu3 }
 0x344   :  { %1657 = vmatmul.bf16.gmra.mxu0 %v5213_v54  ;;  %v1550_v54 = vadd.f32 %v1549_v3, %v7853_v49 }
 0x34b   :  { %v1551_v62 = vpop.f32.mrf.mxu3 }
 0x34c   :  { %v1552_v52 = vadd.f32 %v1551_v62, %v7866_v34  ;;  %v5250_v34 = vld [vmem:[%s9935_s3 + $0x1b8] sm:$0xf0] }
 0x350   :  { %1593 = vmatmul.bf16.gmra.mxu3 %v5249_v37 }
 0x353   :  { %v1554_v22 = vpop.f32.mrf.mxu3 }
 0x354   :  { %1662 = vmatmul.bf16.gmra.mxu0 %v5221_v38 }
 0x35b   :  { %v1556_v4 = vpop.f32.mrf.mxu3 }
 0x360   :  { %1598 = vmatmul.bf16.gmra.mxu3 %v5257_v44 }
 0x361   :  { %v1628_v5 = vpop.f32.mrf.mxu0 }
 0x362   :  { %v1629_v57 = vadd.f32 %v1628_v5, %v1540_v32  ;;  %v6318_v32 = vld [vmem:[%s9935_s3 + $0x1b4] sm:$0xf] }
 0x363   :  { %v1559_v60 = vpop.f32.mrf.mxu3 }
 0x364   :  { %1667 = vmatmul.bf16.gmra.mxu0 %v5229_v8  ;;  %v1708_v24 = vmax.f32 %v1629_v57, 0.0  ;;  %v9966_v8 = vld [vmem:[#allocation22_spill] sm:$0xff]  ;;  %v5253_v57 = vor.u32 %v6318_v32, %v5250_v34 }
 0x365   :  { %v1555_v5 = vadd.f32 %v1554_v22, %v9966_v8  ;;  %v5258_v22 = vld [vmem:[%s9935_s3 + $0x1c8] sm:$0xf0]  ;;  %v9970_v34 = vld [vmem:[#allocation10_spill] sm:$0xff] }
 0x369   :  { %v1630_v29 = vpop.f32.mrf.mxu0 }
 0x36a   :  { %v1631_v13 = vadd.f32 %v1630_v29, %v1542_v56 }
 0x36b   :  { %v8196_v20 = vpop.f32.mrf.mxu3 }
 0x36c   :  { %v1709_v7 = vmax.f32 %v1631_v13, 0.0  ;;  %v1557_v13 = vadd.f32 %v1556_v4, %v9967_v61  ;;  %v9972_v61 = vld [vmem:[#allocation11_spill] sm:$0xff] }
 0x36e   :  { %v8192_v0 = vpack.c.bf16 %v1709_v7, %v1708_v24 }
 0x370   :  { %1603 = vmatmul.bf16.gmra.mxu3 %v5265_v10 }
 0x371   :  { %v1633_v23 = vpop.f32.mrf.mxu0 }
 0x372   :  { %v1634_v50 = vadd.f32 %v1633_v23, %v1545_v30 }
 0x373   :  { %v8213_v28 = vpop.f32.mrf.mxu3 }
 0x374   :  { %1672 = vmatmul.bf16.gmra.mxu0 %v5237_v17  ;;  %v1710_v58 = vmax.f32 %v1634_v50, 0.0  ;;  %v9968_v17 = vld [vmem:[#allocation20_spill] sm:$0xff]  ;;  %v5261_v50 = vor.u32 %v6320_v48, %v5258_v22 }
 0x375   :  { %v1560_v23 = vadd.f32 %v1559_v60, %v9968_v17 }
 0x379   :  { %v1635_v35 = vpop.f32.mrf.mxu0 }
 0x37a   :  { %v1636_v41 = vadd.f32 %v1635_v35, %v1547_v31 }
 0x37b   :  { %v1566_v53 = vpop.f32.mrf.mxu3 }
 0x37c   :  { %v1711_v27 = vmax.f32 %v1636_v41, 0.0  ;;  %v6322_v41 = vld [vmem:[%s9935_s3 + $0x1d4] sm:$0xf] }
 0x37e   :  { %v8210_v51 = vpack.c.bf16 %v1711_v27, %v1710_v58  ;;  %v5266_v58 = vld [vmem:[%s9935_s3 + $0x1d8] sm:$0xf0] }
 0x37f   :  { %v5269_v27 = vor.u32 %v6322_v41, %v5266_v58  ;;  %v9975_v58 = vld [vmem:[#allocation19_spill] sm:$0xff] }
 0x380   :  { %1608 = vmatmul.bf16.gmra.mxu3 %v5273_v11 }
 0x381   :  { %v1638_v45 = vpop.f32.mrf.mxu0 }
 0x382   :  { %v1639_v37 = vadd.f32 %v1638_v45, %v1550_v54  ;;  %v5274_v54 = vld [vmem:[%s9935_s3 + $0x1e8] sm:$0xf0] }
 0x383   :  { %v1569_v39 = vpop.f32.mrf.mxu3  ;;  %v5277_v45 = vor.u32 %v6324_v26, %v5274_v54 }
 0x384   :  { %1677 = vmatmul.bf16.gmra.mxu0 %v5245_v16  ;;  %v1712_v49 = vmax.f32 %v1639_v37, 0.0 }
 0x389   :  { %v1640_v38 = vpop.f32.mrf.mxu0 }
 0x38a   :  { %v1641_v44 = vadd.f32 %v1640_v38, %v1552_v52 }
 0x38b   :  { %v1571_v31 = vpop.f32.mrf.mxu3 }
 0x38c   :  { %v1713_v3 = vmax.f32 %v1641_v44, 0.0  ;;  %v5285_v44 = vor.u32 %v6326_v42, %v5282_v43  ;;  %v1572_v8 = vadd.f32 %v1571_v31, %v9970_v34 }
 0x38e   :  { %v8228_v62 = vpack.c.bf16 %v1713_v3, %v1712_v49 }
 0x390   :  { %1613 = vmatmul.bf16.gmra.mxu3 %v5281_v19  ;;  %v9969_v19 = vld [vmem:[#allocation9_spill] sm:$0xff] }
 0x391   :  { %v1643_v56 = vpop.f32.mrf.mxu0 }
 0x392   :  { %v1644_v29 = vadd.f32 %v1643_v56, %v1555_v5  ;;  %v9971_v5 = vld [vmem:[#allocation8_spill] sm:$0xff] }
 0x393   :  { %v1574_v46 = vpop.f32.mrf.mxu3 }
 0x394   :  { %1682 = vmatmul.bf16.gmra.mxu0 %v5253_v57  ;;  %v1714_v10 = vmax.f32 %v1644_v29, 0.0  ;;  %v1575_v32 = vadd.f32 %v1574_v46, %v9969_v19 }
 0x399   :  { %v1645_v24 = vpop.f32.mrf.mxu0 }
 0x39a   :  { %v1646_v7 = vadd.f32 %v1645_v24, %v1557_v13  ;;  %v1570_v13 = vadd.f32 %v1569_v39, %v9972_v61  ;;  %v5360_v61 = vld [vmem:[%s9935_s3 + $0x210] sm:$0xf] }
 0x39b   :  { %v1576_v2 = vpop.f32.mrf.mxu3 }
 0x39c   :  { %v1715_v12 = vmax.f32 %v1646_v7, 0.0  ;;  %v1577_v57 = vadd.f32 %v1576_v2, %v9971_v5  ;;  %v9976_v2 = vld [vmem:[#allocation29_spill] sm:$0xff] }
 0x39e   :  { %v8238_v30 = vpack.c.bf16 %v1715_v12, %v1714_v10  ;;  %v9973_v10 = vld [vmem:[#allocation17_spill] sm:$0xff] }
 0x39f   :  { %v1567_v12 = vadd.f32 %v1566_v53, %v9973_v10  ;;  %v9979_v10 = vld [vmem:[#allocation21_spill] sm:$0xff] }
 0x3a1   :  { %v1648_v35 = vpop.f32.mrf.mxu0 }
 0x3a2   :  { %v1649_v4 = vadd.f32 %v1648_v35, %v1560_v23 }
 0x3a3   :  { %v1579_v16 = vpop.f32.mrf.mxu3 }
 0x3a4   :  { %1687 = vmatmul.bf16.gmra.mxu0 %v5261_v50  ;;  %v9974_v50 = vld [vmem:[#allocation15_spill] sm:$0xff]  ;;  %v1580_v39 = vadd.f32 %v1579_v16, %v9976_v2 }
 0x3a5   :  { %v1565_v35 = vadd.f32 %v8213_v28, %v9974_v50  ;;  %v6333_v50 = vld [vmem:[%s9935_s3 + $0x224] sm:$0xf0] }
 0x3a9   :  { %v1650_v1 = vpop.f32.mrf.mxu0 }
 0x3ab   :  { %v8253_v52 = vpop.f32.mrf.mxu3 }
 0x3b1   :  { %v1653_v11 = vpop.f32.mrf.mxu0 }
 0x3b2   :  { %v1654_v26 = vadd.f32 %v1653_v11, %v1565_v35  ;;  %v9977_v11 = vld [vmem:[#allocation27_spill] sm:$0xff] }
 0x3b3   :  { %v1584_v3 = vpop.f32.mrf.mxu3 }
 0x3b4   :  { %1692 = vmatmul.bf16.gmra.mxu0 %v5269_v27  ;;  %v1562_v27 = vadd.f32 %v8196_v20, %v9975_v58  ;;  %v1718_v43 = vmax.f32 %v1654_v26, 0.0  ;;  %v1585_v16 = vadd.f32 %v1584_v3, %v9977_v11  ;;  %v5376_v26 = vld [vmem:[%s9935_s3 + $0x230] sm:$0xf] }
 0x3b9   :  { %v1655_v60 = vpop.f32.mrf.mxu0 }
 0x3ba   :  { %v1656_v46 = vadd.f32 %v1655_v60, %v1567_v12 }
 0x3bb   :  { %v8266_v23 = vpop.f32.mrf.mxu3 }
 0x3c1   :  { %v1658_v37 = vpop.f32.mrf.mxu0 }
 0x3c2   :  { %v1659_v48 = vadd.f32 %v1658_v37, %v1570_v13  ;;  %v1719_v37 = vmax.f32 %v1656_v46, 0.0  ;;  %v6331_v13 = vld [vmem:[%s9935_s3 + $0x214] sm:$0xf0] }
 0x3c4   :  { %1697 = vmatmul.bf16.gmra.mxu0 %v5277_v45  ;;  %v1720_v54 = vmax.f32 %v1659_v48, 0.0  ;;  %v1651_v45 = vadd.f32 %v1650_v1, %v1562_v27  ;;  %v1778_v60 = vpack.c.bf16 %v1719_v37, %v1718_v43 }
 0x3c6   :  { %v1717_v28 = vmax.f32 %v1651_v45, 0.0 }
 0x3c9   :  { %v1660_v38 = vpop.f32.mrf.mxu0 }
 0x3ca   :  { %v1661_v24 = vadd.f32 %v1660_v38, %v1572_v8  ;;  %v6329_v8 = vld [vmem:[%s9935_s3 + $0x204] sm:$0xf0] }
 0x3cc   :  { %v1721_v31 = vmax.f32 %v1661_v24, 0.0 }
 0x3ce   :  { %v1779_v42 = vpack.c.bf16 %v1721_v31, %v1720_v54  ;;  %v6335_v54 = vld [vmem:[%s9935_s3 + $0x234] sm:$0xf0] }
 0x3cf   :  { %v5377_v45 = vor.u32 %v6335_v54, %v5376_v26  ;;  %v9985_v26 = vld [vmem:[#allocation13_spill] sm:$0xff] }
 0x3d1   :  { %v1663_v49 = vpop.f32.mrf.mxu0 }
 0x3d2   :  { %v1664_v56 = vadd.f32 %v1663_v49, %v1575_v32  ;;  %v1716_v49 = vmax.f32 %v1649_v4, 0.0  ;;  %v5352_v4 = vld [vmem:[%s9935_s3 + $0x200] sm:$0xf] }
 0x3d3   :  { %v5353_v5 = vor.u32 %v6329_v8, %v5352_v4 }
 0x3d4   :  { %1702 = vmatmul.bf16.gmra.mxu0 %v5285_v44  ;;  %v1722_v22 = vmax.f32 %v1664_v56, 0.0  ;;  %v1589_v44 = vpop.f32.mrf.mxu3  ;;  %v1777_v20 = vpack.c.bf16 %v1717_v28, %v1716_v49  ;;  %v5384_v28 = vld [vmem:[%s9935_s3 + $0x240] sm:$0xf] }
 0x3d9   :  { %v1665_v29 = vpop.f32.mrf.mxu0 }
 0x3da   :  { %v1666_v7 = vadd.f32 %v1665_v29, %v1577_v57  ;;  %v9978_v57 = vld [vmem:[#allocation26_spill] sm:$0xff] }
 0x3db   :  { %v1590_v56 = vadd.f32 %v1589_v44, %v9978_v57 }
 0x3dc   :  { %v1723_v17 = vmax.f32 %v1666_v7, 0.0  ;;  %v8279_v1 = vpop.f32.mrf.mxu3  ;;  %v5361_v7 = vor.u32 %v6331_v13, %v5360_v61  ;;  %v9982_v61 = vld [vmem:[#allocation12_spill] sm:$0xff] }
 0x3de   :  { %v1780_v41 = vpack.c.bf16 %v1723_v17, %v1722_v22  ;;  %v5368_v17 = vld [vmem:[%s9935_s3 + $0x220] sm:$0xf] }
 0x3df   :  { %v5369_v31 = vor.u32 %v6333_v50, %v5368_v17  ;;  %v9984_v50 = vld [vmem:[#allocation7_spill] sm:$0xff] }
 0x3e0   :  { %2142 = vmatpush.bf16.msrb.mxu1 %v1780_v41  ;;  %v9980_v41 = vld [vmem:[#allocation16_spill] sm:$0xff] }
 0x3e1   :  { %v1668_v53 = vpop.f32.mrf.mxu0 }
 0x3e2   :  { %v8273_v38 = vadd.f32 %v1668_v53, %v1580_v39 }
 0x3e4   :  { %2143 = vmatpush.bf16.msrb.mxu1 %v1779_v42 }
 0x3e8   :  { %2144 = vmatpush.bf16.msrb.mxu1 %v1778_v60  ;;  %v6337_v60 = vld [vmem:[%s9935_s3 + $0x244] sm:$0xf0] }
 0x3e9   :  { %v8275_v19 = vpop.f32.mrf.mxu0  ;;  %v5385_v49 = vor.u32 %v6337_v60, %v5384_v28 }
 0x3ec   :  { %2145 = vmatpush.bf16.msrb.mxu1 %v1777_v20 }
 0x3f0   :  { %2146 = vmatpush.bf16.msrb.mxu1 %v8238_v30  ;;  %v1594_v30 = vpop.f32.mrf.mxu3 }
 0x3f1   :  { %v1673_v32 = vpop.f32.mrf.mxu0  ;;  %v1595_v12 = vadd.f32 %v1594_v30, %v9979_v10 }
 0x3f2   :  { %v8281_v34 = vadd.f32 %v1673_v32, %v1585_v16  ;;  %v5392_v16 = vld [vmem:[%s9935_s3 + $0x250] sm:$0xf]  ;;  %v6339_v32 = vld [vmem:[%s9935_s3 + $0x254] sm:$0xf0] }
 0x3f3   :  { %v5393_v30 = vor.u32 %v6339_v32, %v5392_v16 }
 0x3f4   :  { %2147 = vmatpush.bf16.msrb.mxu1 %v8228_v62 }
 0x3f8   :  { %2148 = vmatpush.bf16.msrb.mxu1 %v8210_v51  ;;  %v8297_v51 = vpop.f32.mrf.mxu3 }
 0x3f9   :  { %v8291_v3 = vpop.f32.mrf.mxu0 }
 0x3fc   :  { %2149 = vmatpush.bf16.msrb.mxu1 %v8192_v0 }
 0x3ff   :  { %2150 = vmatmul.bf16.vlgmr.msrb.gmra.mxu1 %v5353_v5 }
 0x400   :  { %v1599_v0 = vpop.f32.mrf.mxu3 }
 0x401   :  { %v1678_v62 = vpop.f32.mrf.mxu0  ;;  %v1600_v58 = vadd.f32 %v1599_v0, %v9980_v41 }
 0x402   :  { %v8295_v29 = vadd.f32 %v1678_v62, %v1590_v56  ;;  %v9981_v56 = vld [vmem:[#allocation6_spill] sm:$0xff] }
 0x408   :  { %v1601_v35 = vpop.f32.mrf.mxu3 }
 0x409   :  { %v8305_v24 = vpop.f32.mrf.mxu0 }
 0x40f   :  { %2155 = vmatmul.bf16.gmra.mxu1 %v5361_v7  ;;  %v9983_v7 = vld [vmem:[#allocation5_spill] sm:$0xff] }
 0x410   :  { %v1604_v39 = vpop.f32.mrf.mxu3 }
 0x411   :  { %v1683_v48 = vpop.f32.mrf.mxu0 }
 0x412   :  { %v8308_v22 = vadd.f32 %v1683_v48, %v1595_v12  ;;  %v5400_v12 = vld [vmem:[%s9935_s3 + $0x260] sm:$0xf]  ;;  %v6341_v48 = vld [vmem:[%s9935_s3 + $0x264] sm:$0xf0] }
 0x418   :  { %v1606_v37 = vpop.f32.mrf.mxu3 }
 0x419   :  { %v1685_v46 = vpop.f32.mrf.mxu0  ;;  %v1607_v54 = vadd.f32 %v1606_v37, %v9985_v26 }
 0x41f   :  { %2160 = vmatmul.bf16.gmra.mxu1 %v5369_v31 }
 0x420   :  { %v1609_v43 = vpop.f32.mrf.mxu3 }
 0x421   :  { %v1688_v27 = vpop.f32.mrf.mxu0  ;;  %v1610_v31 = vadd.f32 %v1609_v43, %v9984_v50 }
 0x422   :  { %v8317_v2 = vadd.f32 %v1688_v27, %v1600_v58  ;;  %v5401_v27 = vor.u32 %v6341_v48, %v5400_v12  ;;  %v9990_v48 = vld [vmem:[#allocation28_spill] sm:$0xff] }
 0x428   :  { %v1611_v20 = vpop.f32.mrf.mxu3 }
 0x429   :  { %v1690_v53 = vpop.f32.mrf.mxu0  ;;  %v1612_v13 = vadd.f32 %v1611_v20, %v9982_v61  ;;  %v9988_v61 = vld [vmem:[#allocation23_spill] sm:$0xff] }
 0x42a   :  { %v1597_v37 = vadd.f32 %v8297_v51, %v9988_v61  ;;  %v5440_v61 = vld [vmem:[%s9935_s3 + $0x2b0] sm:$0xf] }
 0x42f   :  { %2165 = vmatmul.bf16.gmra.mxu1 %v5377_v45 }
 0x430   :  { %v1614_v8 = vpop.f32.mrf.mxu3 }
 0x431   :  { %v1693_v42 = vpop.f32.mrf.mxu0  ;;  %v1615_v62 = vadd.f32 %v1614_v8, %v9981_v56 }
 0x438   :  { %v1616_v57 = vpop.f32.mrf.mxu3 }
 0x439   :  { %v1695_v44 = vpop.f32.mrf.mxu0  ;;  %v1617_v0 = vadd.f32 %v1616_v57, %v9983_v7 }
 0x43a   :  { %v1696_v16 = vadd.f32 %v1695_v44, %v1607_v54  ;;  %v9989_v44 = vld [vmem:[#allocation25_spill] sm:$0xff] }
 0x43f   :  { %2170 = vmatmul.bf16.gmra.mxu1 %v5385_v49  ;;  %v9986_v49 = vld [vmem:[#allocation14_spill] sm:$0xff] }
 0x440   :  { %v1605_v20 = vadd.f32 %v1604_v39, %v9986_v49  ;;  %v5424_v49 = vld [vmem:[%s9935_s3 + $0x290] sm:$0xf] }
 0x441   :  { %v1698_v11 = vpop.f32.mrf.mxu0 }
 0x442   :  { %v1699_v45 = vadd.f32 %v1698_v11, %v1610_v31  ;;  %v1694_v57 = vadd.f32 %v1693_v42, %v1605_v20  ;;  %v6347_v20 = vld [vmem:[%s9935_s3 + $0x294] sm:$0xf0] }
 0x444   :  { %v1736_v56 = vmax.f32 %v1699_v45, 0.0  ;;  %v1734_v11 = vmax.f32 %v1694_v57, 0.0  ;;  %v6349_v57 = vld [vmem:[%s9935_s3 + $0x2a4] sm:$0xf0] }
 0x449   :  { %v1700_v4 = vpop.f32.mrf.mxu0 }
 0x44a   :  { %v1701_v41 = vadd.f32 %v1700_v4, %v1612_v13  ;;  %v1735_v4 = vmax.f32 %v1696_v16, 0.0  ;;  %v1686_v13 = vadd.f32 %v1685_v46, %v1597_v37  ;;  %v6330_v16 = vld [vmem:[%s9935_s3 + $0x214] sm:$0xf]  ;;  %v6351_v37 = vld [vmem:[%s9935_s3 + $0x2b4] sm:$0xf0] }
 0x44c   :  { %v1737_v32 = vmax.f32 %v1701_v41, 0.0  ;;  %v1786_v39 = vpack.c.bf16 %v1735_v4, %v1734_v11  ;;  %v1731_v42 = vmax.f32 %v1686_v13, 0.0  ;;  %v9991_v41 = vld [vmem:[#allocation30_spill] sm:$0xff]  ;;  %v5378_v13 = vld [vmem:[%s9935_s3 + $0x238] sm:$0xf0] }
 0x44d   :  { %v6334_v11 = vld [vmem:[%s9935_s3 + $0x234] sm:$0xf] }
 0x44f   :  { %2175 = vmatmul.bf16.gmra.mxu1 %v5393_v30  ;;  %v9987_v30 = vld [vmem:[#allocation18_spill] sm:$0xff] }
 0x451   :  { %v1703_v5 = vpop.f32.mrf.mxu0 }
 0x452   :  { %v1704_v10 = vadd.f32 %v1703_v5, %v1615_v62  ;;  %v1602_v5 = vadd.f32 %v1601_v35, %v9987_v30  ;;  %v1787_v62 = vpack.c.bf16 %v1737_v32, %v1736_v56  ;;  %v5408_v35 = vld [vmem:[%s9935_s3 + $0x270] sm:$0xf]  ;;  %v5362_v32 = vld [vmem:[%s9935_s3 + $0x218] sm:$0xf0]  ;;  %v6332_v56 = vld [vmem:[%s9935_s3 + $0x224] sm:$0xf] }
 0x453   :  { %v5365_v30 = vor.u32 %v6330_v16, %v5362_v32 }
 0x454   :  { %v1738_v28 = vmax.f32 %v1704_v10, 0.0  ;;  %v1691_v43 = vadd.f32 %v1690_v53, %v1602_v5  ;;  %v1732_v10 = vmax.f32 %v8317_v2, 0.0  ;;  %v6343_v53 = vld [vmem:[%s9935_s3 + $0x274] sm:$0xf0]  ;;  %v5432_v5 = vld [vmem:[%s9935_s3 + $0x2a0] sm:$0xf] }
 0x455   :  { %v5409_v12 = vor.u32 %v6343_v53, %v5408_v35  ;;  %v5433_v4 = vor.u32 %v6349_v57, %v5432_v5  ;;  %v6353_v35 = vld [vmem:[%s9935_s3 + $0x2c4] sm:$0xf0]  ;;  %v6336_v53 = vld [vmem:[%s9935_s3 + $0x244] sm:$0xf]  ;;  %v5418_v5 = vld [vmem:[%s9935_s3 + $0x288] sm:$0xf0] }
 0x456   :  { %v1733_v7 = vmax.f32 %v1691_v43, 0.0  ;;  %v5370_v43 = vld [vmem:[%s9935_s3 + $0x228] sm:$0xf0] }
 0x458   :  { %v1785_v46 = vpack.c.bf16 %v1733_v7, %v1732_v10  ;;  %v5448_v10 = vld [vmem:[%s9935_s3 + $0x2c0] sm:$0xf] }
 0x459   :  { %v1705_v17 = vpop.f32.mrf.mxu0 }
 0x45a   :  { %v1706_v58 = vadd.f32 %v1705_v17, %v1617_v0  ;;  %v1592_v0 = vadd.f32 %v8279_v1, %v9989_v44  ;;  %v1587_v17 = vadd.f32 %v8266_v23, %v9990_v48  ;;  %v1730_v1 = vmax.f32 %v8308_v22, 0.0 }
 0x45b   :  { %v1726_v23 = vmax.f32 %v8281_v34, 0.0  ;;  %v5354_v34 = vld [vmem:[%s9935_s3 + $0x208] sm:$0xf0]  ;;  %v5381_v44 = vor.u32 %v6334_v11, %v5378_v13 }
 0x45c   :  { %v1739_v60 = vmax.f32 %v1706_v58, 0.0  ;;  %v1681_v51 = vadd.f32 %v8305_v24, %v1592_v0  ;;  %v1676_v2 = vadd.f32 %v8291_v3, %v1587_v17  ;;  %v1784_v31 = vpack.c.bf16 %v1731_v42, %v1730_v1  ;;  %v5456_v17 = vld [vmem:[%s9935_s3 + $0x2d0] sm:$0xf]  ;;  %v6355_v1 = vld [vmem:[%s9935_s3 + $0x2d4] sm:$0xf0] }
 0x45d   :  { %v1582_v58 = vadd.f32 %v8253_v52, %v9991_v41  ;;  %v1724_v3 = vmax.f32 %v8273_v38, 0.0  ;;  %v6345_v52 = vld [vmem:[%s9935_s3 + $0x284] sm:$0xf0]  ;;  %v5449_v42 = vor.u32 %v6353_v35, %v5448_v10 }
 0x45e   :  { %v1788_v8 = vpack.c.bf16 %v1739_v60, %v1738_v28  ;;  %v1729_v50 = vmax.f32 %v1681_v51, 0.0  ;;  %v1727_v26 = vmax.f32 %v1676_v2, 0.0  ;;  %v5416_v28 = vld [vmem:[%s9935_s3 + $0x280] sm:$0xf]  ;;  %v5386_v51 = vld [vmem:[%s9935_s3 + $0x248] sm:$0xf0] }
 0x45f   :  { %2180 = vmatmul.bf16.gmra.mxu1 %v5401_v27  ;;  %v1728_v27 = vmax.f32 %v8295_v29, 0.0  ;;  %v1671_v24 = vadd.f32 %v8275_v19, %v1582_v58  ;;  %v6328_v19 = vld [vmem:[%s9935_s3 + $0x204] sm:$0xf]  ;;  %v5417_v60 = vor.u32 %v6345_v52, %v5416_v28  ;;  %v6338_v2 = vld [vmem:[%s9935_s3 + $0x254] sm:$0xf] }
 0x460   :  { %2231 = vmatpush.bf16.msrb.mxu2 %v1788_v8  ;;  %v1782_v45 = vpack.c.bf16 %v1727_v26, %v1726_v23  ;;  %v5357_v38 = vor.u32 %v6328_v19, %v5354_v34  ;;  %v5425_v8 = vor.u32 %v6347_v20, %v5424_v49  ;;  %v6340_v26 = vld [vmem:[%s9935_s3 + $0x264] sm:$0xf]  ;;  %v5472_v52 = vld [vmem:[%s9935_s3 + $0x2f0] sm:$0xf]  ;;  %v6359_v19 = vld [vmem:[%s9935_s3 + $0x2f4] sm:$0xf0] }
 0x461   :  { %v1783_v54 = vpack.c.bf16 %v1729_v50, %v1728_v27  ;;  %v1725_v22 = vmax.f32 %v1671_v24, 0.0  ;;  %v5394_v50 = vld [vmem:[%s9935_s3 + $0x258] sm:$0xf0]  ;;  %v5464_v27 = vld [vmem:[%s9935_s3 + $0x2e0] sm:$0xf] }
 0x462   :  { %v5397_v41 = vor.u32 %v6338_v2, %v5394_v50  ;;  %v6357_v24 = vld [vmem:[%s9935_s3 + $0x2e4] sm:$0xf0]  ;;  %v6342_v34 = vld [vmem:[%s9935_s3 + $0x274] sm:$0xf] }
 0x463   :  { %v1781_v29 = vpack.c.bf16 %v1725_v22, %v1724_v3  ;;  %v5465_v22 = vor.u32 %v6357_v24, %v5464_v27  ;;  %v8462_v3 = vpop.permute.xlu0 %1959 }
 0x464   :  { %2232 = vmatpush.bf16.msrb.mxu2 %v1787_v62  ;;  %v5373_v62 = vor.u32 %v6332_v56, %v5370_v43  ;;  %v8490_v56 = vpop.permute.xlu2 %1954 }
 0x468   :  { %2233 = vmatpush.bf16.msrb.mxu2 %v1786_v39  ;;  %v5441_v39 = vor.u32 %v6351_v37, %v5440_v61 }
 0x46b   :  { %v8478_v20 = vpop.permute.xlu0 %1944 }
 0x46c   :  { %2234 = vmatpush.bf16.msrb.mxu2 %v1785_v46  ;;  %v5389_v46 = vor.u32 %v6336_v53, %v5386_v51  ;;  %v1850_v11 = vpop.permute.xlu2 %1849 }
 0x46f   :  { %2185 = vmatmul.bf16.gmra.mxu1 %v5409_v12 }
 0x470   :  { %2235 = vmatpush.bf16.msrb.mxu2 %v1784_v31  ;;  %v5457_v31 = vor.u32 %v6355_v1, %v5456_v17 }
 0x474   :  { %2236 = vmatpush.bf16.msrb.mxu2 %v1783_v54  ;;  %v5402_v54 = vld [vmem:[%s9935_s3 + $0x268] sm:$0xf0]  ;;  %v1835_v17 = vpop.permute.xlu2 %1834 }
 0x478   :  { %2237 = vmatpush.bf16.msrb.mxu2 %v1782_v45  ;;  %v5405_v45 = vor.u32 %v6340_v26, %v5402_v54 }
 0x47c   :  { %2238 = vmatpush.bf16.msrb.mxu2 %v1781_v29  ;;  %v2151_v7 = vpop.f32.mrf.mxu1  ;;  %v5410_v29 = vld [vmem:[%s9935_s3 + $0x278] sm:$0xf0] }
 0x47d   :  { %v5413_v49 = vor.u32 %v6342_v34, %v5410_v29 }
 0x47f   :  { %2190 = vmatmul.bf16.gmra.mxu1 %v5417_v60  ;;  %2239 = vmatmul.bf16.vlgmr.msrb.gmra.mxu2 %v5357_v38  ;;  %v1845_v60 = vpop.permute.xlu1 %1844  ;;  %v5473_v38 = vor.u32 %v6359_v19, %v5472_v52 }
 0x484   :  { %v2153_v0 = vpop.f32.mrf.mxu1 }
 0x487   :  { %v8482_v32 = vpop.permute.xlu1 %1949 }
 0x48c   :  { %v2156_v12 = vpop.f32.mrf.mxu1 }
 0x48d   :  { %v2157_v2 = vadd.f32 %v2156_v12, %v1835_v17 }
 0x48f   :  { %2195 = vmatmul.bf16.gmra.mxu1 %v5425_v8  ;;  %2244 = vmatmul.bf16.gmra.mxu2 %v5365_v30  ;;  %v1840_v8 = vpop.permute.xlu0 %1839  ;;  %v6344_v30 = vld [vmem:[%s9935_s3 + $0x284] sm:$0xf]  ;;  %v8492_v43 = vpop.permute.xlu1 %1934 }
 0x490   :  { %v5421_v57 = vor.u32 %v6344_v30, %v5418_v5 }
 0x494   :  { %v8432_v48 = vpop.f32.mrf.mxu1 }
 0x495   :  { %v2159_v27 = vadd.f32 %v8432_v48, %v1840_v8  ;;  %v6350_v48 = vld [vmem:[%s9935_s3 + $0x2b4] sm:$0xf] }
 0x497   :  { %v1830_v13 = vpop.permute.xlu1 %1829 }
 0x498   :  { %v2154_v10 = vadd.f32 %v2153_v0, %v1830_v13  ;;  %v5434_v0 = vld [vmem:[%s9935_s3 + $0x2a8] sm:$0xf0] }
 0x49c   :  { %v8446_v58 = vpop.f32.mrf.mxu1 }
 0x49d   :  { %v2162_v19 = vadd.f32 %v8446_v58, %v1845_v60 }
 0x49f   :  { %2200 = vmatmul.bf16.gmra.mxu1 %v5433_v4  ;;  %2249 = vmatmul.bf16.gmra.mxu2 %v5373_v62  ;;  %v1825_v4 = vpop.permute.xlu0 %1824 }
 0x4a0   :  { %v2152_v62 = vadd.f32 %v2151_v7, %v1825_v4 }
 0x4a4   :  { %v8460_v23 = vpop.f32.mrf.mxu1 }
 0x4a5   :  { %v2164_v8 = vadd.f32 %v8460_v23, %v1850_v11  ;;  %v5450_v23 = vld [vmem:[%s9935_s3 + $0x2c8] sm:$0xf0] }
 0x4ac   :  { %v8464_v28 = vpop.f32.mrf.mxu1 }
 0x4af   :  { %2205 = vmatmul.bf16.gmra.mxu1 %v5441_v39  ;;  %2254 = vmatmul.bf16.gmra.mxu2 %v5381_v44  ;;  %v6346_v39 = vld [vmem:[%s9935_s3 + $0x294] sm:$0xf]  ;;  %v5426_v44 = vld [vmem:[%s9935_s3 + $0x298] sm:$0xf0] }
 0x4b0   :  { %v5429_v51 = vor.u32 %v6346_v39, %v5426_v44  ;;  %v6352_v44 = vld [vmem:[%s9935_s3 + $0x2c4] sm:$0xf] }
 0x4b4   :  { %v8480_v16 = vpop.f32.mrf.mxu1 }
 0x4b5   :  { %v2169_v11 = vadd.f32 %v8480_v16, %v8039_v55  ;;  %v5458_v55 = vld [vmem:[%s9935_s3 + $0x2d8] sm:$0xf0] }
 0x4bc   :  { %v2171_v1 = vpop.f32.mrf.mxu1 }
 0x4bf   :  { %2210 = vmatmul.bf16.gmra.mxu1 %v5449_v42  ;;  %2259 = vmatmul.bf16.gmra.mxu2 %v5389_v46 }
 0x4c4   :  { %v8509_v24 = vpop.f32.mrf.mxu1 }
 0x4cf   :  { %2215 = vmatmul.bf16.gmra.mxu1 %v5457_v31  ;;  %2264 = vmatmul.bf16.gmra.mxu2 %v5397_v41  ;;  %v6348_v41 = vld [vmem:[%s9935_s3 + $0x2a4] sm:$0xf] }
 0x4df   :  { %2220 = vmatmul.bf16.gmra.mxu1 %v5465_v22  ;;  %2269 = vmatmul.bf16.gmra.mxu2 %v5405_v45  ;;  %v5437_v22 = vor.u32 %v6348_v41, %v5434_v0 }
 0x4ef   :  { %2225 = vmatmul.bf16.gmra.mxu1 %v5473_v38  ;;  %2274 = vmatmul.bf16.gmra.mxu2 %v5413_v49  ;;  %v8514_v38 = vpop.f32.mrf.mxu1  ;;  %v5442_v49 = vld [vmem:[%s9935_s3 + $0x2b8] sm:$0xf0] }
 0x4f7   :  { %v2178_v58 = vpop.f32.mrf.mxu1 }
 0x4ff   :  { %2279 = vmatmul.bf16.gmra.mxu2 %v5421_v57  ;;  %v5445_v57 = vor.u32 %v6350_v48, %v5442_v49  ;;  %v2181_v39 = vpop.f32.mrf.mxu1 }
 0x502   :  { %v2240_v61 = vpop.f32.mrf.mxu2 }
 0x503   :  { %v2241_v37 = vadd.f32 %v2240_v61, %v2152_v62  ;;  %v2167_v61 = vadd.f32 %v8464_v28, %v8041_v18  ;;  %v2172_v28 = vadd.f32 %v2171_v1, %v7995_v36  ;;  %v6356_v36 = vld [vmem:[%s9935_s3 + $0x2e4] sm:$0xf]  ;;  %v5466_v1 = vld [vmem:[%s9935_s3 + $0x2e8] sm:$0xf0] }
 0x505   :  { %v2320_v42 = vmax.f32 %v2241_v37, 0.0 }
 0x50a   :  { %v2242_v35 = vpop.f32.mrf.mxu2 }
 0x50b   :  { %v2243_v53 = vadd.f32 %v2242_v35, %v2154_v10 }
 0x50d   :  { %v2321_v46 = vmax.f32 %v2243_v53, 0.0  ;;  %v5453_v53 = vor.u32 %v6352_v44, %v5450_v23  ;;  %v2179_v23 = vadd.f32 %v2178_v58, %v7969_v63 }
 0x50f   :  { %2284 = vmatmul.bf16.gmra.mxu2 %v5429_v51  ;;  %v8500_v7 = vpack.c.bf16 %v2321_v46, %v2320_v42  ;;  %v2183_v46 = vpop.f32.mrf.mxu1 }
 0x512   :  { %v2245_v50 = vpop.f32.mrf.mxu2 }
 0x513   :  { %v2246_v31 = vadd.f32 %v2245_v50, %v2157_v2  ;;  %v6354_v50 = vld [vmem:[%s9935_s3 + $0x2d4] sm:$0xf] }
 0x515   :  { %v2322_v45 = vmax.f32 %v2246_v31, 0.0  ;;  %v5461_v31 = vor.u32 %v6354_v50, %v5458_v55 }
 0x517   :  { %v2186_v41 = vpop.f32.mrf.mxu1 }
 0x51a   :  { %v2247_v26 = vpop.f32.mrf.mxu2 }
 0x51b   :  { %v2248_v54 = vadd.f32 %v2247_v26, %v2159_v27 }
 0x51d   :  { %v2323_v52 = vmax.f32 %v2248_v54, 0.0  ;;  %v5469_v54 = vor.u32 %v6356_v36, %v5466_v1 }
 0x51f   :  { %2289 = vmatmul.bf16.gmra.mxu2 %v5437_v22  ;;  %v8511_v12 = vpack.c.bf16 %v2323_v52, %v2322_v45  ;;  %v2188_v27 = vpop.f32.mrf.mxu1  ;;  %v6358_v52 = vld [vmem:[%s9935_s3 + $0x2f4] sm:$0xf] }
 0x522   :  { %v2250_v34 = vpop.f32.mrf.mxu2 }
 0x523   :  { %v2251_v29 = vadd.f32 %v2250_v34, %v2162_v19  ;;  %v5474_v19 = vld [vmem:[%s9935_s3 + $0x2f8] sm:$0xf0] }
 0x524   :  { %v5477_v48 = vor.u32 %v6358_v52, %v5474_v19 }
 0x525   :  { %v2324_v4 = vmax.f32 %v2251_v29, 0.0 }
 0x527   :  { %v2191_v22 = vpop.f32.mrf.mxu1 }
 0x52a   :  { %v2252_v30 = vpop.f32.mrf.mxu2 }
 0x52b   :  { %v2253_v5 = vadd.f32 %v2252_v30, %v2164_v8  ;;  %v8558_v30 = vpop.permute.xlu0 %1929 }
 0x52d   :  { %v2325_v62 = vmax.f32 %v2253_v5, 0.0  ;;  %v2187_v5 = vadd.f32 %v2186_v41, %v7935_v25  ;;  %v2177_v25 = vadd.f32 %v8514_v38, %v7962_v14 }
 0x52f   :  { %2294 = vmatmul.bf16.gmra.mxu2 %v5445_v57  ;;  %v8523_v60 = vpack.c.bf16 %v2325_v62, %v2324_v4  ;;  %v8556_v34 = vpop.f32.mrf.mxu1  ;;  %v2184_v57 = vadd.f32 %v2183_v46, %v7964_v9  ;;  %v2189_v4 = vadd.f32 %v2188_v27, %v7933_v15 }
 0x532   :  { %v2255_v37 = vpop.f32.mrf.mxu2 }
 0x533   :  { %v2256_v13 = vadd.f32 %v2255_v37, %v2167_v61  ;;  %v2182_v37 = vadd.f32 %v2181_v39, %v7940_v21  ;;  %v1905_v15 = vpop.permute.xlu0 %1904 }
 0x534   :  { %v2192_v21 = vadd.f32 %v2191_v22, %v1905_v15  ;;  %v6361_v22 = vld [vmem:[%s9935_s3 + $0x304] sm:$0xf0] }
 0x535   :  { %v2326_v51 = vmax.f32 %v2256_v13, 0.0 }
 0x537   :  { %v2196_v8 = vpop.f32.mrf.mxu1 }
 0x53a   :  { %v2257_v10 = vpop.f32.mrf.mxu2 }
 0x53b   :  { %v2258_v35 = vadd.f32 %v2257_v10, %v2169_v11 }
 0x53d   :  { %v2327_v42 = vmax.f32 %v2258_v35, 0.0 }
 0x53f   :  { %2299 = vmatmul.bf16.gmra.mxu2 %v5453_v53  ;;  %v8535_v18 = vpack.c.bf16 %v2327_v42, %v2326_v51  ;;  %v8565_v53 = vpop.f32.mrf.mxu1 }
 0x542   :  { %v2260_v17 = vpop.f32.mrf.mxu2 }
 0x543   :  { %v2261_v2 = vadd.f32 %v2260_v17, %v2172_v28  ;;  %v2174_v28 = vadd.f32 %v8509_v24, %v8023_v47  ;;  %v1915_v24 = vpop.permute.xlu1 %1914 }
 0x545   :  { %v2328_v27 = vmax.f32 %v2261_v2, 0.0  ;;  %v5544_v2 = vld [vmem:[%s9935_s3 + $0x300] sm:$0xf] }
 0x546   :  { %v5545_v52 = vor.u32 %v6361_v22, %v5544_v2 }
 0x547   :  { %v2201_v41 = vpop.f32.mrf.mxu1 }
 0x54a   :  { %v2262_v16 = vpop.f32.mrf.mxu2 }
 0x54b   :  { %v2263_v58 = vadd.f32 %v2262_v16, %v2174_v28 }
 0x54d   :  { %v2329_v14 = vmax.f32 %v2263_v58, 0.0 }
 0x54f   :  { %2304 = vmatmul.bf16.gmra.mxu2 %v5461_v31  ;;  %v2389_v47 = vpack.c.bf16 %v2329_v14, %v2328_v27  ;;  %v8576_v16 = vpop.f32.mrf.mxu1  ;;  %v6371_v14 = vld [vmem:[%s9935_s3 + $0x354] sm:$0xf0] }
 0x552   :  { %v2265_v0 = vpop.f32.mrf.mxu2 }
 0x553   :  { %v2266_v39 = vadd.f32 %v2265_v0, %v2177_v25  ;;  %v2197_v0 = vadd.f32 %v2196_v8, %v1915_v24  ;;  %v6363_v8 = vld [vmem:[%s9935_s3 + $0x314] sm:$0xf0] }
 0x555   :  { %v2330_v31 = vmax.f32 %v2266_v39, 0.0 }
 0x55a   :  { %v2267_v26 = vpop.f32.mrf.mxu2 }
 0x55b   :  { %v2268_v51 = vadd.f32 %v2267_v26, %v2179_v23 }
 0x55d   :  { %v2331_v17 = vmax.f32 %v2268_v51, 0.0  ;;  %v5568_v51 = vld [vmem:[%s9935_s3 + $0x330] sm:$0xf] }
 0x55f   :  { %2309 = vmatmul.bf16.gmra.mxu2 %v5469_v54  ;;  %v2390_v38 = vpack.c.bf16 %v2331_v17, %v2330_v31  ;;  %v8581_v54 = vpop.permute.xlu2 %1939  ;;  %v5584_v31 = vld [vmem:[%s9935_s3 + $0x350] sm:$0xf] }
 0x560   :  { %v5585_v27 = vor.u32 %v6371_v14, %v5584_v31 }
 0x562   :  { %v2270_v45 = vpop.f32.mrf.mxu2 }
 0x563   :  { %v2271_v11 = vadd.f32 %v2270_v45, %v2182_v37  ;;  %v2206_v45 = vpop.f32.mrf.mxu1  ;;  %v5560_v37 = vld [vmem:[%s9935_s3 + $0x320] sm:$0xf] }
 0x565   :  { %v2332_v46 = vmax.f32 %v2271_v11, 0.0 }
 0x567   :  { %v1925_v19 = vpop.permute.xlu2 %1924 }
 0x56a   :  { %v2272_v29 = vpop.f32.mrf.mxu2 }
 0x56b   :  { %v2273_v13 = vadd.f32 %v2272_v29, %v2184_v57 }
 0x56d   :  { %v2333_v9 = vmax.f32 %v2273_v13, 0.0  ;;  %v6365_v13 = vld [vmem:[%s9935_s3 + $0x324] sm:$0xf0] }
 0x56e   :  { %v5561_v11 = vor.u32 %v6365_v13, %v5560_v37 }
 0x56f   :  { %2314 = vmatmul.bf16.gmra.mxu2 %v5477_v48  ;;  %v2391_v55 = vpack.c.bf16 %v2333_v9, %v2332_v46  ;;  %v6367_v9 = vld [vmem:[%s9935_s3 + $0x334] sm:$0xf0]  ;;  %v6369_v46 = vld [vmem:[%s9935_s3 + $0x344] sm:$0xf0] }
 0x570   :  { %v5569_v15 = vor.u32 %v6367_v9, %v5568_v51 }
 0x572   :  { %v2275_v49 = vpop.f32.mrf.mxu2 }
 0x573   :  { %v2276_v62 = vadd.f32 %v2275_v49, %v2187_v5  ;;  %v5552_v49 = vld [vmem:[%s9935_s3 + $0x310] sm:$0xf] }
 0x574   :  { %v5553_v57 = vor.u32 %v6363_v8, %v5552_v49 }
 0x575   :  { %v2334_v10 = vmax.f32 %v2276_v62, 0.0 }
 0x57a   :  { %v2277_v61 = vpop.f32.mrf.mxu2 }
 0x57b   :  { %v2278_v44 = vadd.f32 %v2277_v61, %v2189_v4  ;;  %v2207_v4 = vadd.f32 %v2206_v45, %v8492_v43  ;;  %v5592_v45 = vld [vmem:[%s9935_s3 + $0x360] sm:$0xf] }
 0x57d   :  { %v2335_v35 = vmax.f32 %v2278_v44, 0.0 }
 0x57f   :  { %v2392_v42 = vpack.c.bf16 %v2335_v35, %v2334_v10 }
 0x581   :  { %2754 = vmatpush.bf16.msra.mxu3 %v2392_v42 }
 0x582   :  { %v2280_v63 = vpop.f32.mrf.mxu2 }
 0x583   :  { %v8571_v50 = vadd.f32 %v2280_v63, %v2192_v21 }
 0x585   :  { %2755 = vmatpush.bf16.msra.mxu3 %v2391_v55 }
 0x589   :  { %2756 = vmatpush.bf16.msra.mxu3 %v2390_v38 }
 0x58a   :  { %v8573_v36 = vpop.f32.mrf.mxu2 }
 0x58d   :  { %2757 = vmatpush.bf16.msra.mxu3 %v2389_v47 }
 0x591   :  { %2758 = vmatpush.bf16.msra.mxu3 %v8535_v18 }
 0x592   :  { %v2285_v1 = vpop.f32.mrf.mxu2 }
 0x593   :  { %v8578_v26 = vadd.f32 %v2285_v1, %v2197_v0 }
 0x595   :  { %2759 = vmatpush.bf16.msra.mxu3 %v8523_v60  ;;  %v2202_v60 = vadd.f32 %v2201_v41, %v1925_v19 }
 0x599   :  { %2760 = vmatpush.bf16.msra.mxu3 %v8511_v12  ;;  %v8595_v12 = vpop.f32.mrf.mxu1 }
 0x59a   :  { %v8590_v18 = vpop.f32.mrf.mxu2 }
 0x59d   :  { %2761 = vmatpush.bf16.msra.mxu3 %v8500_v7 }
 0x5a0   :  { %2762 = vmatmul.bf16.vlgmr.msra.gmra.mxu3 %v5545_v52  ;;  %v6373_v52 = vld [vmem:[%s9935_s3 + $0x364] sm:$0xf0] }
 0x5a1   :  { %v2211_v7 = vpop.f32.mrf.mxu1  ;;  %v5593_v8 = vor.u32 %v6373_v52, %v5592_v45  ;;  %v5624_v45 = vld [vmem:[%s9935_s3 + $0x3a0] sm:$0xf]  ;;  %v6381_v52 = vld [vmem:[%s9935_s3 + $0x3a4] sm:$0xf0] }
 0x5a2   :  { %v2290_v29 = vpop.f32.mrf.mxu2  ;;  %v2212_v10 = vadd.f32 %v2211_v7, %v8478_v20  ;;  %v5576_v20 = vld [vmem:[%s9935_s3 + $0x340] sm:$0xf] }
 0x5a3   :  { %v8593_v48 = vadd.f32 %v2290_v29, %v2202_v60  ;;  %v5577_v58 = vor.u32 %v6369_v46, %v5576_v20 }
 0x5a9   :  { %v2213_v44 = vpop.f32.mrf.mxu1 }
 0x5aa   :  { %v8603_v5 = vpop.f32.mrf.mxu2  ;;  %v2214_v13 = vadd.f32 %v2213_v44, %v8482_v32  ;;  %v5600_v32 = vld [vmem:[%s9935_s3 + $0x370] sm:$0xf]  ;;  %v6375_v44 = vld [vmem:[%s9935_s3 + $0x374] sm:$0xf0] }
 0x5b0   :  { %2767 = vmatmul.bf16.gmra.mxu3 %v5553_v57 }
 0x5b1   :  { %v2216_v43 = vpop.f32.mrf.mxu1 }
 0x5b2   :  { %v2295_v62 = vpop.f32.mrf.mxu2  ;;  %v2217_v7 = vadd.f32 %v2216_v43, %v8490_v56  ;;  %v2204_v43 = vadd.f32 %v8576_v16, %v8558_v30 }
 0x5b3   :  { %v8606_v61 = vadd.f32 %v2295_v62, %v2207_v4 }
 0x5b5   :  { %v2342_v30 = vmax.f32 %v8606_v61, 0.0 }
 0x5b9   :  { %v2218_v28 = vpop.f32.mrf.mxu1 }
 0x5ba   :  { %v2297_v23 = vpop.f32.mrf.mxu2 }
 0x5c0   :  { %2772 = vmatmul.bf16.gmra.mxu3 %v5561_v11 }
 0x5c1   :  { %v2221_v39 = vpop.f32.mrf.mxu1 }
 0x5c2   :  { %v2300_v35 = vpop.f32.mrf.mxu2  ;;  %v2222_v60 = vadd.f32 %v2221_v39, %v8021_v40 }
 0x5c3   :  { %v8615_v25 = vadd.f32 %v2300_v35, %v2212_v10 }
 0x5c5   :  { %v2344_v39 = vmax.f32 %v8615_v25, 0.0 }
 0x5c9   :  { %v2223_v17 = vpop.f32.mrf.mxu1 }
 0x5ca   :  { %v2302_v42 = vpop.f32.mrf.mxu2  ;;  %v2224_v1 = vadd.f32 %v2223_v17, %v8025_v59  ;;  %v2340_v17 = vmax.f32 %v8593_v48, 0.0 }
 0x5cb   :  { %v2303_v40 = vadd.f32 %v2302_v42, %v2214_v13  ;;  %v1920_v42 = vpop.permute.xlu2 %1919 }
 0x5cc   :  { %v2199_v20 = vadd.f32 %v8565_v53, %v1920_v42  ;;  %v2338_v53 = vmax.f32 %v8578_v26, 0.0  ;;  %v5546_v26 = vld [vmem:[%s9935_s3 + $0x308] sm:$0xf0]  ;;  %v5648_v42 = vld [vmem:[%s9935_s3 + $0x3d0] sm:$0xf] }
 0x5ce   :  { %v2288_v16 = vadd.f32 %v8590_v18, %v2199_v20  ;;  %v2336_v18 = vmax.f32 %v8571_v50, 0.0  ;;  %v6387_v20 = vld [vmem:[%s9935_s3 + $0x3d4] sm:$0xf0] }
 0x5d0   :  { %2777 = vmatmul.bf16.gmra.mxu3 %v5569_v15 }
 0x5d1   :  { %v2226_v41 = vpop.f32.mrf.mxu1 }
 0x5d2   :  { %v2305_v21 = vpop.f32.mrf.mxu2  ;;  %v2227_v0 = vadd.f32 %v2226_v41, %v7990_v6  ;;  %v2219_v6 = vadd.f32 %v2218_v28, %v8462_v3  ;;  %v2209_v3 = vadd.f32 %v8595_v12, %v8581_v54  ;;  %v2345_v28 = vmax.f32 %v2303_v40, 0.0 }
 0x5d3   :  { %v2306_v11 = vadd.f32 %v2305_v21, %v2217_v7  ;;  %v2293_v54 = vadd.f32 %v8603_v5, %v2204_v43  ;;  %v5601_v21 = vor.u32 %v6375_v44, %v5600_v32  ;;  %v6366_v7 = vld [vmem:[%s9935_s3 + $0x334] sm:$0xf] }
 0x5d4   :  { %v2298_v15 = vadd.f32 %v2297_v23, %v2209_v3  ;;  %v2397_v23 = vpack.c.bf16 %v2345_v28, %v2344_v39  ;;  %v6385_v3 = vld [vmem:[%s9935_s3 + $0x3c4] sm:$0xf0] }
 0x5d5   :  { %v2346_v9 = vmax.f32 %v2306_v11, 0.0  ;;  %v2341_v25 = vmax.f32 %v2293_v54, 0.0 }
 0x5d6   :  { %v2343_v12 = vmax.f32 %v2298_v15, 0.0  ;;  %v5578_v15 = vld [vmem:[%s9935_s3 + $0x348] sm:$0xf0] }
 0x5d7   :  { %v2395_v31 = vpack.c.bf16 %v2341_v25, %v2340_v17  ;;  %v5649_v25 = vor.u32 %v6387_v20, %v5648_v42 }
 0x5d8   :  { %v2396_v46 = vpack.c.bf16 %v2343_v12, %v2342_v30  ;;  %v6370_v30 = vld [vmem:[%s9935_s3 + $0x354] sm:$0xf] }
 0x5d9   :  { %v2228_v24 = vpop.f32.mrf.mxu1 }
 0x5da   :  { %v2307_v63 = vpop.f32.mrf.mxu2  ;;  %v2229_v2 = vadd.f32 %v2228_v24, %v7988_v33  ;;  %v6362_v24 = vld [vmem:[%s9935_s3 + $0x314] sm:$0xf] }
 0x5db   :  { %v2308_v4 = vadd.f32 %v2307_v63, %v2219_v6  ;;  %v1910_v63 = vpop.permute.xlu1 %1909 }
 0x5dd   :  { %v2347_v35 = vmax.f32 %v2308_v4, 0.0  ;;  %v5570_v4 = vld [vmem:[%s9935_s3 + $0x338] sm:$0xf0] }
 0x5de   :  { %v5573_v11 = vor.u32 %v6366_v7, %v5570_v4  ;;  %v5610_v7 = vld [vmem:[%s9935_s3 + $0x388] sm:$0xf0] }
 0x5df   :  { %v2398_v56 = vpack.c.bf16 %v2347_v35, %v2346_v9  ;;  %v6368_v9 = vld [vmem:[%s9935_s3 + $0x344] sm:$0xf] }
 0x5e0   :  { %2782 = vmatmul.bf16.gmra.mxu3 %v5577_v58  ;;  %v2194_v58 = vadd.f32 %v8556_v34, %v1910_v63  ;;  %v6377_v34 = vld [vmem:[%s9935_s3 + $0x384] sm:$0xf0]  ;;  %v5581_v43 = vor.u32 %v6368_v9, %v5578_v15 }
 0x5e2   :  { %v2310_v55 = vpop.f32.mrf.mxu2  ;;  %v2283_v5 = vadd.f32 %v8573_v36, %v2194_v58  ;;  %v6360_v36 = vld [vmem:[%s9935_s3 + $0x304] sm:$0xf] }
 0x5e3   :  { %v2311_v59 = vadd.f32 %v2310_v55, %v2222_v60  ;;  %v2339_v55 = vmax.f32 %v2288_v16, 0.0  ;;  %v5549_v50 = vor.u32 %v6360_v36, %v5546_v26  ;;  %v5562_v60 = vld [vmem:[%s9935_s3 + $0x328] sm:$0xf0]  ;;  %v8746_v28 = vpop.permute.xlu1 %2506  ;;  %v5586_v16 = vld [vmem:[%s9935_s3 + $0x358] sm:$0xf0] }
 0x5e4   :  { %v2337_v61 = vmax.f32 %v2283_v5, 0.0 }
 0x5e5   :  { %v2348_v10 = vmax.f32 %v2311_v59, 0.0  ;;  %v2394_v14 = vpack.c.bf16 %v2339_v55, %v2338_v53  ;;  %v5632_v59 = vld [vmem:[%s9935_s3 + $0x3b0] sm:$0xf]  ;;  %v5656_v55 = vld [vmem:[%s9935_s3 + $0x3e0] sm:$0xf] }
 0x5e6   :  { %v2393_v48 = vpack.c.bf16 %v2337_v61, %v2336_v18  ;;  %v6389_v53 = vld [vmem:[%s9935_s3 + $0x3e4] sm:$0xf0]  ;;  %v6372_v61 = vld [vmem:[%s9935_s3 + $0x364] sm:$0xf] }
 0x5ea   :  { %v2312_v38 = vpop.f32.mrf.mxu2 }
 0x5eb   :  { %v2313_v29 = vadd.f32 %v2312_v38, %v2224_v1  ;;  %v5608_v38 = vld [vmem:[%s9935_s3 + $0x380] sm:$0xf]  ;;  %v8754_v54 = vpop.permute.xlu1 %2581 }
 0x5ec   :  { %v5609_v41 = vor.u32 %v6377_v34, %v5608_v38  ;;  %v5657_v34 = vor.u32 %v6389_v53, %v5656_v55 }
 0x5ed   :  { %v2349_v62 = vmax.f32 %v2313_v29, 0.0  ;;  %v5625_v29 = vor.u32 %v6381_v52, %v5624_v45 }
 0x5ef   :  { %v2399_v51 = vpack.c.bf16 %v2349_v62, %v2348_v10 }
 0x5f0   :  { %2787 = vmatmul.bf16.gmra.mxu3 %v5585_v27  ;;  %v5616_v27 = vld [vmem:[%s9935_s3 + $0x390] sm:$0xf] }
 0x5f2   :  { %v2315_v47 = vpop.f32.mrf.mxu2 }
 0x5f3   :  { %v2316_v22 = vadd.f32 %v2315_v47, %v2227_v0  ;;  %v6379_v47 = vld [vmem:[%s9935_s3 + $0x394] sm:$0xf0]  ;;  %v5554_v0 = vld [vmem:[%s9935_s3 + $0x318] sm:$0xf0]  ;;  %v8774_v63 = vpop.permute.xlu1 %2566 }
 0x5f4   :  { %v5617_v1 = vor.u32 %v6379_v47, %v5616_v27  ;;  %v5664_v47 = vld [vmem:[%s9935_s3 + $0x3f0] sm:$0xf] }
 0x5f5   :  { %v2350_v57 = vmax.f32 %v2316_v22, 0.0  ;;  %v8692_v22 = vpop.permute.xlu2 %2586 }
 0x5fa   :  { %v2317_v19 = vpop.f32.mrf.mxu2 }
 0x5fb   :  { %v2318_v49 = vadd.f32 %v2317_v19, %v2229_v2  ;;  %v5557_v2 = vor.u32 %v6362_v24, %v5554_v0  ;;  %v6364_v19 = vld [vmem:[%s9935_s3 + $0x324] sm:$0xf]  ;;  %v6391_v24 = vld [vmem:[%s9935_s3 + $0x3f4] sm:$0xf0]  ;;  %v6374_v0 = vld [vmem:[%s9935_s3 + $0x374] sm:$0xf] }
 0x5fd   :  { %v2351_v33 = vmax.f32 %v2318_v49, 0.0  ;;  %v5565_v49 = vor.u32 %v6364_v19, %v5562_v60  ;;  %v8708_v6 = vpop.permute.xlu2 %2511 }
 0x5ff   :  { %v2400_v37 = vpack.c.bf16 %v2351_v33, %v2350_v57  ;;  %v6383_v33 = vld [vmem:[%s9935_s3 + $0x3b4] sm:$0xf0] }
 0x600   :  { %2792 = vmatmul.bf16.gmra.mxu3 %v5593_v8  ;;  %v8706_v8 = vpop.permute.xlu0 %2591  ;;  %v5633_v13 = vor.u32 %v6383_v33, %v5632_v59  ;;  %v6376_v33 = vld [vmem:[%s9935_s3 + $0x384] sm:$0xf] }
 0x601   :  { %2843 = vmatpush.bf16.msra.mxu0 %v2400_v37 }
 0x605   :  { %2844 = vmatpush.bf16.msra.mxu0 %v2399_v51  ;;  %v8726_v37 = vpop.permute.xlu2 %2496  ;;  %v5640_v51 = vld [vmem:[%s9935_s3 + $0x3c0] sm:$0xf] }
 0x608   :  { %v8713_v57 = vpop.permute.xlu0 %2576 }
 0x609   :  { %2845 = vmatpush.bf16.msra.mxu0 %v2398_v56  ;;  %v5641_v56 = vor.u32 %v6385_v3, %v5640_v51 }
 0x60d   :  { %2846 = vmatpush.bf16.msra.mxu0 %v2397_v23  ;;  %v8732_v35 = vpop.permute.xlu2 %2571 }
 0x610   :  { %2797 = vmatmul.bf16.gmra.mxu3 %v5601_v21  ;;  %v8728_v10 = vpop.permute.xlu0 %2501 }
 0x611   :  { %2847 = vmatpush.bf16.msra.mxu0 %v2396_v46  ;;  %v5589_v46 = vor.u32 %v6370_v30, %v5586_v16  ;;  %v6378_v16 = vld [vmem:[%s9935_s3 + $0x394] sm:$0xf] }
 0x615   :  { %2848 = vmatpush.bf16.msra.mxu0 %v2395_v31  ;;  %v8752_v44 = vpop.permute.xlu2 %2556  ;;  %v8785_v31 = vpop.permute.xlu1 %2491 }
 0x618   :  { %v8748_v39 = vpop.permute.xlu0 %2486 }
 0x619   :  { %2849 = vmatpush.bf16.msra.mxu0 %v2394_v14  ;;  %v5594_v14 = vld [vmem:[%s9935_s3 + $0x368] sm:$0xf0] }
 0x61a   :  { %v5597_v36 = vor.u32 %v6372_v61, %v5594_v14 }
 0x61d   :  { %2850 = vmatpush.bf16.msra.mxu0 %v2393_v48  ;;  %v8763_v21 = vpop.permute.xlu2 %2481  ;;  %v8802_v48 = vpop.permute.xlu1 %2476 }
 0x620   :  { %2802 = vmatmul.bf16.gmra.mxu3 %v5609_v41  ;;  %2851 = vmatmul.bf16.vlgmr.msra.gmra.mxu0 %v5549_v50  ;;  %v8756_v12 = vpop.permute.xlu0 %2561 }
 0x623   :  { %v8724_v62 = vpop.f32.mrf.mxu3 }
 0x625   :  { %v8780_v5 = vpop.permute.xlu2 %2466  ;;  %v8820_v52 = vpop.permute.xlu1 %2551 }
 0x628   :  { %v8776_v58 = vpop.permute.xlu0 %2546 }
 0x62b   :  { %v8730_v40 = vpop.f32.mrf.mxu3 }
 0x62d   :  { %v8800_v26 = vpop.permute.xlu2 %2541 }
 0x630   :  { %2807 = vmatmul.bf16.gmra.mxu3 %v5617_v1  ;;  %2856 = vmatmul.bf16.gmra.mxu0 %v5557_v2  ;;  %v8796_v18 = vpop.permute.xlu0 %2471  ;;  %v5602_v1 = vld [vmem:[%s9935_s3 + $0x378] sm:$0xf0]  ;;  %v5665_v2 = vor.u32 %v6391_v24, %v5664_v47 }
 0x631   :  { %v5605_v45 = vor.u32 %v6374_v0, %v5602_v1 }
 0x633   :  { %v8750_v32 = vpop.f32.mrf.mxu3 }
 0x635   :  { %v8806_v27 = vpop.permute.xlu2 %2526 }
 0x638   :  { %v2457_v41 = vpop.permute.xlu0 %2456 }
 0x63b   :  { %v8758_v23 = vpop.f32.mrf.mxu3 }
 0x640   :  { %2812 = vmatmul.bf16.gmra.mxu3 %v5625_v29  ;;  %2861 = vmatmul.bf16.gmra.mxu0 %v5565_v49  ;;  %v8822_v19 = vpop.permute.xlu0 %2531  ;;  %v2452_v29 = vpop.permute.xlu2 %2451 }
 0x641   :  { %v8824_v49 = vpop.permute.xlu1 %2536 }
 0x643   :  { %v8778_v17 = vpop.f32.mrf.mxu3 }
 0x648   :  { %v8826_v59 = vpop.permute.xlu0 %2516  ;;  %v2437_v4 = vpop.permute.xlu2 %2436 }
 0x649   :  { %v2462_v9 = vpop.permute.xlu1 %2461 }
 0x64b   :  { %v8798_v38 = vpop.f32.mrf.mxu3 }
 0x650   :  { %2817 = vmatmul.bf16.gmra.mxu3 %v5633_v13  ;;  %2866 = vmatmul.bf16.gmra.mxu0 %v5573_v11  ;;  %v2764_v13 = vadd.f32 %v8724_v62, %v2437_v4  ;;  %v5613_v11 = vor.u32 %v6376_v33, %v5610_v7  ;;  %v2442_v15 = vpop.permute.xlu0 %2441  ;;  %v5618_v62 = vld [vmem:[%s9935_s3 + $0x398] sm:$0xf0]  ;;  %v2774_v33 = vadd.f32 %v8778_v17, %v2457_v41 }
 0x651   :  { %v5621_v61 = vor.u32 %v6378_v16, %v5618_v62  ;;  %v5634_v17 = vld [vmem:[%s9935_s3 + $0x3b8] sm:$0xf0] }
 0x653   :  { %v8804_v50 = vpop.f32.mrf.mxu3 }
 0x65b   :  { %v2780_v60 = vpop.f32.mrf.mxu3 }
 0x65c   :  { %v2781_v16 = vadd.f32 %v2780_v60, %v8796_v18 }
 0x660   :  { %2822 = vmatmul.bf16.gmra.mxu3 %v5641_v56  ;;  %2871 = vmatmul.bf16.gmra.mxu0 %v5581_v43  ;;  %v2766_v56 = vadd.f32 %v8730_v40, %v2442_v15 }
 0x663   :  { %v2783_v55 = vpop.f32.mrf.mxu3 }
 0x670   :  { %2827 = vmatmul.bf16.gmra.mxu3 %v5649_v25  ;;  %2876 = vmatmul.bf16.gmra.mxu0 %v5589_v46  ;;  %v2447_v46 = vpop.permute.xlu1 %2446 }
 0x671   :  { %v2769_v53 = vadd.f32 %v8750_v32, %v2447_v46  ;;  %v5626_v32 = vld [vmem:[%s9935_s3 + $0x3a8] sm:$0xf0] }
 0x680   :  { %2832 = vmatmul.bf16.gmra.mxu3 %v5657_v34  ;;  %2881 = vmatmul.bf16.gmra.mxu0 %v5597_v36  ;;  %v2771_v34 = vadd.f32 %v8758_v23, %v2452_v29  ;;  %v8846_v36 = vpop.f32.mrf.mxu3 }
 0x688   :  { %v8857_v4 = vpop.f32.mrf.mxu3 }
 0x690   :  { %2837 = vmatmul.bf16.gmra.mxu3 %v5665_v2  ;;  %2886 = vmatmul.bf16.gmra.mxu0 %v5605_v45  ;;  %v6380_v2 = vld [vmem:[%s9935_s3 + $0x3a4] sm:$0xf] }
 0x691   :  { %v5629_v7 = vor.u32 %v6380_v2, %v5626_v32  ;;  %v5650_v2 = vld [vmem:[%s9935_s3 + $0x3d8] sm:$0xf0] }
 0x69d   :  { %v2852_v51 = vpop.f32.mrf.mxu0 }
 0x69e   :  { %v2853_v3 = vadd.f32 %v2852_v51, %v2764_v13  ;;  %v2776_v13 = vadd.f32 %v8798_v38, %v2462_v9 }
 0x6a0   :  { %2891 = vmatmul.bf16.gmra.mxu0 %v5613_v11  ;;  %v2932_v20 = vmax.f32 %v2853_v3, 0.0 }
 0x6a5   :  { %v2854_v43 = vpop.f32.mrf.mxu0 }
 0x6a6   :  { %v2855_v42 = vadd.f32 %v2854_v43, %v2766_v56  ;;  %v2790_v56 = vpop.f32.mrf.mxu3  ;;  %v6382_v43 = vld [vmem:[%s9935_s3 + $0x3b4] sm:$0xf] }
 0x6a8   :  { %v2933_v30 = vmax.f32 %v2855_v42, 0.0  ;;  %v2779_v42 = vadd.f32 %v8804_v50, %v8780_v5  ;;  %v2784_v50 = vadd.f32 %v2783_v55, %v8802_v48  ;;  %v6388_v55 = vld [vmem:[%s9935_s3 + $0x3e4] sm:$0xf] }
 0x6aa   :  { %v8842_v25 = vpack.c.bf16 %v2933_v30, %v2932_v20  ;;  %v5637_v20 = vor.u32 %v6382_v43, %v5634_v17  ;;  %v5666_v43 = vld [vmem:[%s9935_s3 + $0x3f8] sm:$0xf0] }
 0x6ad   :  { %v2857_v40 = vpop.f32.mrf.mxu0 }
 0x6ae   :  { %v2858_v14 = vadd.f32 %v2857_v40, %v2769_v53  ;;  %v2793_v30 = vpop.f32.mrf.mxu3  ;;  %v6384_v40 = vld [vmem:[%s9935_s3 + $0x3c4] sm:$0xf] }
 0x6b0   :  { %2896 = vmatmul.bf16.gmra.mxu0 %v5621_v61  ;;  %v2934_v0 = vmax.f32 %v2858_v14, 0.0  ;;  %v5642_v14 = vld [vmem:[%s9935_s3 + $0x3c8] sm:$0xf0] }
 0x6b5   :  { %v2859_v47 = vpop.f32.mrf.mxu0 }
 0x6b6   :  { %v2860_v24 = vadd.f32 %v2859_v47, %v2771_v34  ;;  %v5645_v34 = vor.u32 %v6384_v40, %v5642_v14  ;;  %v2795_v47 = vpop.f32.mrf.mxu3  ;;  %v2791_v14 = vadd.f32 %v2790_v56, %v8785_v31 }
 0x6b8   :  { %v2935_v1 = vmax.f32 %v2860_v24, 0.0 }
 0x6ba   :  { %v8854_v45 = vpack.c.bf16 %v2935_v1, %v2934_v0  ;;  %v6386_v1 = vld [vmem:[%s9935_s3 + $0x3d4] sm:$0xf] }
 0x6bb   :  { %v5653_v32 = vor.u32 %v6386_v1, %v5650_v2 }
 0x6bd   :  { %v2862_v23 = vpop.f32.mrf.mxu0 }
 0x6be   :  { %v2863_v29 = vadd.f32 %v2862_v23, %v2774_v33  ;;  %v2798_v0 = vpop.f32.mrf.mxu3  ;;  %v5658_v23 = vld [vmem:[%s9935_s3 + $0x3e8] sm:$0xf0] }
 0x6c0   :  { %2901 = vmatmul.bf16.gmra.mxu0 %v5629_v7  ;;  %v2936_v3 = vmax.f32 %v2863_v29, 0.0 }
 0x6c5   :  { %v2864_v11 = vpop.f32.mrf.mxu0 }
 0x6c6   :  { %v2865_v51 = vadd.f32 %v2864_v11, %v2776_v13  ;;  %v2800_v7 = vpop.f32.mrf.mxu3  ;;  %v5661_v13 = vor.u32 %v6388_v55, %v5658_v23 }
 0x6c8   :  { %v2937_v15 = vmax.f32 %v2865_v51, 0.0 }
 0x6ca   :  { %v8866_v41 = vpack.c.bf16 %v2937_v15, %v2936_v3  ;;  %v6390_v15 = vld [vmem:[%s9935_s3 + $0x3f4] sm:$0xf] }
 0x6cb   :  { %v5669_v17 = vor.u32 %v6390_v15, %v5666_v43 }
 0x6cd   :  { %v2867_v38 = vpop.f32.mrf.mxu0 }
 0x6ce   :  { %v2868_v9 = vadd.f32 %v2867_v38, %v2779_v42  ;;  %v2803_v29 = vpop.f32.mrf.mxu3  ;;  %v2799_v38 = vadd.f32 %v2798_v0, %v8746_v28  ;;  %v2789_v28 = vadd.f32 %v8857_v4, %v8748_v39 }
 0x6d0   :  { %2906 = vmatmul.bf16.gmra.mxu0 %v5637_v20  ;;  %v2938_v53 = vmax.f32 %v2868_v9, 0.0  ;;  %v2796_v9 = vadd.f32 %v2795_v47, %v8728_v10 }
 0x6d5   :  { %v2869_v62 = vpop.f32.mrf.mxu0 }
 0x6d6   :  { %v2870_v46 = vadd.f32 %v2869_v62, %v2781_v16  ;;  %v8892_v51 = vpop.f32.mrf.mxu3  ;;  %v2801_v16 = vadd.f32 %v2800_v7, %v8708_v6  ;;  %v2786_v6 = vadd.f32 %v8846_v36, %v8763_v21 }
 0x6d8   :  { %v2939_v61 = vmax.f32 %v2870_v46, 0.0 }
 0x6da   :  { %v8877_v5 = vpack.c.bf16 %v2939_v61, %v2938_v53  ;;  %v2794_v53 = vadd.f32 %v2793_v30, %v8726_v37  ;;  %v2804_v37 = vadd.f32 %v2803_v29, %v8826_v59  ;;  %v6393_v29 = vld [vmem:[%s9935_s3 + $0x404] sm:$0xf0] }
 0x6dd   :  { %v2872_v24 = vpop.f32.mrf.mxu0 }
 0x6de   :  { %v2873_v18 = vadd.f32 %v2872_v24, %v2784_v50  ;;  %v2808_v20 = vpop.f32.mrf.mxu3 }
 0x6df   :  { %v2809_v59 = vadd.f32 %v2808_v20, %v8806_v27 }
 0x6e0   :  { %2911 = vmatmul.bf16.gmra.mxu0 %v5645_v34 }
 0x6e5   :  { %v2874_v60 = vpop.f32.mrf.mxu0 }
 0x6e6   :  { %v8905_v1 = vpop.f32.mrf.mxu3  ;;  %v2875_v56 = vadd.f32 %v2874_v60, %v2786_v6 }
 0x6e8   :  { %v2941_v39 = vmax.f32 %v2875_v56, 0.0 }
 0x6ed   :  { %v2877_v33 = vpop.f32.mrf.mxu0 }
 0x6ee   :  { %v2878_v30 = vadd.f32 %v2877_v33, %v2789_v28  ;;  %v6399_v28 = vld [vmem:[%s9935_s3 + $0x434] sm:$0xf0] }
 0x6f0   :  { %2916 = vmatmul.bf16.gmra.mxu0 %v5653_v32  ;;  %v2942_v23 = vmax.f32 %v2878_v30, 0.0  ;;  %v6401_v30 = vld [vmem:[%s9935_s3 + $0x444] sm:$0xf0] }
 0x6f5   :  { %v2879_v48 = vpop.f32.mrf.mxu0 }
 0x6f6   :  { %v2880_v0 = vadd.f32 %v2879_v48, %v2791_v14  ;;  %v2813_v48 = vpop.f32.mrf.mxu3 }
 0x6f7   :  { %v2814_v15 = vadd.f32 %v2813_v48, %v8824_v49 }
 0x6f8   :  { %v2943_v32 = vmax.f32 %v2880_v0, 0.0 }
 0x6fa   :  { %v3002_v4 = vpack.c.bf16 %v2943_v32, %v2942_v23  ;;  %v6403_v23 = vld [vmem:[%s9935_s3 + $0x454] sm:$0xf0] }
 0x6fd   :  { %v2882_v11 = vpop.f32.mrf.mxu0 }
 0x6fe   :  { %v2883_v50 = vadd.f32 %v2882_v11, %v2794_v53  ;;  %v8918_v36 = vpop.f32.mrf.mxu3 }
 0x700   :  { %2921 = vmatmul.bf16.gmra.mxu0 %v5661_v13  ;;  %v2944_v2 = vmax.f32 %v2883_v50, 0.0  ;;  %v2940_v13 = vmax.f32 %v2873_v18, 0.0  ;;  %v5736_v18 = vld [vmem:[%s9935_s3 + $0x400] sm:$0xf] }
 0x702   :  { %v3001_v21 = vpack.c.bf16 %v2941_v39, %v2940_v13 }
 0x705   :  { %v2884_v3 = vpop.f32.mrf.mxu0 }
 0x706   :  { %v2885_v61 = vadd.f32 %v2884_v3, %v2796_v9  ;;  %v5737_v3 = vor.u32 %v6393_v29, %v5736_v18 }
 0x708   :  { %v2945_v10 = vmax.f32 %v2885_v61, 0.0 }
 0x70a   :  { %v3003_v55 = vpack.c.bf16 %v2945_v10, %v2944_v2 }
 0x70d   :  { %v2887_v42 = vpop.f32.mrf.mxu0 }
 0x70e   :  { %v2888_v62 = vadd.f32 %v2887_v42, %v2799_v38  ;;  %v6395_v42 = vld [vmem:[%s9935_s3 + $0x414] sm:$0xf0] }
 0x710   :  { %2926 = vmatmul.bf16.gmra.mxu0 %v5669_v17  ;;  %v2946_v34 = vmax.f32 %v2888_v62, 0.0  ;;  %v5744_v17 = vld [vmem:[%s9935_s3 + $0x410] sm:$0xf]  ;;  %v5752_v62 = vld [vmem:[%s9935_s3 + $0x420] sm:$0xf] }
 0x711   :  { %v5745_v38 = vor.u32 %v6395_v42, %v5744_v17 }
 0x715   :  { %v2889_v46 = vpop.f32.mrf.mxu0 }
 0x716   :  { %v2890_v40 = vadd.f32 %v2889_v46, %v2801_v16  ;;  %v6397_v46 = vld [vmem:[%s9935_s3 + $0x424] sm:$0xf0] }
 0x718   :  { %v2947_v24 = vmax.f32 %v2890_v40, 0.0  ;;  %v5753_v40 = vor.u32 %v6397_v46, %v5752_v62 }
 0x71a   :  { %v3004_v47 = vpack.c.bf16 %v2947_v24, %v2946_v34  ;;  %v5760_v24 = vld [vmem:[%s9935_s3 + $0x430] sm:$0xf] }
 0x71b   :  { %v5761_v10 = vor.u32 %v6399_v28, %v5760_v24 }
 0x71c   :  { %3366 = vmatpush.bf16.msra.mxu1 %v3004_v47 }
 0x71d   :  { %v2892_v31 = vpop.f32.mrf.mxu0 }
 0x71e   :  { %v8912_v7 = vadd.f32 %v2892_v31, %v2804_v37 }
 0x720   :  { %3367 = vmatpush.bf16.msra.mxu1 %v3003_v55  ;;  %v5776_v55 = vld [vmem:[%s9935_s3 + $0x450] sm:$0xf] }
 0x721   :  { %v5777_v48 = vor.u32 %v6403_v23, %v5776_v55  ;;  %v5800_v23 = vld [vmem:[%s9935_s3 + $0x480] sm:$0xf] }
 0x724   :  { %3368 = vmatpush.bf16.msra.mxu1 %v3002_v4 }
 0x725   :  { %v8914_v11 = vpop.f32.mrf.mxu0 }
 0x728   :  { %3369 = vmatpush.bf16.msra.mxu1 %v3001_v21 }
 0x72c   :  { %3370 = vmatpush.bf16.msra.mxu1 %v8877_v5  ;;  %v2818_v5 = vpop.f32.mrf.mxu3 }
 0x72d   :  { %v2897_v60 = vpop.f32.mrf.mxu0  ;;  %v2819_v49 = vadd.f32 %v2818_v5, %v8776_v58  ;;  %v5784_v5 = vld [vmem:[%s9935_s3 + $0x460] sm:$0xf] }
 0x72e   :  { %v8920_v33 = vadd.f32 %v2897_v60, %v2809_v59 }
 0x730   :  { %3371 = vmatpush.bf16.msra.mxu1 %v8866_v41 }
 0x734   :  { %3372 = vmatpush.bf16.msra.mxu1 %v8854_v45  ;;  %v8936_v45 = vpop.f32.mrf.mxu3 }
 0x735   :  { %v8930_v27 = vpop.f32.mrf.mxu0 }
 0x738   :  { %3373 = vmatpush.bf16.msra.mxu1 %v8842_v25 }
 0x73b   :  { %3374 = vmatmul.bf16.vlgmr.msra.gmra.mxu1 %v5737_v3  ;;  %v6405_v3 = vld [vmem:[%s9935_s3 + $0x464] sm:$0xf0] }
 0x73c   :  { %v2823_v25 = vpop.f32.mrf.mxu3 }
 0x73d   :  { %v2902_v41 = vpop.f32.mrf.mxu0  ;;  %v2824_v14 = vadd.f32 %v2823_v25, %v8752_v44  ;;  %v5768_v44 = vld [vmem:[%s9935_s3 + $0x440] sm:$0xf] }
 0x73e   :  { %v8934_v43 = vadd.f32 %v2902_v41, %v2814_v15  ;;  %v5769_v31 = vor.u32 %v6401_v30, %v5768_v44 }
 0x744   :  { %v2825_v53 = vpop.f32.mrf.mxu3 }
 0x745   :  { %v8944_v20 = vpop.f32.mrf.mxu0 }
 0x74b   :  { %3379 = vmatmul.bf16.gmra.mxu1 %v5745_v38  ;;  %v5785_v38 = vor.u32 %v6405_v3, %v5784_v5  ;;  %v6396_v5 = vld [vmem:[%s9935_s3 + $0x424] sm:$0xf]  ;;  %v5754_v3 = vld [vmem:[%s9935_s3 + $0x428] sm:$0xf0] }
 0x74c   :  { %v2828_v58 = vpop.f32.mrf.mxu3 }
 0x74d   :  { %v2907_v9 = vpop.f32.mrf.mxu0 }
 0x74e   :  { %v8947_v16 = vadd.f32 %v2907_v9, %v2819_v49  ;;  %v2829_v49 = vadd.f32 %v2828_v58, %v8774_v63  ;;  %v2816_v58 = vadd.f32 %v8918_v36, %v8800_v26 }
 0x750   :  { %v2954_v26 = vmax.f32 %v8947_v16, 0.0 }
 0x754   :  { %v2830_v47 = vpop.f32.mrf.mxu3 }
 0x755   :  { %v2909_v61 = vpop.f32.mrf.mxu0 }
 0x75b   :  { %3384 = vmatmul.bf16.gmra.mxu1 %v5753_v40  ;;  %v2826_v40 = vadd.f32 %v2825_v53, %v8756_v12  ;;  %v5792_v12 = vld [vmem:[%s9935_s3 + $0x470] sm:$0xf]  ;;  %v6407_v53 = vld [vmem:[%s9935_s3 + $0x474] sm:$0xf0] }
 0x75c   :  { %v2833_v37 = vpop.f32.mrf.mxu3 }
 0x75d   :  { %v2912_v50 = vpop.f32.mrf.mxu0  ;;  %v2834_v41 = vadd.f32 %v2833_v37, %v8713_v57 }
 0x75e   :  { %v8956_v34 = vadd.f32 %v2912_v50, %v2824_v14 }
 0x760   :  { %v2956_v44 = vmax.f32 %v8956_v34, 0.0 }
 0x764   :  { %v2835_v56 = vpop.f32.mrf.mxu3 }
 0x765   :  { %v2914_v0 = vpop.f32.mrf.mxu0  ;;  %v2836_v60 = vadd.f32 %v2835_v56, %v8754_v54  ;;  %v2952_v56 = vmax.f32 %v8934_v43, 0.0 }
 0x766   :  { %v2915_v57 = vadd.f32 %v2914_v0, %v2826_v40  ;;  %v5793_v0 = vor.u32 %v6407_v53, %v5792_v12  ;;  %v6417_v40 = vld [vmem:[%s9935_s3 + $0x4c4] sm:$0xf0]  ;;  %v5778_v12 = vld [vmem:[%s9935_s3 + $0x458] sm:$0xf0] }
 0x768   :  { %v2957_v37 = vmax.f32 %v2915_v57, 0.0 }
 0x76b   :  { %3389 = vmatmul.bf16.gmra.mxu1 %v5761_v10 }
 0x76c   :  { %v2838_v4 = vpop.f32.mrf.mxu3 }
 0x76d   :  { %v2917_v6 = vpop.f32.mrf.mxu0  ;;  %v2839_v59 = vadd.f32 %v2838_v4, %v8692_v22  ;;  %v2831_v22 = vadd.f32 %v2830_v47, %v8732_v35  ;;  %v2821_v35 = vadd.f32 %v8936_v45, %v8820_v52  ;;  %v2905_v52 = vadd.f32 %v8944_v20, %v2816_v58  ;;  %v5808_v4 = vld [vmem:[%s9935_s3 + $0x490] sm:$0xf]  ;;  %v6419_v58 = vld [vmem:[%s9935_s3 + $0x4d4] sm:$0xf0] }
 0x76e   :  { %v2918_v14 = vadd.f32 %v2917_v6, %v2829_v49  ;;  %v2811_v6 = vadd.f32 %v8905_v1, %v8822_v19  ;;  %v2950_v19 = vmax.f32 %v8920_v33, 0.0  ;;  %v5738_v33 = vld [vmem:[%s9935_s3 + $0x408] sm:$0xf0] }
 0x76f   :  { %v2910_v47 = vadd.f32 %v2909_v61, %v2821_v35  ;;  %v3009_v61 = vpack.c.bf16 %v2957_v37, %v2956_v44  ;;  %v2953_v34 = vmax.f32 %v2905_v52, 0.0  ;;  %v6402_v44 = vld [vmem:[%s9935_s3 + $0x454] sm:$0xf] }
 0x770   :  { %v2958_v10 = vmax.f32 %v2918_v14, 0.0  ;;  %v2900_v36 = vadd.f32 %v8930_v27, %v2811_v6  ;;  %v2948_v27 = vmax.f32 %v8912_v7, 0.0  ;;  %v6400_v14 = vld [vmem:[%s9935_s3 + $0x444] sm:$0xf]  ;;  %v5781_v52 = vor.u32 %v6402_v44, %v5778_v12  ;;  %v9106_v6 = vpop.permute.xlu0 %3108 }
 0x771   :  { %v2955_v45 = vmax.f32 %v2910_v47, 0.0  ;;  %v3007_v55 = vpack.c.bf16 %v2953_v34, %v2952_v56 }
 0x773   :  { %v3008_v30 = vpack.c.bf16 %v2955_v45, %v2954_v26 }
 0x774   :  { %v2840_v21 = vpop.f32.mrf.mxu3 }
 0x775   :  { %v2919_v2 = vpop.f32.mrf.mxu0  ;;  %v2841_v18 = vadd.f32 %v2840_v21, %v8706_v8  ;;  %v5746_v21 = vld [vmem:[%s9935_s3 + $0x418] sm:$0xf0] }
 0x776   :  { %v2920_v9 = vadd.f32 %v2919_v2, %v2831_v22  ;;  %v2522_v2 = vpop.permute.xlu1 %2521  ;;  %v5762_v22 = vld [vmem:[%s9935_s3 + $0x438] sm:$0xf0] }
 0x778   :  { %v2959_v24 = vmax.f32 %v2920_v9, 0.0 }
 0x77a   :  { %v3010_v63 = vpack.c.bf16 %v2959_v24, %v2958_v10 }
 0x77b   :  { %3394 = vmatmul.bf16.gmra.mxu1 %v5769_v31  ;;  %v2806_v31 = vadd.f32 %v8892_v51, %v2522_v2  ;;  %v6409_v51 = vld [vmem:[%s9935_s3 + $0x484] sm:$0xf0]  ;;  %v6404_v2 = vld [vmem:[%s9935_s3 + $0x464] sm:$0xf] }
 0x77d   :  { %v2922_v32 = vpop.f32.mrf.mxu0  ;;  %v2895_v20 = vadd.f32 %v8914_v11, %v2806_v31  ;;  %v6392_v11 = vld [vmem:[%s9935_s3 + $0x404] sm:$0xf]  ;;  %v5786_v31 = vld [vmem:[%s9935_s3 + $0x468] sm:$0xf0] }
 0x77e   :  { %v2923_v54 = vadd.f32 %v2922_v32, %v2834_v41  ;;  %v2951_v32 = vmax.f32 %v2900_v36, 0.0  ;;  %v5741_v7 = vor.u32 %v6392_v11, %v5738_v33  ;;  %v5757_v41 = vor.u32 %v6396_v5, %v5754_v3  ;;  %v9060_v49 = vpop.permute.xlu1 %3118  ;;  %v5848_v36 = vld [vmem:[%s9935_s3 + $0x4e0] sm:$0xf]  ;;  %v6406_v11 = vld [vmem:[%s9935_s3 + $0x474] sm:$0xf] }
 0x77f   :  { %v2949_v1 = vmax.f32 %v2895_v20, 0.0  ;;  %v5794_v33 = vld [vmem:[%s9935_s3 + $0x478] sm:$0xf0] }
 0x780   :  { %v2960_v50 = vmax.f32 %v2923_v54, 0.0  ;;  %v3006_v16 = vpack.c.bf16 %v2951_v32, %v2950_v19  ;;  %v5789_v32 = vor.u32 %v6404_v2, %v5786_v31 }
 0x781   :  { %v3005_v43 = vpack.c.bf16 %v2949_v1, %v2948_v27  ;;  %v5856_v27 = vld [vmem:[%s9935_s3 + $0x4f0] sm:$0xf] }
 0x785   :  { %v2924_v39 = vpop.f32.mrf.mxu0 }
 0x786   :  { %v2925_v17 = vadd.f32 %v2924_v39, %v2836_v60  ;;  %v5801_v39 = vor.u32 %v6409_v51, %v5800_v23  ;;  %v9078_v57 = vpop.permute.xlu1 %3113  ;;  %v6423_v51 = vld [vmem:[%s9935_s3 + $0x4f4] sm:$0xf0] }
 0x788   :  { %v2961_v62 = vmax.f32 %v2925_v17, 0.0  ;;  %v5824_v17 = vld [vmem:[%s9935_s3 + $0x4b0] sm:$0xf] }
 0x78a   :  { %v3011_v28 = vpack.c.bf16 %v2961_v62, %v2960_v50  ;;  %v5832_v62 = vld [vmem:[%s9935_s3 + $0x4c0] sm:$0xf]  ;;  %v5770_v50 = vld [vmem:[%s9935_s3 + $0x448] sm:$0xf0] }
 0x78b   :  { %3399 = vmatmul.bf16.gmra.mxu1 %v5777_v48  ;;  %v6411_v48 = vld [vmem:[%s9935_s3 + $0x494] sm:$0xf0]  ;;  %v5833_v24 = vor.u32 %v6417_v40, %v5832_v62 }
 0x78d   :  { %v2927_v13 = vpop.f32.mrf.mxu0 }
 0x78e   :  { %v2928_v29 = vadd.f32 %v2927_v13, %v2839_v59  ;;  %v6394_v13 = vld [vmem:[%s9935_s3 + $0x414] sm:$0xf]  ;;  %v5809_v59 = vor.u32 %v6411_v48, %v5808_v4  ;;  %v9084_v47 = vpop.permute.xlu1 %3198 }
 0x78f   :  { %v5749_v60 = vor.u32 %v6394_v13, %v5746_v21 }
 0x790   :  { %v2962_v25 = vmax.f32 %v2928_v29, 0.0  ;;  %v6413_v29 = vld [vmem:[%s9935_s3 + $0x4a4] sm:$0xf0] }
 0x795   :  { %v2929_v15 = vpop.f32.mrf.mxu0 }
 0x796   :  { %v2930_v42 = vadd.f32 %v2929_v15, %v2841_v18  ;;  %v5816_v18 = vld [vmem:[%s9935_s3 + $0x4a0] sm:$0xf] }
 0x797   :  { %v5817_v15 = vor.u32 %v6413_v29, %v5816_v18  ;;  %v5802_v18 = vld [vmem:[%s9935_s3 + $0x488] sm:$0xf0] }
 0x798   :  { %v2963_v8 = vmax.f32 %v2930_v42, 0.0  ;;  %v6415_v42 = vld [vmem:[%s9935_s3 + $0x4b4] sm:$0xf0] }
 0x79a   :  { %v3012_v46 = vpack.c.bf16 %v2963_v8, %v2962_v25  ;;  %v5825_v25 = vor.u32 %v6415_v42, %v5824_v17 }
 0x79b   :  { %3404 = vmatmul.bf16.gmra.mxu1 %v5785_v38  ;;  %v6398_v38 = vld [vmem:[%s9935_s3 + $0x434] sm:$0xf] }
 0x79c   :  { %3455 = vmatpush.bf16.msra.mxu2 %v3012_v46  ;;  %v5765_v8 = vor.u32 %v6398_v38, %v5762_v22  ;;  %v9067_v46 = vpop.permute.xlu2 %3123 }
 0x7a0   :  { %3456 = vmatpush.bf16.msra.mxu2 %v3011_v28  ;;  %v5773_v28 = vor.u32 %v6400_v14, %v5770_v50 }
 0x7a4   :  { %3457 = vmatpush.bf16.msra.mxu2 %v3010_v63  ;;  %v9082_v10 = vpop.permute.xlu2 %3098  ;;  %v5840_v63 = vld [vmem:[%s9935_s3 + $0x4d0] sm:$0xf] }
 0x7a5   :  { %v5841_v53 = vor.u32 %v6419_v58, %v5840_v63 }
 0x7a8   :  { %3458 = vmatpush.bf16.msra.mxu2 %v3009_v61  ;;  %v9102_v61 = vpop.permute.xlu1 %3093 }
 0x7ab   :  { %3409 = vmatmul.bf16.gmra.mxu1 %v5793_v0 }
 0x7ac   :  { %3459 = vmatpush.bf16.msra.mxu2 %v3008_v30  ;;  %v9100_v45 = vpop.permute.xlu2 %3203  ;;  %v6421_v30 = vld [vmem:[%s9935_s3 + $0x4e4] sm:$0xf0] }
 0x7ad   :  { %v5849_v20 = vor.u32 %v6421_v30, %v5848_v36 }
 0x7b0   :  { %3460 = vmatpush.bf16.msra.mxu2 %v3007_v55  ;;  %v9113_v34 = vpop.permute.xlu1 %3078  ;;  %v9126_v55 = vpop.permute.xlu0 %3103 }
 0x7b4   :  { %3461 = vmatpush.bf16.msra.mxu2 %v3006_v16  ;;  %v9108_v26 = vpop.permute.xlu2 %3188 }
 0x7b8   :  { %3462 = vmatpush.bf16.msra.mxu2 %v3005_v43  ;;  %v9058_v54 = vpop.f32.mrf.mxu1  ;;  %v9130_v1 = vpop.permute.xlu1 %3183 }
 0x7b9   :  { %v9137_v23 = vpop.permute.xlu0 %3088 }
 0x7bb   :  { %3414 = vmatmul.bf16.gmra.mxu1 %v5801_v39  ;;  %3463 = vmatmul.bf16.vlgmr.msra.gmra.mxu2 %v5741_v7  ;;  %v5857_v39 = vor.u32 %v6423_v51, %v5856_v27  ;;  %v5797_v7 = vor.u32 %v6406_v11, %v5794_v33 }
 0x7bc   :  { %v9128_v19 = vpop.permute.xlu2 %3083 }
 0x7c0   :  { %v9062_v9 = vpop.f32.mrf.mxu1  ;;  %v9148_v4 = vpop.permute.xlu1 %3168 }
 0x7c1   :  { %v9152_v13 = vpop.permute.xlu0 %3193 }
 0x7c4   :  { %v3069_v43 = vpop.permute.xlu2 %3068 }
 0x7c8   :  { %v9080_v35 = vpop.f32.mrf.mxu1 }
 0x7c9   :  { %v9162_v5 = vpop.permute.xlu0 %3178 }
 0x7cb   :  { %3419 = vmatmul.bf16.gmra.mxu1 %v5809_v59  ;;  %3468 = vmatmul.bf16.gmra.mxu2 %v5749_v60  ;;  %v3064_v59 = vpop.permute.xlu1 %3063  ;;  %v6408_v60 = vld [vmem:[%s9935_s3 + $0x484] sm:$0xf] }
 0x7cc   :  { %v9154_v21 = vpop.permute.xlu2 %3173  ;;  %v5805_v29 = vor.u32 %v6408_v60, %v5802_v18 }
 0x7d0   :  { %v9086_v37 = vpop.f32.mrf.mxu1 }
 0x7d1   :  { %v3074_v38 = vpop.permute.xlu0 %3073  ;;  %v3383_v36 = vadd.f32 %v9086_v37, %v3064_v59  ;;  %v6414_v37 = vld [vmem:[%s9935_s3 + $0x4b4] sm:$0xf] }
 0x7d4   :  { %v9164_v3 = vpop.permute.xlu2 %3158 }
 0x7d8   :  { %v9104_v0 = vpop.f32.mrf.mxu1 }
 0x7d9   :  { %v3059_v63 = vpop.permute.xlu0 %3058  ;;  %v3386_v51 = vadd.f32 %v9104_v0, %v3069_v43 }
 0x7da   :  { %v3381_v44 = vadd.f32 %v9080_v35, %v3059_v63 }
 0x7db   :  { %3424 = vmatmul.bf16.gmra.mxu1 %v5817_v15  ;;  %3473 = vmatmul.bf16.gmra.mxu2 %v5757_v41  ;;  %v3049_v15 = vpop.permute.xlu1 %3048 }
 0x7dc   :  { %v3376_v41 = vadd.f32 %v9058_v54, %v3049_v15  ;;  %v3054_v22 = vpop.permute.xlu2 %3053 }
 0x7dd   :  { %v3378_v62 = vadd.f32 %v9062_v9, %v3054_v22  ;;  %v5818_v9 = vld [vmem:[%s9935_s3 + $0x4a8] sm:$0xf0] }
 0x7e0   :  { %v9124_v56 = vpop.f32.mrf.mxu1 }
 0x7e1   :  { %v3388_v59 = vadd.f32 %v9124_v56, %v3074_v38  ;;  %v5834_v56 = vld [vmem:[%s9935_s3 + $0x4c8] sm:$0xf0] }
 0x7e8   :  { %v9132_v16 = vpop.f32.mrf.mxu1 }
 0x7eb   :  { %3429 = vmatmul.bf16.gmra.mxu1 %v5825_v25  ;;  %3478 = vmatmul.bf16.gmra.mxu2 %v5765_v8  ;;  %v6410_v25 = vld [vmem:[%s9935_s3 + $0x494] sm:$0xf]  ;;  %v5810_v8 = vld [vmem:[%s9935_s3 + $0x498] sm:$0xf0] }
 0x7ec   :  { %v5813_v50 = vor.u32 %v6410_v25, %v5810_v8  ;;  %v6416_v8 = vld [vmem:[%s9935_s3 + $0x4c4] sm:$0xf] }
 0x7f0   :  { %v9150_v48 = vpop.f32.mrf.mxu1 }
 0x7f1   :  { %v3393_v38 = vadd.f32 %v9150_v48, %v9128_v19  ;;  %v5842_v19 = vld [vmem:[%s9935_s3 + $0x4d8] sm:$0xf0] }
 0x7f8   :  { %v3395_v58 = vpop.f32.mrf.mxu1 }
 0x7fb   :  { %3434 = vmatmul.bf16.gmra.mxu1 %v5833_v24  ;;  %3483 = vmatmul.bf16.gmra.mxu2 %v5773_v28 }
 0x800   :  { %v9184_v30 = vpop.f32.mrf.mxu1 }
 0x80b   :  { %3439 = vmatmul.bf16.gmra.mxu1 %v5841_v53  ;;  %3488 = vmatmul.bf16.gmra.mxu2 %v5781_v52  ;;  %v6412_v52 = vld [vmem:[%s9935_s3 + $0x4a4] sm:$0xf] }
 0x81b   :  { %3444 = vmatmul.bf16.gmra.mxu1 %v5849_v20  ;;  %3493 = vmatmul.bf16.gmra.mxu2 %v5789_v32  ;;  %v5821_v20 = vor.u32 %v6412_v52, %v5818_v9 }
 0x82b   :  { %3449 = vmatmul.bf16.gmra.mxu1 %v5857_v39  ;;  %3498 = vmatmul.bf16.gmra.mxu2 %v5797_v7  ;;  %v9189_v39 = vpop.f32.mrf.mxu1  ;;  %v5826_v7 = vld [vmem:[%s9935_s3 + $0x4b8] sm:$0xf0] }
 0x833   :  { %v3402_v0 = vpop.f32.mrf.mxu1 }
 0x83b   :  { %3503 = vmatmul.bf16.gmra.mxu2 %v5805_v29  ;;  %v5829_v29 = vor.u32 %v6414_v37, %v5826_v7  ;;  %v3405_v25 = vpop.f32.mrf.mxu1 }
 0x83e   :  { %v3464_v17 = vpop.f32.mrf.mxu2 }
 0x83f   :  { %v3465_v42 = vadd.f32 %v3464_v17, %v3376_v41  ;;  %v3391_v17 = vadd.f32 %v9132_v16, %v9113_v34  ;;  %v3396_v16 = vadd.f32 %v3395_v58, %v9137_v23  ;;  %v6420_v23 = vld [vmem:[%s9935_s3 + $0x4e4] sm:$0xf]  ;;  %v5850_v58 = vld [vmem:[%s9935_s3 + $0x4e8] sm:$0xf0] }
 0x841   :  { %v3544_v24 = vmax.f32 %v3465_v42, 0.0 }
 0x846   :  { %v3466_v40 = vpop.f32.mrf.mxu2 }
 0x847   :  { %v3467_v14 = vadd.f32 %v3466_v40, %v3378_v62 }
 0x849   :  { %v3545_v28 = vmax.f32 %v3467_v14, 0.0  ;;  %v5837_v14 = vor.u32 %v6416_v8, %v5834_v56  ;;  %v3403_v56 = vadd.f32 %v3402_v0, %v9126_v55 }
 0x84b   :  { %3508 = vmatmul.bf16.gmra.mxu2 %v5813_v50  ;;  %v9174_v54 = vpack.c.bf16 %v3545_v28, %v3544_v24  ;;  %v3407_v28 = vpop.f32.mrf.mxu1 }
 0x84e   :  { %v3469_v12 = vpop.f32.mrf.mxu2 }
 0x84f   :  { %v3470_v53 = vadd.f32 %v3469_v12, %v3381_v44  ;;  %v6418_v12 = vld [vmem:[%s9935_s3 + $0x4d4] sm:$0xf] }
 0x851   :  { %v3546_v32 = vmax.f32 %v3470_v53, 0.0  ;;  %v5845_v53 = vor.u32 %v6418_v12, %v5842_v19 }
 0x853   :  { %v3410_v52 = vpop.f32.mrf.mxu1 }
 0x856   :  { %v3471_v2 = vpop.f32.mrf.mxu2 }
 0x857   :  { %v3472_v31 = vadd.f32 %v3471_v2, %v3383_v36 }
 0x859   :  { %v3547_v27 = vmax.f32 %v3472_v31, 0.0  ;;  %v5853_v31 = vor.u32 %v6420_v23, %v5850_v58 }
 0x85b   :  { %3513 = vmatmul.bf16.gmra.mxu2 %v5821_v20  ;;  %v9186_v35 = vpack.c.bf16 %v3547_v27, %v3546_v32  ;;  %v3412_v36 = vpop.f32.mrf.mxu1  ;;  %v6422_v27 = vld [vmem:[%s9935_s3 + $0x4f4] sm:$0xf] }
 0x85e   :  { %v3474_v11 = vpop.f32.mrf.mxu2 }
 0x85f   :  { %v3475_v33 = vadd.f32 %v3474_v11, %v3386_v51  ;;  %v5858_v51 = vld [vmem:[%s9935_s3 + $0x4f8] sm:$0xf0] }
 0x860   :  { %v5861_v37 = vor.u32 %v6422_v27, %v5858_v51 }
 0x861   :  { %v3548_v15 = vmax.f32 %v3475_v33, 0.0 }
 0x863   :  { %v3415_v20 = vpop.f32.mrf.mxu1 }
 0x866   :  { %v3476_v60 = vpop.f32.mrf.mxu2 }
 0x867   :  { %v3477_v18 = vadd.f32 %v3476_v60, %v3388_v59  ;;  %v9233_v60 = vpop.permute.xlu1 %3153 }
 0x869   :  { %v3549_v41 = vmax.f32 %v3477_v18, 0.0  ;;  %v3411_v18 = vadd.f32 %v3410_v52, %v9060_v49  ;;  %v3401_v49 = vadd.f32 %v9189_v39, %v9082_v10 }
 0x86b   :  { %3518 = vmatmul.bf16.gmra.mxu2 %v5829_v29  ;;  %v9198_v43 = vpack.c.bf16 %v3549_v41, %v3548_v15  ;;  %v9231_v11 = vpop.f32.mrf.mxu1  ;;  %v3408_v29 = vadd.f32 %v3407_v28, %v9078_v57  ;;  %v3413_v15 = vadd.f32 %v3412_v36, %v9067_v46 }
 0x86e   :  { %v3479_v42 = vpop.f32.mrf.mxu2 }
 0x86f   :  { %v3480_v22 = vadd.f32 %v3479_v42, %v3391_v17  ;;  %v3406_v42 = vadd.f32 %v3405_v25, %v9106_v6  ;;  %v3129_v46 = vpop.permute.xlu1 %3128 }
 0x870   :  { %v3416_v6 = vadd.f32 %v3415_v20, %v3129_v46  ;;  %v6425_v20 = vld [vmem:[%s9935_s3 + $0x504] sm:$0xf0] }
 0x871   :  { %v3550_v50 = vmax.f32 %v3480_v22, 0.0 }
 0x873   :  { %v3420_v59 = vpop.f32.mrf.mxu1 }
 0x876   :  { %v3481_v62 = vpop.f32.mrf.mxu2 }
 0x877   :  { %v3482_v40 = vadd.f32 %v3481_v62, %v3393_v38 }
 0x879   :  { %v3551_v24 = vmax.f32 %v3482_v40, 0.0 }
 0x87b   :  { %3523 = vmatmul.bf16.gmra.mxu2 %v5837_v14  ;;  %v9210_v34 = vpack.c.bf16 %v3551_v24, %v3550_v50  ;;  %v9240_v14 = vpop.f32.mrf.mxu1 }
 0x87e   :  { %v3484_v63 = vpop.f32.mrf.mxu2 }
 0x87f   :  { %v3485_v44 = vadd.f32 %v3484_v63, %v3396_v16  ;;  %v3398_v16 = vadd.f32 %v9184_v30, %v9102_v61  ;;  %v3139_v30 = vpop.permute.xlu2 %3138 }
 0x881   :  { %v3552_v36 = vmax.f32 %v3485_v44, 0.0  ;;  %v5928_v44 = vld [vmem:[%s9935_s3 + $0x500] sm:$0xf] }
 0x882   :  { %v5929_v27 = vor.u32 %v6425_v20, %v5928_v44 }
 0x883   :  { %v3425_v52 = vpop.f32.mrf.mxu1 }
 0x886   :  { %v3486_v48 = vpop.f32.mrf.mxu2 }
 0x887   :  { %v3487_v0 = vadd.f32 %v3486_v48, %v3398_v16 }
 0x889   :  { %v3553_v10 = vmax.f32 %v3487_v0, 0.0 }
 0x88b   :  { %3528 = vmatmul.bf16.gmra.mxu2 %v5845_v53  ;;  %v3613_v61 = vpack.c.bf16 %v3553_v10, %v3552_v36  ;;  %v9251_v48 = vpop.f32.mrf.mxu1  ;;  %v6435_v10 = vld [vmem:[%s9935_s3 + $0x554] sm:$0xf0] }
 0x88e   :  { %v3489_v9 = vpop.f32.mrf.mxu2 }
 0x88f   :  { %v3490_v25 = vadd.f32 %v3489_v9, %v3401_v49  ;;  %v3421_v9 = vadd.f32 %v3420_v59, %v3139_v30  ;;  %v6427_v59 = vld [vmem:[%s9935_s3 + $0x514] sm:$0xf0] }
 0x891   :  { %v3554_v53 = vmax.f32 %v3490_v25, 0.0 }
 0x896   :  { %v3491_v2 = vpop.f32.mrf.mxu2 }
 0x897   :  { %v3492_v50 = vadd.f32 %v3491_v2, %v3403_v56 }
 0x899   :  { %v3555_v63 = vmax.f32 %v3492_v50, 0.0  ;;  %v5952_v50 = vld [vmem:[%s9935_s3 + $0x530] sm:$0xf] }
 0x89b   :  { %3533 = vmatmul.bf16.gmra.mxu2 %v5853_v31  ;;  %v3614_v39 = vpack.c.bf16 %v3555_v63, %v3554_v53  ;;  %v9256_v31 = vpop.permute.xlu0 %3163  ;;  %v5968_v53 = vld [vmem:[%s9935_s3 + $0x550] sm:$0xf] }
 0x89c   :  { %v5969_v36 = vor.u32 %v6435_v10, %v5968_v53 }
 0x89e   :  { %v3494_v32 = vpop.f32.mrf.mxu2 }
 0x89f   :  { %v3495_v38 = vadd.f32 %v3494_v32, %v3406_v42  ;;  %v3430_v32 = vpop.f32.mrf.mxu1  ;;  %v5944_v42 = vld [vmem:[%s9935_s3 + $0x520] sm:$0xf] }
 0x8a1   :  { %v3556_v28 = vmax.f32 %v3495_v38, 0.0 }
 0x8a3   :  { %v3149_v51 = vpop.permute.xlu0 %3148 }
 0x8a6   :  { %v3496_v33 = vpop.f32.mrf.mxu2 }
 0x8a7   :  { %v3497_v22 = vadd.f32 %v3496_v33, %v3408_v29 }
 0x8a9   :  { %v3557_v57 = vmax.f32 %v3497_v22, 0.0  ;;  %v6429_v22 = vld [vmem:[%s9935_s3 + $0x524] sm:$0xf0] }
 0x8aa   :  { %v5945_v38 = vor.u32 %v6429_v22, %v5944_v42 }
 0x8ab   :  { %3538 = vmatmul.bf16.gmra.mxu2 %v5861_v37  ;;  %v3615_v19 = vpack.c.bf16 %v3557_v57, %v3556_v28  ;;  %v6431_v57 = vld [vmem:[%s9935_s3 + $0x534] sm:$0xf0]  ;;  %v6433_v28 = vld [vmem:[%s9935_s3 + $0x544] sm:$0xf0] }
 0x8ac   :  { %v5953_v46 = vor.u32 %v6431_v57, %v5952_v50 }
 0x8ae   :  { %v3499_v7 = vpop.f32.mrf.mxu2 }
 0x8af   :  { %v3500_v41 = vadd.f32 %v3499_v7, %v3411_v18  ;;  %v5936_v7 = vld [vmem:[%s9935_s3 + $0x510] sm:$0xf] }
 0x8b0   :  { %v5937_v29 = vor.u32 %v6427_v59, %v5936_v7 }
 0x8b1   :  { %v3558_v62 = vmax.f32 %v3500_v41, 0.0 }
 0x8b6   :  { %v3501_v17 = vpop.f32.mrf.mxu2 }
 0x8b7   :  { %v3502_v8 = vadd.f32 %v3501_v17, %v3413_v15  ;;  %v3431_v15 = vadd.f32 %v3430_v32, %v9164_v3  ;;  %v5976_v32 = vld [vmem:[%s9935_s3 + $0x560] sm:$0xf] }
 0x8b9   :  { %v3559_v40 = vmax.f32 %v3502_v8, 0.0 }
 0x8bb   :  { %v3616_v24 = vpack.c.bf16 %v3559_v40, %v3558_v62 }
 0x8bd   :  { %3978 = vmatpush.bf16.msrb.mxu3 %v3616_v24 }
 0x8be   :  { %v3504_v55 = vpop.f32.mrf.mxu2 }
 0x8bf   :  { %v9246_v12 = vadd.f32 %v3504_v55, %v3416_v6 }
 0x8c1   :  { %3979 = vmatpush.bf16.msrb.mxu3 %v3615_v19 }
 0x8c5   :  { %3980 = vmatpush.bf16.msrb.mxu3 %v3614_v39 }
 0x8c6   :  { %v9248_v23 = vpop.f32.mrf.mxu2 }
 0x8c9   :  { %3981 = vmatpush.bf16.msrb.mxu3 %v3613_v61 }
 0x8cd   :  { %3982 = vmatpush.bf16.msrb.mxu3 %v9210_v34 }
 0x8ce   :  { %v3509_v58 = vpop.f32.mrf.mxu2 }
 0x8cf   :  { %v9253_v2 = vadd.f32 %v3509_v58, %v3421_v9 }
 0x8d1   :  { %3983 = vmatpush.bf16.msrb.mxu3 %v9198_v43  ;;  %v3426_v43 = vadd.f32 %v3425_v52, %v3149_v51 }
 0x8d5   :  { %3984 = vmatpush.bf16.msrb.mxu3 %v9186_v35  ;;  %v9270_v35 = vpop.f32.mrf.mxu1 }
 0x8d6   :  { %v9265_v34 = vpop.f32.mrf.mxu2 }
 0x8d9   :  { %3985 = vmatpush.bf16.msrb.mxu3 %v9174_v54 }
 0x8dc   :  { %3986 = vmatmul.bf16.vlgmr.msrb.gmra.mxu3 %v5929_v27  ;;  %v6437_v27 = vld [vmem:[%s9935_s3 + $0x564] sm:$0xf0] }
 0x8dd   :  { %v3435_v54 = vpop.f32.mrf.mxu1  ;;  %v5977_v59 = vor.u32 %v6437_v27, %v5976_v32  ;;  %v6008_v32 = vld [vmem:[%s9935_s3 + $0x5a0] sm:$0xf]  ;;  %v6445_v27 = vld [vmem:[%s9935_s3 + $0x5a4] sm:$0xf0] }
 0x8de   :  { %v3514_v33 = vpop.f32.mrf.mxu2  ;;  %v3436_v62 = vadd.f32 %v3435_v54, %v9148_v4  ;;  %v5960_v4 = vld [vmem:[%s9935_s3 + $0x540] sm:$0xf] }
 0x8df   :  { %v9268_v37 = vadd.f32 %v3514_v33, %v3426_v43  ;;  %v5961_v0 = vor.u32 %v6433_v28, %v5960_v4 }
 0x8e5   :  { %v3437_v8 = vpop.f32.mrf.mxu1 }
 0x8e6   :  { %v9278_v18 = vpop.f32.mrf.mxu2  ;;  %v3438_v22 = vadd.f32 %v3437_v8, %v9154_v21  ;;  %v5984_v21 = vld [vmem:[%s9935_s3 + $0x570] sm:$0xf]  ;;  %v6439_v8 = vld [vmem:[%s9935_s3 + $0x574] sm:$0xf0] }
 0x8ec   :  { %3991 = vmatmul.bf16.gmra.mxu3 %v5937_v29 }
 0x8ed   :  { %v3440_v3 = vpop.f32.mrf.mxu1 }
 0x8ee   :  { %v3519_v41 = vpop.f32.mrf.mxu2  ;;  %v3441_v54 = vadd.f32 %v3440_v3, %v9162_v5  ;;  %v3428_v3 = vadd.f32 %v9251_v48, %v9233_v60 }
 0x8ef   :  { %v9281_v17 = vadd.f32 %v3519_v41, %v3431_v15 }
 0x8f1   :  { %v3566_v60 = vmax.f32 %v9281_v17, 0.0 }
 0x8f5   :  { %v3442_v16 = vpop.f32.mrf.mxu1 }
 0x8f6   :  { %v3521_v56 = vpop.f32.mrf.mxu2 }
 0x8fc   :  { %3996 = vmatmul.bf16.gmra.mxu3 %v5945_v38 }
 0x8fd   :  { %v3445_v25 = vpop.f32.mrf.mxu1 }
 0x8fe   :  { %v3524_v40 = vpop.f32.mrf.mxu2  ;;  %v3446_v43 = vadd.f32 %v3445_v25, %v9108_v26 }
 0x8ff   :  { %v9290_v49 = vadd.f32 %v3524_v40, %v3436_v62 }
 0x901   :  { %v3568_v25 = vmax.f32 %v9290_v49, 0.0 }
 0x905   :  { %v3447_v63 = vpop.f32.mrf.mxu1 }
 0x906   :  { %v3526_v24 = vpop.f32.mrf.mxu2  ;;  %v3448_v58 = vadd.f32 %v3447_v63, %v9152_v13  ;;  %v3564_v63 = vmax.f32 %v9268_v37, 0.0 }
 0x907   :  { %v3527_v26 = vadd.f32 %v3526_v24, %v3438_v22  ;;  %v3144_v24 = vpop.permute.xlu0 %3143 }
 0x908   :  { %v3423_v4 = vadd.f32 %v9240_v14, %v3144_v24  ;;  %v3562_v14 = vmax.f32 %v9253_v2, 0.0  ;;  %v5930_v2 = vld [vmem:[%s9935_s3 + $0x508] sm:$0xf0]  ;;  %v6032_v24 = vld [vmem:[%s9935_s3 + $0x5d0] sm:$0xf] }
 0x90a   :  { %v3512_v48 = vadd.f32 %v9265_v34, %v3423_v4  ;;  %v3560_v34 = vmax.f32 %v9246_v12, 0.0  ;;  %v6451_v4 = vld [vmem:[%s9935_s3 + $0x5d4] sm:$0xf0] }
 0x90c   :  { %4001 = vmatmul.bf16.gmra.mxu3 %v5953_v46 }
 0x90d   :  { %v3450_v52 = vpop.f32.mrf.mxu1 }
 0x90e   :  { %v3529_v6 = vpop.f32.mrf.mxu2  ;;  %v3451_v9 = vadd.f32 %v3450_v52, %v9084_v47  ;;  %v3443_v47 = vadd.f32 %v3442_v16, %v9130_v1  ;;  %v3433_v1 = vadd.f32 %v9270_v35, %v9256_v31  ;;  %v3569_v16 = vmax.f32 %v3527_v26, 0.0 }
 0x90f   :  { %v3530_v38 = vadd.f32 %v3529_v6, %v3441_v54  ;;  %v3517_v31 = vadd.f32 %v9278_v18, %v3428_v3  ;;  %v5985_v6 = vor.u32 %v6439_v8, %v5984_v21  ;;  %v6430_v54 = vld [vmem:[%s9935_s3 + $0x534] sm:$0xf] }
 0x910   :  { %v3522_v46 = vadd.f32 %v3521_v56, %v3433_v1  ;;  %v3621_v56 = vpack.c.bf16 %v3569_v16, %v3568_v25  ;;  %v6449_v1 = vld [vmem:[%s9935_s3 + $0x5c4] sm:$0xf0] }
 0x911   :  { %v3570_v57 = vmax.f32 %v3530_v38, 0.0  ;;  %v3565_v49 = vmax.f32 %v3517_v31, 0.0 }
 0x912   :  { %v3567_v35 = vmax.f32 %v3522_v46, 0.0  ;;  %v5962_v46 = vld [vmem:[%s9935_s3 + $0x548] sm:$0xf0] }
 0x913   :  { %v3619_v53 = vpack.c.bf16 %v3565_v49, %v3564_v63  ;;  %v6033_v49 = vor.u32 %v6451_v4, %v6032_v24 }
 0x914   :  { %v3620_v28 = vpack.c.bf16 %v3567_v35, %v3566_v60  ;;  %v6434_v60 = vld [vmem:[%s9935_s3 + $0x554] sm:$0xf] }
 0x915   :  { %v3452_v30 = vpop.f32.mrf.mxu1 }
 0x916   :  { %v3531_v55 = vpop.f32.mrf.mxu2  ;;  %v3453_v44 = vadd.f32 %v3452_v30, %v9100_v45  ;;  %v6426_v30 = vld [vmem:[%s9935_s3 + $0x514] sm:$0xf] }
 0x917   :  { %v3532_v15 = vadd.f32 %v3531_v55, %v3443_v47  ;;  %v3134_v55 = vpop.permute.xlu2 %3133 }
 0x919   :  { %v3571_v40 = vmax.f32 %v3532_v15, 0.0  ;;  %v5954_v15 = vld [vmem:[%s9935_s3 + $0x538] sm:$0xf0] }
 0x91a   :  { %v5957_v38 = vor.u32 %v6430_v54, %v5954_v15  ;;  %v5994_v54 = vld [vmem:[%s9935_s3 + $0x588] sm:$0xf0] }
 0x91b   :  { %v3622_v5 = vpack.c.bf16 %v3571_v40, %v3570_v57  ;;  %v6432_v57 = vld [vmem:[%s9935_s3 + $0x544] sm:$0xf] }
 0x91c   :  { %4006 = vmatmul.bf16.gmra.mxu3 %v5961_v0  ;;  %v3418_v0 = vadd.f32 %v9231_v11, %v3134_v55  ;;  %v6441_v11 = vld [vmem:[%s9935_s3 + $0x584] sm:$0xf0]  ;;  %v5965_v3 = vor.u32 %v6432_v57, %v5962_v46 }
 0x91e   :  { %v3534_v19 = vpop.f32.mrf.mxu2  ;;  %v3507_v18 = vadd.f32 %v9248_v23, %v3418_v0  ;;  %v6424_v23 = vld [vmem:[%s9935_s3 + $0x504] sm:$0xf] }
 0x91f   :  { %v3535_v13 = vadd.f32 %v3534_v19, %v3446_v43  ;;  %v3563_v19 = vmax.f32 %v3512_v48, 0.0  ;;  %v5933_v12 = vor.u32 %v6424_v23, %v5930_v2  ;;  %v5946_v43 = vld [vmem:[%s9935_s3 + $0x528] sm:$0xf0]  ;;  %v9421_v16 = vpop.permute.xlu2 %3730  ;;  %v5970_v48 = vld [vmem:[%s9935_s3 + $0x558] sm:$0xf0] }
 0x920   :  { %v3561_v17 = vmax.f32 %v3507_v18, 0.0 }
 0x921   :  { %v3572_v62 = vmax.f32 %v3535_v13, 0.0  ;;  %v3618_v10 = vpack.c.bf16 %v3563_v19, %v3562_v14  ;;  %v6016_v13 = vld [vmem:[%s9935_s3 + $0x5b0] sm:$0xf]  ;;  %v6040_v19 = vld [vmem:[%s9935_s3 + $0x5e0] sm:$0xf] }
 0x922   :  { %v3617_v37 = vpack.c.bf16 %v3561_v17, %v3560_v34  ;;  %v6453_v14 = vld [vmem:[%s9935_s3 + $0x5e4] sm:$0xf0]  ;;  %v6436_v17 = vld [vmem:[%s9935_s3 + $0x564] sm:$0xf] }
 0x926   :  { %v3536_v39 = vpop.f32.mrf.mxu2 }
 0x927   :  { %v3537_v33 = vadd.f32 %v3536_v39, %v3448_v58  ;;  %v5992_v39 = vld [vmem:[%s9935_s3 + $0x580] sm:$0xf]  ;;  %v9429_v31 = vpop.permute.xlu2 %3805 }
 0x928   :  { %v5993_v52 = vor.u32 %v6441_v11, %v5992_v39  ;;  %v6041_v11 = vor.u32 %v6453_v14, %v6040_v19 }
 0x929   :  { %v3573_v41 = vmax.f32 %v3537_v33, 0.0  ;;  %v6009_v33 = vor.u32 %v6445_v27, %v6008_v32 }
 0x92b   :  { %v3623_v50 = vpack.c.bf16 %v3573_v41, %v3572_v62 }
 0x92c   :  { %4011 = vmatmul.bf16.gmra.mxu3 %v5969_v36  ;;  %v6000_v36 = vld [vmem:[%s9935_s3 + $0x590] sm:$0xf] }
 0x92e   :  { %v3539_v61 = vpop.f32.mrf.mxu2 }
 0x92f   :  { %v3540_v20 = vadd.f32 %v3539_v61, %v3451_v9  ;;  %v6443_v61 = vld [vmem:[%s9935_s3 + $0x594] sm:$0xf0]  ;;  %v5938_v9 = vld [vmem:[%s9935_s3 + $0x518] sm:$0xf0]  ;;  %v9449_v55 = vpop.permute.xlu2 %3790 }
 0x930   :  { %v6001_v58 = vor.u32 %v6443_v61, %v6000_v36  ;;  %v6048_v61 = vld [vmem:[%s9935_s3 + $0x5f0] sm:$0xf] }
 0x931   :  { %v3574_v29 = vmax.f32 %v3540_v20, 0.0  ;;  %v9367_v20 = vpop.permute.xlu0 %3810 }
 0x936   :  { %v3541_v51 = vpop.f32.mrf.mxu2 }
 0x937   :  { %v3542_v7 = vadd.f32 %v3541_v51, %v3453_v44  ;;  %v5941_v44 = vor.u32 %v6426_v30, %v5938_v9  ;;  %v6428_v51 = vld [vmem:[%s9935_s3 + $0x524] sm:$0xf]  ;;  %v6455_v30 = vld [vmem:[%s9935_s3 + $0x5f4] sm:$0xf0]  ;;  %v6438_v9 = vld [vmem:[%s9935_s3 + $0x574] sm:$0xf] }
 0x939   :  { %v3575_v45 = vmax.f32 %v3542_v7, 0.0  ;;  %v5949_v7 = vor.u32 %v6428_v51, %v5946_v43  ;;  %v9383_v47 = vpop.permute.xlu0 %3735 }
 0x93b   :  { %v3624_v42 = vpack.c.bf16 %v3575_v45, %v3574_v29  ;;  %v6447_v45 = vld [vmem:[%s9935_s3 + $0x5b4] sm:$0xf0] }
 0x93c   :  { %4016 = vmatmul.bf16.gmra.mxu3 %v5977_v59  ;;  %v9381_v59 = vpop.permute.xlu1 %3815  ;;  %v6017_v22 = vor.u32 %v6447_v45, %v6016_v13  ;;  %v6440_v45 = vld [vmem:[%s9935_s3 + $0x584] sm:$0xf] }
 0x93d   :  { %4067 = vmatpush.bf16.msrb.mxu0 %v3624_v42 }
 0x941   :  { %4068 = vmatpush.bf16.msrb.mxu0 %v3623_v50  ;;  %v9401_v42 = vpop.permute.xlu0 %3720  ;;  %v6024_v50 = vld [vmem:[%s9935_s3 + $0x5c0] sm:$0xf] }
 0x944   :  { %v9388_v29 = vpop.permute.xlu1 %3800 }
 0x945   :  { %4069 = vmatpush.bf16.msrb.mxu0 %v3622_v5  ;;  %v6025_v5 = vor.u32 %v6449_v1, %v6024_v50 }
 0x949   :  { %4070 = vmatpush.bf16.msrb.mxu0 %v3621_v56  ;;  %v9407_v40 = vpop.permute.xlu0 %3795 }
 0x94c   :  { %4021 = vmatmul.bf16.gmra.mxu3 %v5985_v6  ;;  %v9403_v62 = vpop.permute.xlu1 %3725 }
 0x94d   :  { %4071 = vmatpush.bf16.msrb.mxu0 %v3620_v28  ;;  %v5973_v28 = vor.u32 %v6434_v60, %v5970_v48  ;;  %v6442_v48 = vld [vmem:[%s9935_s3 + $0x594] sm:$0xf] }
 0x951   :  { %4072 = vmatpush.bf16.msrb.mxu0 %v3619_v53  ;;  %v9427_v8 = vpop.permute.xlu0 %3780  ;;  %v9460_v53 = vpop.permute.xlu2 %3715 }
 0x954   :  { %v9423_v25 = vpop.permute.xlu1 %3710 }
 0x955   :  { %4073 = vmatpush.bf16.msrb.mxu0 %v3618_v10  ;;  %v5978_v10 = vld [vmem:[%s9935_s3 + $0x568] sm:$0xf0] }
 0x956   :  { %v5981_v23 = vor.u32 %v6436_v17, %v5978_v10 }
 0x959   :  { %4074 = vmatpush.bf16.msrb.mxu0 %v3617_v37  ;;  %v9438_v6 = vpop.permute.xlu0 %3705  ;;  %v9477_v37 = vpop.permute.xlu2 %3700 }
 0x95c   :  { %4026 = vmatmul.bf16.gmra.mxu3 %v5993_v52  ;;  %4075 = vmatmul.bf16.vlgmr.msrb.gmra.mxu0 %v5933_v12  ;;  %v9431_v35 = vpop.permute.xlu1 %3785 }
 0x95f   :  { %v9399_v41 = vpop.f32.mrf.mxu3 }
 0x961   :  { %v9455_v18 = vpop.permute.xlu0 %3690  ;;  %v9495_v27 = vpop.permute.xlu2 %3775 }
 0x964   :  { %v9451_v0 = vpop.permute.xlu1 %3770 }
 0x967   :  { %v9405_v26 = vpop.f32.mrf.mxu3 }
 0x969   :  { %v9475_v2 = vpop.permute.xlu0 %3765 }
 0x96c   :  { %4031 = vmatmul.bf16.gmra.mxu3 %v6001_v58  ;;  %4080 = vmatmul.bf16.gmra.mxu0 %v5941_v44  ;;  %v9471_v34 = vpop.permute.xlu1 %3695  ;;  %v5986_v58 = vld [vmem:[%s9935_s3 + $0x578] sm:$0xf0]  ;;  %v6049_v44 = vor.u32 %v6455_v30, %v6048_v61 }
 0x96d   :  { %v5989_v32 = vor.u32 %v6438_v9, %v5986_v58 }
 0x96f   :  { %v9425_v21 = vpop.f32.mrf.mxu3 }
 0x971   :  { %v9481_v36 = vpop.permute.xlu0 %3750 }
 0x974   :  { %v3681_v52 = vpop.permute.xlu1 %3680 }
 0x977   :  { %v9433_v56 = vpop.f32.mrf.mxu3 }
 0x97c   :  { %4036 = vmatmul.bf16.gmra.mxu3 %v6009_v33  ;;  %4085 = vmatmul.bf16.gmra.mxu0 %v5949_v7  ;;  %v9497_v51 = vpop.permute.xlu1 %3755  ;;  %v3676_v33 = vpop.permute.xlu0 %3675 }
 0x97d   :  { %v9499_v7 = vpop.permute.xlu2 %3760 }
 0x97f   :  { %v9453_v63 = vpop.f32.mrf.mxu3 }
 0x984   :  { %v9501_v13 = vpop.permute.xlu1 %3740  ;;  %v3661_v15 = vpop.permute.xlu0 %3660 }
 0x985   :  { %v3686_v57 = vpop.permute.xlu2 %3685 }
 0x987   :  { %v9473_v39 = vpop.f32.mrf.mxu3 }
 0x98c   :  { %4041 = vmatmul.bf16.gmra.mxu3 %v6017_v22  ;;  %4090 = vmatmul.bf16.gmra.mxu0 %v5957_v38  ;;  %v3988_v22 = vadd.f32 %v9399_v41, %v3661_v15  ;;  %v5997_v38 = vor.u32 %v6440_v45, %v5994_v54  ;;  %v3666_v46 = vpop.permute.xlu1 %3665  ;;  %v6002_v41 = vld [vmem:[%s9935_s3 + $0x598] sm:$0xf0]  ;;  %v3998_v45 = vadd.f32 %v9453_v63, %v3681_v52 }
 0x98d   :  { %v6005_v17 = vor.u32 %v6442_v48, %v6002_v41  ;;  %v6018_v63 = vld [vmem:[%s9935_s3 + $0x5b8] sm:$0xf0] }
 0x98f   :  { %v9479_v12 = vpop.f32.mrf.mxu3 }
 0x997   :  { %v4004_v43 = vpop.f32.mrf.mxu3 }
 0x998   :  { %v4005_v48 = vadd.f32 %v4004_v43, %v9471_v34 }
 0x99c   :  { %4046 = vmatmul.bf16.gmra.mxu3 %v6025_v5  ;;  %4095 = vmatmul.bf16.gmra.mxu0 %v5965_v3  ;;  %v3990_v5 = vadd.f32 %v9405_v26, %v3666_v46 }
 0x99f   :  { %v4007_v19 = vpop.f32.mrf.mxu3 }
 0x9ac   :  { %4051 = vmatmul.bf16.gmra.mxu3 %v6033_v49  ;;  %4100 = vmatmul.bf16.gmra.mxu0 %v5973_v28  ;;  %v3671_v28 = vpop.permute.xlu2 %3670 }
 0x9ad   :  { %v3993_v14 = vadd.f32 %v9425_v21, %v3671_v28  ;;  %v6010_v21 = vld [vmem:[%s9935_s3 + $0x5a8] sm:$0xf0] }
 0x9bc   :  { %4056 = vmatmul.bf16.gmra.mxu3 %v6041_v11  ;;  %4105 = vmatmul.bf16.gmra.mxu0 %v5981_v23  ;;  %v3995_v11 = vadd.f32 %v9433_v56, %v3676_v33  ;;  %v9521_v23 = vpop.f32.mrf.mxu3 }
 0x9c4   :  { %v9532_v15 = vpop.f32.mrf.mxu3 }
 0x9cc   :  { %4061 = vmatmul.bf16.gmra.mxu3 %v6049_v44  ;;  %4110 = vmatmul.bf16.gmra.mxu0 %v5989_v32  ;;  %v6444_v44 = vld [vmem:[%s9935_s3 + $0x5a4] sm:$0xf] }
 0x9cd   :  { %v6013_v54 = vor.u32 %v6444_v44, %v6010_v21  ;;  %v6034_v44 = vld [vmem:[%s9935_s3 + $0x5d8] sm:$0xf0] }
 0x9d9   :  { %v4076_v50 = vpop.f32.mrf.mxu0 }
 0x9da   :  { %v4077_v1 = vadd.f32 %v4076_v50, %v3988_v22  ;;  %v4000_v22 = vadd.f32 %v9473_v39, %v3686_v57 }
 0x9dc   :  { %4115 = vmatmul.bf16.gmra.mxu0 %v5997_v38  ;;  %v4156_v4 = vmax.f32 %v4077_v1, 0.0 }
 0x9e1   :  { %v4078_v3 = vpop.f32.mrf.mxu0 }
 0x9e2   :  { %v4079_v24 = vadd.f32 %v4078_v3, %v3990_v5  ;;  %v4014_v5 = vpop.f32.mrf.mxu3  ;;  %v6446_v3 = vld [vmem:[%s9935_s3 + $0x5b4] sm:$0xf] }
 0x9e4   :  { %v4157_v60 = vmax.f32 %v4079_v24, 0.0  ;;  %v4003_v24 = vadd.f32 %v9479_v12, %v9455_v18  ;;  %v4008_v12 = vadd.f32 %v4007_v19, %v9477_v37 }
 0x9e6   :  { %v9517_v49 = vpack.c.bf16 %v4157_v60, %v4156_v4  ;;  %v6021_v4 = vor.u32 %v6446_v3, %v6018_v63  ;;  %v6050_v3 = vld [vmem:[%s9935_s3 + $0x5f8] sm:$0xf0] }
 0x9e9   :  { %v4081_v26 = vpop.f32.mrf.mxu0 }
 0x9ea   :  { %v4082_v10 = vadd.f32 %v4081_v26, %v3993_v14  ;;  %v4017_v60 = vpop.f32.mrf.mxu3  ;;  %v6448_v26 = vld [vmem:[%s9935_s3 + $0x5c4] sm:$0xf] }
 0x9ec   :  { %4120 = vmatmul.bf16.gmra.mxu0 %v6005_v17  ;;  %v4158_v9 = vmax.f32 %v4082_v10, 0.0  ;;  %v6026_v10 = vld [vmem:[%s9935_s3 + $0x5c8] sm:$0xf0] }
 0x9f1   :  { %v4083_v61 = vpop.f32.mrf.mxu0 }
 0x9f2   :  { %v4084_v30 = vadd.f32 %v4083_v61, %v3995_v11  ;;  %v6029_v11 = vor.u32 %v6448_v26, %v6026_v10  ;;  %v4019_v61 = vpop.f32.mrf.mxu3  ;;  %v4015_v10 = vadd.f32 %v4014_v5, %v9460_v53 }
 0x9f4   :  { %v4159_v58 = vmax.f32 %v4084_v30, 0.0 }
 0x9f6   :  { %v9529_v32 = vpack.c.bf16 %v4159_v58, %v4158_v9  ;;  %v6450_v58 = vld [vmem:[%s9935_s3 + $0x5d4] sm:$0xf] }
 0x9f7   :  { %v6037_v21 = vor.u32 %v6450_v58, %v6034_v44  ;;  %v4013_v44 = vadd.f32 %v9532_v15, %v9423_v25  ;;  %v3746_v15 = vpop.permute.xlu2 %3745 }
 0x9f9   :  { %v4086_v56 = vpop.f32.mrf.mxu0 }
 0x9fa   :  { %v4087_v33 = vadd.f32 %v4086_v56, %v3998_v45  ;;  %v4022_v9 = vpop.f32.mrf.mxu3  ;;  %v6042_v56 = vld [vmem:[%s9935_s3 + $0x5e8] sm:$0xf0] }
 0x9fc   :  { %4125 = vmatmul.bf16.gmra.mxu0 %v6013_v54  ;;  %v4160_v1 = vmax.f32 %v4087_v33, 0.0  ;;  %v6452_v54 = vld [vmem:[%s9935_s3 + $0x5e4] sm:$0xf] }
 0xa01   :  { %v4088_v38 = vpop.f32.mrf.mxu0 }
 0xa02   :  { %v4089_v50 = vadd.f32 %v4088_v38, %v4000_v22  ;;  %v4024_v37 = vpop.f32.mrf.mxu3  ;;  %v6045_v22 = vor.u32 %v6452_v54, %v6042_v56 }
 0xa04   :  { %v4161_v46 = vmax.f32 %v4089_v50, 0.0 }
 0xa06   :  { %v9541_v52 = vpack.c.bf16 %v4161_v46, %v4160_v1  ;;  %v6454_v46 = vld [vmem:[%s9935_s3 + $0x5f4] sm:$0xf] }
 0xa07   :  { %v6053_v63 = vor.u32 %v6454_v46, %v6050_v3 }
 0xa09   :  { %v4091_v39 = vpop.f32.mrf.mxu0 }
 0xa0a   :  { %v4092_v57 = vadd.f32 %v4091_v39, %v4003_v24  ;;  %v4027_v33 = vpop.f32.mrf.mxu3  ;;  %v4023_v39 = vadd.f32 %v4022_v9, %v9421_v16 }
 0xa0c   :  { %4130 = vmatmul.bf16.gmra.mxu0 %v6021_v4  ;;  %v4162_v14 = vmax.f32 %v4092_v57, 0.0  ;;  %v4020_v57 = vadd.f32 %v4019_v61, %v9403_v62  ;;  %v4028_v61 = vadd.f32 %v4027_v33, %v9501_v13 }
 0xa11   :  { %v4093_v41 = vpop.f32.mrf.mxu0 }
 0xa12   :  { %v4094_v28 = vadd.f32 %v4093_v41, %v4005_v48  ;;  %v4029_v50 = vpop.f32.mrf.mxu3  ;;  %v4025_v48 = vadd.f32 %v4024_v37, %v9383_v47  ;;  %v4010_v47 = vadd.f32 %v9521_v23, %v9438_v6 }
 0xa14   :  { %v4163_v17 = vmax.f32 %v4094_v28, 0.0 }
 0xa16   :  { %v9552_v18 = vpack.c.bf16 %v4163_v17, %v4162_v14  ;;  %v4018_v14 = vadd.f32 %v4017_v60, %v9401_v42 }
 0xa19   :  { %v4096_v30 = vpop.f32.mrf.mxu0 }
 0xa1a   :  { %v9555_v34 = vadd.f32 %v4096_v30, %v4008_v12  ;;  %v4032_v4 = vpop.f32.mrf.mxu3 }
 0xa1b   :  { %v4033_v46 = vadd.f32 %v4032_v4, %v9481_v36 }
 0xa1c   :  { %4135 = vmatmul.bf16.gmra.mxu0 %v6029_v11 }
 0xa21   :  { %v4098_v43 = vpop.f32.mrf.mxu0 }
 0xa22   :  { %v4034_v58 = vpop.f32.mrf.mxu3  ;;  %v4099_v53 = vadd.f32 %v4098_v43, %v4010_v47  ;;  %v6136_v47 = vld [vmem:[%s9935_s3 + $0x620] sm:$0xf] }
 0xa29   :  { %v4101_v45 = vpop.f32.mrf.mxu0 }
 0xa2a   :  { %v4102_v42 = vadd.f32 %v4101_v45, %v4013_v44 }
 0xa2c   :  { %4140 = vmatmul.bf16.gmra.mxu0 %v6037_v21  ;;  %v4166_v56 = vmax.f32 %v4102_v42, 0.0 }
 0xa31   :  { %v4103_v19 = vpop.f32.mrf.mxu0 }
 0xa32   :  { %v4104_v16 = vadd.f32 %v4103_v19, %v4015_v10  ;;  %v4037_v19 = vpop.f32.mrf.mxu3  ;;  %v6459_v10 = vld [vmem:[%s9935_s3 + $0x614] sm:$0xf0] }
 0xa34   :  { %v4167_v5 = vmax.f32 %v4104_v16, 0.0 }
 0xa36   :  { %v4226_v25 = vpack.c.bf16 %v4167_v5, %v4166_v56 }
 0xa39   :  { %v4106_v38 = vpop.f32.mrf.mxu0 }
 0xa3a   :  { %v4107_v12 = vadd.f32 %v4106_v38, %v4018_v14  ;;  %v4030_v38 = vadd.f32 %v4029_v50, %v3746_v15  ;;  %v4039_v3 = vpop.f32.mrf.mxu3  ;;  %v6120_v50 = vld [vmem:[%s9935_s3 + $0x600] sm:$0xf]  ;;  %v6463_v15 = vld [vmem:[%s9935_s3 + $0x634] sm:$0xf0] }
 0xa3c   :  { %4145 = vmatmul.bf16.gmra.mxu0 %v6045_v22  ;;  %v4168_v60 = vmax.f32 %v4107_v12, 0.0  ;;  %v4165_v22 = vmax.f32 %v4099_v53, 0.0 }
 0xa41   :  { %v4108_v1 = vpop.f32.mrf.mxu0 }
 0xa42   :  { %v4109_v17 = vadd.f32 %v4108_v1, %v4020_v57  ;;  %v4164_v1 = vmax.f32 %v9555_v34, 0.0  ;;  %v4035_v34 = vadd.f32 %v4034_v58, %v9497_v51  ;;  %v4038_v51 = vadd.f32 %v4037_v19, %v9499_v7 }
 0xa44   :  { %v4169_v9 = vmax.f32 %v4109_v17, 0.0  ;;  %v4225_v13 = vpack.c.bf16 %v4165_v22, %v4164_v1  ;;  %v4040_v17 = vadd.f32 %v4039_v3, %v9475_v2 }
 0xa46   :  { %v4227_v37 = vpack.c.bf16 %v4169_v9, %v4168_v60 }
 0xa49   :  { %v4111_v24 = vpop.f32.mrf.mxu0 }
 0xa4a   :  { %v4112_v41 = vadd.f32 %v4111_v24, %v4023_v39  ;;  %v6457_v39 = vld [vmem:[%s9935_s3 + $0x604] sm:$0xf0] }
 0xa4b   :  { %v6121_v57 = vor.u32 %v6457_v39, %v6120_v50 }
 0xa4c   :  { %4150 = vmatmul.bf16.gmra.mxu0 %v6053_v63  ;;  %v4170_v11 = vmax.f32 %v4112_v41, 0.0 }
 0xa51   :  { %v4113_v28 = vpop.f32.mrf.mxu0 }
 0xa52   :  { %v4114_v26 = vadd.f32 %v4113_v28, %v4025_v48 }
 0xa54   :  { %v4171_v30 = vmax.f32 %v4114_v26, 0.0  ;;  %v6128_v26 = vld [vmem:[%s9935_s3 + $0x610] sm:$0xf] }
 0xa56   :  { %v4228_v62 = vpack.c.bf16 %v4171_v30, %v4170_v11  ;;  %v6129_v11 = vor.u32 %v6459_v10, %v6128_v26 }
 0xa58   :  { %4590 = vmatpush.bf16.msrb.mxu1 %v4228_v62 }
 0xa59   :  { %v4116_v21 = vpop.f32.mrf.mxu0 }
 0xa5a   :  { %v4117_v54 = vadd.f32 %v4116_v21, %v4028_v61  ;;  %v6461_v61 = vld [vmem:[%s9935_s3 + $0x624] sm:$0xf0] }
 0xa5b   :  { %v6137_v53 = vor.u32 %v6461_v61, %v6136_v47 }
 0xa5c   :  { %4591 = vmatpush.bf16.msrb.mxu1 %v4227_v37  ;;  %v4172_v45 = vmax.f32 %v4117_v54, 0.0 }
 0xa60   :  { %4592 = vmatpush.bf16.msrb.mxu1 %v4226_v25  ;;  %v6144_v25 = vld [vmem:[%s9935_s3 + $0x630] sm:$0xf] }
 0xa61   :  { %v4118_v6 = vpop.f32.mrf.mxu0 }
 0xa62   :  { %v4119_v23 = vadd.f32 %v4118_v6, %v4030_v38  ;;  %v6145_v38 = vor.u32 %v6463_v15, %v6144_v25  ;;  %v6200_v15 = vld [vmem:[%s9935_s3 + $0x6a0] sm:$0xf] }
 0xa64   :  { %v4173_v33 = vmax.f32 %v4119_v23, 0.0  ;;  %4593 = vmatpush.bf16.msrb.mxu1 %v4225_v13  ;;  %v6465_v23 = vld [vmem:[%s9935_s3 + $0x644] sm:$0xf0] }
 0xa66   :  { %v9586_v43 = vpack.c.bf16 %v4173_v33, %v4172_v45 }
 0xa68   :  { %4594 = vmatpush.bf16.msrb.mxu1 %v9552_v18  ;;  %v4042_v18 = vpop.f32.mrf.mxu3 }
 0xa69   :  { %v4121_v63 = vpop.f32.mrf.mxu0  ;;  %v4043_v16 = vadd.f32 %v4042_v18, %v9451_v0 }
 0xa6a   :  { %v4122_v24 = vadd.f32 %v4121_v63, %v4033_v46  ;;  %v6160_v63 = vld [vmem:[%s9935_s3 + $0x650] sm:$0xf] }
 0xa6c   :  { %4595 = vmatpush.bf16.msrb.mxu1 %v9541_v52  ;;  %v4174_v48 = vmax.f32 %v4122_v24, 0.0  ;;  %v6467_v24 = vld [vmem:[%s9935_s3 + $0x654] sm:$0xf0] }
 0xa6d   :  { %v6161_v39 = vor.u32 %v6467_v24, %v6160_v63 }
 0xa70   :  { %4596 = vmatpush.bf16.msrb.mxu1 %v9529_v32  ;;  %v4044_v14 = vpop.f32.mrf.mxu3 }
 0xa71   :  { %v4123_v36 = vpop.f32.mrf.mxu0  ;;  %v4045_v62 = vadd.f32 %v4044_v14, %v9495_v27 }
 0xa72   :  { %v4124_v4 = vadd.f32 %v4123_v36, %v4035_v34 }
 0xa74   :  { %v4175_v41 = vmax.f32 %v4124_v4, 0.0  ;;  %4597 = vmatpush.bf16.msrb.mxu1 %v9517_v49 }
 0xa76   :  { %v9600_v52 = vpack.c.bf16 %v4175_v41, %v4174_v48 }
 0xa77   :  { %4598 = vmatmul.bf16.vlgmr.msrb.gmra.mxu1 %v6121_v57 }
 0xa78   :  { %v4047_v7 = vpop.f32.mrf.mxu3 }
 0xa79   :  { %v4126_v32 = vpop.f32.mrf.mxu0  ;;  %v4048_v0 = vadd.f32 %v4047_v7, %v9427_v8  ;;  %v6152_v8 = vld [vmem:[%s9935_s3 + $0x640] sm:$0xf] }
 0xa7a   :  { %v4127_v28 = vadd.f32 %v4126_v32, %v4038_v51  ;;  %v6153_v33 = vor.u32 %v6465_v23, %v6152_v8  ;;  %v6168_v51 = vld [vmem:[%s9935_s3 + $0x660] sm:$0xf]  ;;  %v6469_v32 = vld [vmem:[%s9935_s3 + $0x664] sm:$0xf0]  ;;  %v6208_v8 = vld [vmem:[%s9935_s3 + $0x6b0] sm:$0xf] }
 0xa7b   :  { %v6169_v10 = vor.u32 %v6469_v32, %v6168_v51  ;;  %v6479_v23 = vld [vmem:[%s9935_s3 + $0x6b4] sm:$0xf0]  ;;  %v6224_v32 = vld [vmem:[%s9935_s3 + $0x6d0] sm:$0xf] }
 0xa7c   :  { %v4176_v30 = vmax.f32 %v4127_v28, 0.0 }
 0xa80   :  { %v4049_v42 = vpop.f32.mrf.mxu3 }
 0xa81   :  { %v4128_v12 = vpop.f32.mrf.mxu0  ;;  %v4050_v7 = vadd.f32 %v4049_v42, %v9431_v35  ;;  %v6471_v35 = vld [vmem:[%s9935_s3 + $0x674] sm:$0xf0] }
 0xa82   :  { %v4129_v49 = vadd.f32 %v4128_v12, %v4040_v17 }
 0xa84   :  { %v4177_v58 = vmax.f32 %v4129_v49, 0.0 }
 0xa86   :  { %v9610_v44 = vpack.c.bf16 %v4177_v58, %v4176_v30 }
 0xa87   :  { %4603 = vmatmul.bf16.gmra.mxu1 %v6129_v11 }
 0xa88   :  { %v4052_v22 = vpop.f32.mrf.mxu3 }
 0xa89   :  { %v4131_v2 = vpop.f32.mrf.mxu0  ;;  %v4053_v49 = vadd.f32 %v4052_v22, %v9449_v55  ;;  %v6176_v55 = vld [vmem:[%s9935_s3 + $0x670] sm:$0xf]  ;;  %v6130_v22 = vld [vmem:[%s9935_s3 + $0x618] sm:$0xf0] }
 0xa8a   :  { %v4132_v9 = vadd.f32 %v4131_v2, %v4043_v16 }
 0xa8c   :  { %v4178_v5 = vmax.f32 %v4132_v9, 0.0 }
 0xa90   :  { %v4054_v1 = vpop.f32.mrf.mxu3 }
 0xa91   :  { %v4133_v60 = vpop.f32.mrf.mxu0 }
 0xa92   :  { %v4134_v21 = vadd.f32 %v4133_v60, %v4045_v62 }
 0xa94   :  { %v4179_v37 = vmax.f32 %v4134_v21, 0.0  ;;  %v6177_v21 = vor.u32 %v6471_v35, %v6176_v55  ;;  %v6487_v55 = vld [vmem:[%s9935_s3 + $0x6f4] sm:$0xf0]  ;;  %v6470_v35 = vld [vmem:[%s9935_s3 + $0x674] sm:$0xf] }
 0xa96   :  { %v9620_v54 = vpack.c.bf16 %v4179_v37, %v4178_v5  ;;  %v6473_v5 = vld [vmem:[%s9935_s3 + $0x684] sm:$0xf0]  ;;  %v6456_v37 = vld [vmem:[%s9935_s3 + $0x604] sm:$0xf] }
 0xa97   :  { %4608 = vmatmul.bf16.gmra.mxu1 %v6137_v53  ;;  %v6184_v53 = vld [vmem:[%s9935_s3 + $0x680] sm:$0xf] }
 0xa98   :  { %v4057_v13 = vpop.f32.mrf.mxu3 }
 0xa99   :  { %v4136_v27 = vpop.f32.mrf.mxu0  ;;  %v4058_v14 = vadd.f32 %v4057_v13, %v9388_v29 }
 0xa9a   :  { %v4137_v56 = vadd.f32 %v4136_v27, %v4048_v0  ;;  %v6185_v0 = vor.u32 %v6473_v5, %v6184_v53  ;;  %v6475_v27 = vld [vmem:[%s9935_s3 + $0x694] sm:$0xf0] }
 0xa9c   :  { %v4180_v60 = vmax.f32 %v4137_v56, 0.0  ;;  %v6458_v56 = vld [vmem:[%s9935_s3 + $0x614] sm:$0xf] }
 0xaa0   :  { %v4059_v46 = vpop.f32.mrf.mxu3 }
 0xaa1   :  { %v4138_v19 = vpop.f32.mrf.mxu0  ;;  %v4060_v57 = vadd.f32 %v4059_v46, %v9429_v31 }
 0xaa2   :  { %v4139_v29 = vadd.f32 %v4138_v19, %v4050_v7  ;;  %v6477_v19 = vld [vmem:[%s9935_s3 + $0x6a4] sm:$0xf0]  ;;  %v6170_v7 = vld [vmem:[%s9935_s3 + $0x668] sm:$0xf0] }
 0xaa7   :  { %4613 = vmatmul.bf16.gmra.mxu1 %v6145_v38  ;;  %v6460_v38 = vld [vmem:[%s9935_s3 + $0x624] sm:$0xf] }
 0xaa8   :  { %v4062_v50 = vpop.f32.mrf.mxu3 }
 0xaa9   :  { %v4141_v6 = vpop.f32.mrf.mxu0  ;;  %v4063_v18 = vadd.f32 %v4062_v50, %v9367_v20  ;;  %v4055_v20 = vadd.f32 %v4054_v1, %v9407_v40  ;;  %v4181_v40 = vmax.f32 %v4139_v29, 0.0  ;;  %v6138_v1 = vld [vmem:[%s9935_s3 + $0x628] sm:$0xf0]  ;;  %v6481_v50 = vld [vmem:[%s9935_s3 + $0x6c4] sm:$0xf0] }
 0xaaa   :  { %v4142_v16 = vadd.f32 %v4141_v6, %v4053_v49  ;;  %v6201_v6 = vor.u32 %v6477_v19, %v6200_v15  ;;  %v6141_v13 = vor.u32 %v6460_v38, %v6138_v1  ;;  %v6232_v49 = vld [vmem:[%s9935_s3 + $0x6e0] sm:$0xf] }
 0xaab   :  { %v4233_v42 = vpack.c.bf16 %v4181_v40, %v4180_v60 }
 0xaac   :  { %v4182_v47 = vmax.f32 %v4142_v16, 0.0 }
 0xab0   :  { %v4064_v4 = vpop.f32.mrf.mxu3 }
 0xab1   :  { %v4143_v45 = vpop.f32.mrf.mxu0  ;;  %v4065_v48 = vadd.f32 %v4064_v4, %v9381_v59 }
 0xab2   :  { %v4144_v11 = vadd.f32 %v4143_v45, %v4055_v20  ;;  %v6462_v45 = vld [vmem:[%s9935_s3 + $0x634] sm:$0xf] }
 0xab4   :  { %v4183_v9 = vmax.f32 %v4144_v11, 0.0 }
 0xab6   :  { %v4234_v61 = vpack.c.bf16 %v4183_v9, %v4182_v47  ;;  %v9772_v9 = vpop.permute.xlu0 %4347 }
 0xab7   :  { %4618 = vmatmul.bf16.gmra.mxu1 %v6153_v33  ;;  %v6146_v33 = vld [vmem:[%s9935_s3 + $0x638] sm:$0xf0] }
 0xab8   :  { %v6149_v63 = vor.u32 %v6462_v45, %v6146_v33 }
 0xab9   :  { %v4146_v3 = vpop.f32.mrf.mxu0 }
 0xaba   :  { %v4147_v31 = vadd.f32 %v4146_v3, %v4058_v14  ;;  %v6209_v3 = vor.u32 %v6479_v23, %v6208_v8  ;;  %v6466_v14 = vld [vmem:[%s9935_s3 + $0x654] sm:$0xf]  ;;  %v6194_v23 = vld [vmem:[%s9935_s3 + $0x698] sm:$0xf0] }
 0xabb   :  { %v6474_v8 = vld [vmem:[%s9935_s3 + $0x694] sm:$0xf] }
 0xabc   :  { %v4184_v2 = vmax.f32 %v4147_v31, 0.0 }
 0xabe   :  { %v9783_v60 = vpop.permute.xlu0 %4322 }
 0xac1   :  { %v4148_v34 = vpop.f32.mrf.mxu0 }
 0xac2   :  { %v4149_v17 = vadd.f32 %v4148_v34, %v4060_v57  ;;  %v6216_v34 = vld [vmem:[%s9935_s3 + $0x6c0] sm:$0xf] }
 0xac3   :  { %v6217_v4 = vor.u32 %v6481_v50, %v6216_v34 }
 0xac4   :  { %v4185_v30 = vmax.f32 %v4149_v17, 0.0  ;;  %v6162_v17 = vld [vmem:[%s9935_s3 + $0x658] sm:$0xf0] }
 0xac6   :  { %v4235_v62 = vpack.c.bf16 %v4185_v30, %v4184_v2  ;;  %v6485_v30 = vld [vmem:[%s9935_s3 + $0x6e4] sm:$0xf0] }
 0xac7   :  { %4623 = vmatmul.bf16.gmra.mxu1 %v6161_v39  ;;  %v6464_v39 = vld [vmem:[%s9935_s3 + $0x644] sm:$0xf]  ;;  %v6233_v2 = vor.u32 %v6485_v30, %v6232_v49 }
 0xac9   :  { %v4151_v36 = vpop.f32.mrf.mxu0 }
 0xaca   :  { %v4152_v41 = vadd.f32 %v4151_v36, %v4063_v18  ;;  %v6154_v36 = vld [vmem:[%s9935_s3 + $0x648] sm:$0xf0] }
 0xacb   :  { %v6157_v18 = vor.u32 %v6464_v39, %v6154_v36 }
 0xacc   :  { %v4186_v12 = vmax.f32 %v4152_v41, 0.0  ;;  %v9732_v41 = vpop.permute.xlu1 %4332 }
 0xad1   :  { %v4153_v28 = vpop.f32.mrf.mxu0 }
 0xad2   :  { %v4154_v26 = vadd.f32 %v4153_v28, %v4065_v48  ;;  %v9730_v48 = vpop.permute.xlu2 %4342  ;;  %v6483_v28 = vld [vmem:[%s9935_s3 + $0x6d4] sm:$0xf0] }
 0xad4   :  { %v4187_v59 = vmax.f32 %v4154_v26, 0.0  ;;  %v6225_v26 = vor.u32 %v6483_v28, %v6224_v32  ;;  %v9750_v31 = vpop.permute.xlu1 %4327  ;;  %v6476_v28 = vld [vmem:[%s9935_s3 + $0x6a4] sm:$0xf] }
 0xad6   :  { %v4236_v58 = vpack.c.bf16 %v4187_v59, %v4186_v12 }
 0xad7   :  { %4628 = vmatmul.bf16.gmra.mxu1 %v6169_v10  ;;  %v6165_v10 = vor.u32 %v6466_v14, %v6162_v17 }
 0xad8   :  { %4679 = vmatpush.bf16.msrb.mxu2 %v4236_v58  ;;  %v6468_v58 = vld [vmem:[%s9935_s3 + $0x664] sm:$0xf] }
 0xad9   :  { %v6173_v29 = vor.u32 %v6468_v58, %v6170_v7 }
 0xada   :  { %v9748_v20 = vpop.permute.xlu2 %4337 }
 0xadc   :  { %4680 = vmatpush.bf16.msrb.mxu2 %v4235_v62  ;;  %v9759_v11 = vpop.permute.xlu1 %4302 }
 0xae0   :  { %4681 = vmatpush.bf16.msrb.mxu2 %v4234_v61  ;;  %v6240_v61 = vld [vmem:[%s9935_s3 + $0x6f0] sm:$0xf] }
 0xae1   :  { %v6241_v53 = vor.u32 %v6487_v55, %v6240_v61  ;;  %v6210_v55 = vld [vmem:[%s9935_s3 + $0x6b8] sm:$0xf0] }
 0xae2   :  { %v9754_v59 = vpop.permute.xlu2 %4312 }
 0xae4   :  { %4682 = vmatpush.bf16.msrb.mxu2 %v4233_v42  ;;  %v9776_v47 = vpop.permute.xlu1 %4427  ;;  %v6178_v42 = vld [vmem:[%s9935_s3 + $0x678] sm:$0xf0] }
 0xae5   :  { %v6181_v5 = vor.u32 %v6470_v35, %v6178_v42 }
 0xae7   :  { %4633 = vmatmul.bf16.gmra.mxu1 %v6177_v21 }
 0xae8   :  { %4683 = vmatpush.bf16.msrb.mxu2 %v9620_v54  ;;  %v6122_v54 = vld [vmem:[%s9935_s3 + $0x608] sm:$0xf0] }
 0xaea   :  { %v9774_v62 = vpop.permute.xlu2 %4307 }
 0xaec   :  { %4684 = vmatpush.bf16.msrb.mxu2 %v9610_v44  ;;  %v6125_v44 = vor.u32 %v6456_v37, %v6122_v54  ;;  %v9794_v37 = vpop.permute.xlu1 %4412 }
 0xaf0   :  { %4685 = vmatpush.bf16.msrb.mxu2 %v9600_v52  ;;  %v6192_v52 = vld [vmem:[%s9935_s3 + $0x690] sm:$0xf] }
 0xaf1   :  { %v6193_v25 = vor.u32 %v6475_v27, %v6192_v52  ;;  %v6472_v27 = vld [vmem:[%s9935_s3 + $0x684] sm:$0xf] }
 0xaf2   :  { %v4293_v21 = vpop.permute.xlu2 %4292 }
 0xaf4   :  { %4686 = vmatpush.bf16.msrb.mxu2 %v9586_v43  ;;  %v6133_v43 = vor.u32 %v6458_v56, %v6130_v22  ;;  %v9712_v46 = vpop.f32.mrf.mxu1  ;;  %v4288_v52 = vpop.permute.xlu1 %4287  ;;  %v6186_v56 = vld [vmem:[%s9935_s3 + $0x688] sm:$0xf0] }
 0xaf5   :  { %v6189_v22 = vor.u32 %v6472_v27, %v6186_v56 }
 0xaf7   :  { %4638 = vmatmul.bf16.gmra.mxu1 %v6185_v0  ;;  %4687 = vmatmul.bf16.vlgmr.msrb.gmra.mxu2 %v6125_v44  ;;  %v9798_v0 = vpop.permute.xlu0 %4317 }
 0xafa   :  { %v9800_v44 = vpop.permute.xlu2 %4417 }
 0xafc   :  { %v9714_v24 = vpop.f32.mrf.mxu1  ;;  %v4273_v15 = vpop.permute.xlu1 %4272 }
 0xafd   :  { %v4600_v19 = vadd.f32 %v9712_v46, %v4273_v15 }
 0xb04   :  { %v9728_v57 = vpop.f32.mrf.mxu1 }
 0xb07   :  { %4643 = vmatmul.bf16.gmra.mxu1 %v6193_v25  ;;  %4692 = vmatmul.bf16.gmra.mxu2 %v6133_v43  ;;  %v9808_v25 = vpop.permute.xlu0 %4422  ;;  %v9810_v43 = vpop.permute.xlu2 %4402 }
 0xb0c   :  { %v9734_v51 = vpop.f32.mrf.mxu1 }
 0xb0d   :  { %v4607_v14 = vadd.f32 %v9734_v51, %v4288_v52  ;;  %v6478_v51 = vld [vmem:[%s9935_s3 + $0x6b4] sm:$0xf] }
 0xb14   :  { %v9752_v12 = vpop.f32.mrf.mxu1 }
 0xb15   :  { %v4610_v7 = vadd.f32 %v9752_v12, %v4293_v21 }
 0xb17   :  { %4648 = vmatmul.bf16.gmra.mxu1 %v6201_v6  ;;  %4697 = vmatmul.bf16.gmra.mxu2 %v6141_v13  ;;  %v4298_v6 = vpop.permute.xlu0 %4297  ;;  %v4278_v13 = vpop.permute.xlu2 %4277 }
 0xb18   :  { %v4602_v45 = vadd.f32 %v9714_v24, %v4278_v13  ;;  %v6202_v24 = vld [vmem:[%s9935_s3 + $0x6a8] sm:$0xf0] }
 0xb19   :  { %v6205_v49 = vor.u32 %v6476_v28, %v6202_v24 }
 0xb1c   :  { %v9770_v16 = vpop.f32.mrf.mxu1 }
 0xb1d   :  { %v4612_v35 = vadd.f32 %v9770_v16, %v4298_v6  ;;  %v6218_v16 = vld [vmem:[%s9935_s3 + $0x6c8] sm:$0xf0] }
 0xb1f   :  { %v4283_v39 = vpop.permute.xlu0 %4282 }
 0xb24   :  { %v9778_v40 = vpop.f32.mrf.mxu1 }
 0xb25   :  { %v4615_v56 = vadd.f32 %v9778_v40, %v9759_v11 }
 0xb27   :  { %4653 = vmatmul.bf16.gmra.mxu1 %v6209_v3  ;;  %4702 = vmatmul.bf16.gmra.mxu2 %v6149_v63  ;;  %v6197_v63 = vor.u32 %v6474_v8, %v6194_v23  ;;  %v9873_v24 = vpop.permute.xlu0 %4407 }
 0xb2c   :  { %v9796_v54 = vpop.f32.mrf.mxu1 }
 0xb34   :  { %v4619_v36 = vpop.f32.mrf.mxu1 }
 0xb35   :  { %v4620_v40 = vadd.f32 %v4619_v36, %v9754_v59  ;;  %v6484_v59 = vld [vmem:[%s9935_s3 + $0x6e4] sm:$0xf]  ;;  %v6234_v36 = vld [vmem:[%s9935_s3 + $0x6e8] sm:$0xf0] }
 0xb36   :  { %v6237_v28 = vor.u32 %v6484_v59, %v6234_v36 }
 0xb37   :  { %4658 = vmatmul.bf16.gmra.mxu1 %v6217_v4  ;;  %4707 = vmatmul.bf16.gmra.mxu2 %v6157_v18  ;;  %v4605_v4 = vadd.f32 %v9728_v57, %v4283_v39 }
 0xb3c   :  { %v9830_v17 = vpop.f32.mrf.mxu1 }
 0xb44   :  { %v9835_v61 = vpop.f32.mrf.mxu1 }
 0xb47   :  { %4663 = vmatmul.bf16.gmra.mxu1 %v6225_v26  ;;  %4712 = vmatmul.bf16.gmra.mxu2 %v6165_v10 }
 0xb4c   :  { %v4626_v12 = vpop.f32.mrf.mxu1 }
 0xb57   :  { %4668 = vmatmul.bf16.gmra.mxu1 %v6233_v2  ;;  %4717 = vmatmul.bf16.gmra.mxu2 %v6173_v29 }
 0xb67   :  { %4673 = vmatmul.bf16.gmra.mxu1 %v6241_v53  ;;  %4722 = vmatmul.bf16.gmra.mxu2 %v6181_v5  ;;  %v6213_v5 = vor.u32 %v6478_v51, %v6210_v55 }
 0xb77   :  { %4727 = vmatmul.bf16.gmra.mxu2 %v6189_v22 }
 0xb7a   :  { %v4688_v38 = vpop.f32.mrf.mxu2 }
 0xb7b   :  { %v4689_v1 = vadd.f32 %v4688_v38, %v4600_v19  ;;  %v4629_v19 = vpop.f32.mrf.mxu1  ;;  %v6480_v38 = vld [vmem:[%s9935_s3 + $0x6c4] sm:$0xf] }
 0xb7c   :  { %v6221_v8 = vor.u32 %v6480_v38, %v6218_v16  ;;  %v4627_v16 = vadd.f32 %v4626_v12, %v9750_v31 }
 0xb7d   :  { %v4768_v34 = vmax.f32 %v4689_v1, 0.0  ;;  %v4617_v1 = vadd.f32 %v9796_v54, %v9774_v62  ;;  %v6226_v62 = vld [vmem:[%s9935_s3 + $0x6d8] sm:$0xf0] }
 0xb82   :  { %v4690_v33 = vpop.f32.mrf.mxu2 }
 0xb83   :  { %v4691_v3 = vadd.f32 %v4690_v33, %v4602_v45  ;;  %v4631_v33 = vpop.f32.mrf.mxu1 }
 0xb85   :  { %v4769_v50 = vmax.f32 %v4691_v3, 0.0 }
 0xb87   :  { %4732 = vmatmul.bf16.gmra.mxu2 %v6197_v63  ;;  %v9820_v46 = vpack.c.bf16 %v4769_v50, %v4768_v34  ;;  %v6482_v34 = vld [vmem:[%s9935_s3 + $0x6d4] sm:$0xf] }
 0xb88   :  { %v6229_v50 = vor.u32 %v6482_v34, %v6226_v62 }
 0xb8a   :  { %v4693_v18 = vpop.f32.mrf.mxu2 }
 0xb8b   :  { %v4694_v32 = vadd.f32 %v4693_v18, %v4605_v4  ;;  %v4634_v39 = vpop.f32.mrf.mxu1 }
 0xb8d   :  { %v4770_v30 = vmax.f32 %v4694_v32, 0.0 }
 0xb92   :  { %v4695_v26 = vpop.f32.mrf.mxu2 }
 0xb93   :  { %v4696_v10 = vadd.f32 %v4695_v26, %v4607_v14  ;;  %v4636_v18 = vpop.f32.mrf.mxu1 }
 0xb95   :  { %v4771_v58 = vmax.f32 %v4696_v10, 0.0  ;;  %v6486_v10 = vld [vmem:[%s9935_s3 + $0x6f4] sm:$0xf] }
 0xb97   :  { %4737 = vmatmul.bf16.gmra.mxu2 %v6205_v49  ;;  %v9832_v57 = vpack.c.bf16 %v4771_v58, %v4770_v30  ;;  %v6242_v49 = vld [vmem:[%s9935_s3 + $0x6f8] sm:$0xf0]  ;;  %v9881_v30 = vpop.permute.xlu0 %4392 }
 0xb9a   :  { %v4698_v2 = vpop.f32.mrf.mxu2 }
 0xb9b   :  { %v4699_v29 = vadd.f32 %v4698_v2, %v4610_v7  ;;  %v4639_v14 = vpop.f32.mrf.mxu1  ;;  %v6245_v2 = vor.u32 %v6486_v10, %v6242_v49 }
 0xb9d   :  { %v4772_v52 = vmax.f32 %v4699_v29, 0.0  ;;  %v9883_v29 = vpop.permute.xlu2 %4382 }
 0xb9f   :  { %v9885_v55 = vpop.permute.xlu0 %4387 }
 0xba2   :  { %v4700_v42 = vpop.f32.mrf.mxu2 }
 0xba3   :  { %v4701_v53 = vadd.f32 %v4700_v42, %v4612_v35  ;;  %v4641_v58 = vpop.f32.mrf.mxu1 }
 0xba5   :  { %v4773_v27 = vmax.f32 %v4701_v53, 0.0  ;;  %v9887_v42 = vpop.permute.xlu2 %4377  ;;  %v4635_v53 = vadd.f32 %v4634_v39, %v9730_v48  ;;  %v4625_v48 = vadd.f32 %v9835_v61, %v9783_v60  ;;  %v9898_v39 = vpop.permute.xlu1 %4397 }
 0xba7   :  { %4742 = vmatmul.bf16.gmra.mxu2 %v6213_v5  ;;  %v9844_v21 = vpack.c.bf16 %v4773_v27, %v4772_v52  ;;  %v4632_v5 = vadd.f32 %v4631_v33, %v9748_v20  ;;  %v4637_v52 = vadd.f32 %v4636_v18, %v9772_v9  ;;  %v4622_v33 = vadd.f32 %v9830_v17, %v9798_v0 }
 0xbaa   :  { %v4703_v22 = vpop.f32.mrf.mxu2 }
 0xbab   :  { %v4704_v15 = vadd.f32 %v4703_v22, %v4615_v56  ;;  %v4644_v35 = vpop.f32.mrf.mxu1  ;;  %v4630_v22 = vadd.f32 %v4629_v19, %v9732_v41 }
 0xbad   :  { %v4774_v23 = vmax.f32 %v4704_v15, 0.0  ;;  %v4353_v9 = vpop.permute.xlu2 %4352 }
 0xbae   :  { %v4640_v41 = vadd.f32 %v4639_v14, %v4353_v9 }
 0xbb2   :  { %v4705_v6 = vpop.f32.mrf.mxu2 }
 0xbb3   :  { %v4706_v13 = vadd.f32 %v4705_v6, %v4617_v1 }
 0xbb5   :  { %v4775_v45 = vmax.f32 %v4706_v13, 0.0 }
 0xbb7   :  { %4747 = vmatmul.bf16.gmra.mxu2 %v6221_v8  ;;  %v9856_v11 = vpack.c.bf16 %v4775_v45, %v4774_v23  ;;  %v4363_v8 = vpop.permute.xlu0 %4362  ;;  %v4646_v23 = vpop.f32.mrf.mxu1 }
 0xbb8   :  { %v4645_v49 = vadd.f32 %v4644_v35, %v4363_v8 }
 0xbba   :  { %v4708_v3 = vpop.f32.mrf.mxu2 }
 0xbbb   :  { %v9859_v63 = vadd.f32 %v4708_v3, %v4620_v40 }
 0xbbd   :  { %v4776_v0 = vmax.f32 %v9859_v63, 0.0  ;;  %v9908_v63 = vld [vmem:[%s9937_s5] sm:$0xff]  ;;  %s6542_s5 = smov [#allocation2]  }
 0xbbe   :  { %s4867_s22 = sshll.u32 %s6542_s5, 4  ;;  %s4868_s22 = int_to_ptr.vmem [resolvable:$true] %s4867_s22 }
 0xbbf   :  { %v4358_v59 = vpop.permute.xlu0 %4357  ;;  %v4649_v36 = vpop.f32.mrf.mxu1 }
 0xbc2   :  { %v4710_v54 = vpop.f32.mrf.mxu2 }
 0xbc3   :  { %v4711_v12 = vadd.f32 %v4710_v54, %v4622_v33 }
 0xbc5   :  { %v4777_v60 = vmax.f32 %v4711_v12, 0.0 }
 0xbc7   :  { %4752 = vmatmul.bf16.gmra.mxu2 %v6229_v50 }
 0xbca   :  { %v4713_v4 = vpop.f32.mrf.mxu2 }
 0xbcb   :  { %v4714_v19 = vadd.f32 %v4713_v4, %v4625_v48  ;;  %v4805_v4 = vpack.c.bf16 %v4777_v60, %v4776_v0 }
 0xbcd   :  { %v4778_v18 = vmax.f32 %v4714_v19, 0.0 }
 0xbd2   :  { %v4715_v32 = vpop.f32.mrf.mxu2 }
 0xbd3   :  { %v4716_v45 = vadd.f32 %v4715_v32, %v4627_v16  ;;  %v4642_v32 = vadd.f32 %v4641_v58, %v4358_v59 }
 0xbd5   :  { %v4779_v34 = vmax.f32 %v4716_v45, 0.0 }
 0xbd7   :  { %4757 = vmatmul.bf16.gmra.mxu2 %v6237_v28  ;;  %v4806_v61 = vpack.c.bf16 %v4779_v34, %v4778_v18 }
 0xbda   :  { %v4718_v26 = vpop.f32.mrf.mxu2 }
 0xbdb   :  { %v4719_v1 = vadd.f32 %v4718_v26, %v4630_v22  ;;  %v4373_v26 = vpop.permute.xlu1 %4372 }
 0xbdd   :  { %v4780_v3 = vmax.f32 %v4719_v1, 0.0 }
 0xbe2   :  { %v4720_v7 = vpop.f32.mrf.mxu2 }
 0xbe3   :  { %v4721_v15 = vadd.f32 %v4720_v7, %v4632_v5  ;;  %v4651_v7 = vpop.f32.mrf.mxu1  ;;  %v4368_v58 = vpop.permute.xlu1 %4367 }
 0xbe4   :  { %v4647_v5 = vadd.f32 %v4646_v23, %v4368_v58 }
 0xbe5   :  { %v4781_v20 = vmax.f32 %v4721_v15, 0.0  ;;  %v4650_v15 = vadd.f32 %v4649_v36, %v4373_v26 }
 0xbe7   :  { %4762 = vmatmul.bf16.gmra.mxu2 %v6245_v2  ;;  %v4807_v62 = vpack.c.bf16 %v4781_v20, %v4780_v3 }
 0xbea   :  { %v4723_v51 = vpop.f32.mrf.mxu2 }
 0xbeb   :  { %v4724_v27 = vadd.f32 %v4723_v51, %v4635_v53  ;;  %v4824_v53 = vunpack.c.l.b16 %v9908_v63 }
 0xbed   :  { %v4782_v6 = vmax.f32 %v4724_v27, 0.0  ;;  %v4654_v27 = vpop.f32.mrf.mxu1 }
 0xbee   :  { %v4655_v20 = vadd.f32 %v4654_v27, %v9883_v29 }
 0xbf2   :  { %v4725_v56 = vpop.f32.mrf.mxu2 }
 0xbf3   :  { %v4726_v38 = vadd.f32 %v4725_v56, %v4637_v52 }
 0xbf5   :  { %v4783_v13 = vmax.f32 %v4726_v38, 0.0  ;;  %v4656_v1 = vpop.f32.mrf.mxu1 }
 0xbf7   :  { %v4808_v40 = vpack.c.bf16 %v4783_v13, %v4782_v6  ;;  %v4652_v6 = vadd.f32 %v4651_v7, %v9887_v42 }
 0xbf9   :  { %4830 = vmatpush.bf16.msra.mxu3 %v4808_v40 }
 0xbfa   :  { %v4728_v31 = vpop.f32.mrf.mxu2 }
 0xbfb   :  { %v4729_v50 = vadd.f32 %v4728_v31, %v4640_v41 }
 0xbfd   :  { %4831 = vmatpush.bf16.msra.mxu3 %v4807_v62  ;;  %v4784_v14 = vmax.f32 %v4729_v50, 0.0  ;;  %v4659_v45 = vpop.f32.mrf.mxu1 }
 0xbfe   :  { %v4660_v42 = vadd.f32 %v4659_v45, %v9881_v30 }
 0xc01   :  { %4832 = vmatpush.bf16.msra.mxu3 %v4806_v61 }
 0xc02   :  { %v4730_v17 = vpop.f32.mrf.mxu2 }
 0xc03   :  { %v4731_v28 = vadd.f32 %v4730_v17, %v4642_v32 }
 0xc05   :  { %v4785_v54 = vmax.f32 %v4731_v28, 0.0  ;;  %4833 = vmatpush.bf16.msra.mxu3 %v4805_v4  ;;  %v4661_v33 = vpop.f32.mrf.mxu1 }
 0xc07   :  { %v9901_v10 = vpack.c.bf16 %v4785_v54, %v4784_v14 }
 0xc09   :  { %4834 = vmatpush.bf16.msra.mxu3 %v9856_v11  ;;  %v4826_v11 = vpack.c.b16 %v4824_v53, %v4824_v53 }
 0xc0a   :  { %v4733_v2 = vpop.f32.mrf.mxu2 }
 0xc0b   :  { %v4734_v51 = vadd.f32 %v4733_v2, %v4645_v49 }
 0xc0d   :  { %4835 = vmatpush.bf16.msra.mxu3 %v9844_v21  ;;  %v4786_v56 = vmax.f32 %v4734_v51, 0.0  ;;  %v4664_v50 = vpop.f32.mrf.mxu1 }
 0xc11   :  { %4836 = vmatpush.bf16.msra.mxu3 %v9832_v57 }
 0xc12   :  { %v4735_v52 = vpop.f32.mrf.mxu2 }
 0xc13   :  { %v4736_v35 = vadd.f32 %v4735_v52, %v4647_v5  ;;  %v4665_v52 = vadd.f32 %v4664_v50, %v9810_v43  ;;  %v4825_v43 = vunpack.c.h.b16 %v9908_v63 }
 0xc15   :  { %v4787_v22 = vmax.f32 %v4736_v35, 0.0  ;;  %4837 = vmatpush.bf16.msra.mxu3 %v9820_v46  ;;  %v4657_v46 = vadd.f32 %v4656_v1, %v9885_v55  ;;  %v4666_v60 = vpop.f32.mrf.mxu1 }
 0xc16   :  { %v4667_v51 = vadd.f32 %v4666_v60, %v9873_v24 }
 0xc17   :  { %v9913_v21 = vpack.c.bf16 %v4787_v22, %v4786_v56 }
 0xc18   :  { %4838 = vmatmul.bf16.vlgmr.msra.gmra.mxu3 %v4826_v11 }
 0xc1a   :  { %v4738_v38 = vpop.f32.mrf.mxu2 }
 0xc1b   :  { %v4739_v16 = vadd.f32 %v4738_v38, %v4650_v15 }
 0xc1d   :  { %v4788_v57 = vmax.f32 %v4739_v16, 0.0  ;;  %v4669_v59 = vpop.f32.mrf.mxu1 }
 0xc1e   :  { %v4670_v49 = vadd.f32 %v4669_v59, %v9794_v37 }
 0xc22   :  { %v4740_v13 = vpop.f32.mrf.mxu2 }
 0xc23   :  { %v4741_v8 = vadd.f32 %v4740_v13, %v4652_v6 }
 0xc25   :  { %v4789_v23 = vmax.f32 %v4741_v8, 0.0  ;;  %v4671_v36 = vpop.f32.mrf.mxu1  ;;  %v4821_v8 = vpop.permute.xlu1 %4820 }
 0xc26   :  { %v4672_v14 = vadd.f32 %v4671_v36, %v9800_v44  ;;  %v4662_v44 = vadd.f32 %v4661_v33, %v9898_v39  ;;  %v4827_v39 = vpack.c.b16 %v4825_v43, %v4825_v43 }
 0xc27   :  { %v4811_v48 = vpack.c.bf16 %v4789_v23, %v4788_v57 }
 0xc2a   :  { %v4743_v40 = vpop.f32.mrf.mxu2 }
 0xc2b   :  { %v4744_v9 = vadd.f32 %v4743_v40, %v4655_v20 }
 0xc2d   :  { %v4790_v3 = vmax.f32 %v4744_v9, 0.0  ;;  %v4674_v55 = vpop.f32.mrf.mxu1 }
 0xc2e   :  { %v4675_v28 = vadd.f32 %v4674_v55, %v9808_v25 }
 0xc32   :  { %v4745_v41 = vpop.f32.mrf.mxu2 }
 0xc33   :  { %v4746_v19 = vadd.f32 %v4745_v41, %v4657_v46 }
 0xc35   :  { %v4791_v31 = vmax.f32 %v4746_v19, 0.0  ;;  %v4676_v4 = vpop.f32.mrf.mxu1 }
 0xc36   :  { %v4677_v30 = vadd.f32 %v4676_v4, %v9776_v47 }
 0xc37   :  { %v4812_v12 = vpack.c.bf16 %v4791_v31, %v4790_v3 }
 0xc3a   :  { %v4748_v34 = vpop.f32.mrf.mxu2 }
 0xc3b   :  { %v4749_v62 = vadd.f32 %v4748_v34, %v4660_v42 }
 0xc3d   :  { %v4792_v16 = vmax.f32 %v4749_v62, 0.0 }
 0xc42   :  { %v4750_v18 = vpop.f32.mrf.mxu2 }
 0xc43   :  { %v4751_v56 = vadd.f32 %v4750_v18, %v4662_v44 }
 0xc45   :  { %v4793_v38 = vmax.f32 %v4751_v56, 0.0 }
 0xc47   :  { %v4813_v1 = vpack.c.bf16 %v4793_v38, %v4792_v16 }
 0xc4a   :  { %v4753_v61 = vpop.f32.mrf.mxu2 }
 0xc4b   :  { %v4754_v11 = vadd.f32 %v4753_v61, %v4665_v52 }
 0xc4d   :  { %v4794_v15 = vmax.f32 %v4754_v11, 0.0 }
 0xc52   :  { %v4755_v29 = vpop.f32.mrf.mxu2 }
 0xc53   :  { %v4756_v35 = vadd.f32 %v4755_v29, %v4667_v51 }
 0xc55   :  { %v4795_v22 = vmax.f32 %v4756_v35, 0.0 }
 0xc57   :  { %v4814_v24 = vpack.c.bf16 %v4795_v22, %v4794_v15 }
 0xc5a   :  { %v4758_v32 = vpop.f32.mrf.mxu2 }
 0xc5b   :  { %v4759_v58 = vadd.f32 %v4758_v32, %v4670_v49 }
 0xc5d   :  { %v4796_v47 = vmax.f32 %v4759_v58, 0.0 }
 0xc62   :  { %v4760_v0 = vpop.f32.mrf.mxu2 }
 0xc63   :  { %v4761_v7 = vadd.f32 %v4760_v0, %v4672_v14 }
 0xc65   :  { %v4797_v27 = vmax.f32 %v4761_v7, 0.0 }
 0xc67   :  { %v4815_v37 = vpack.c.bf16 %v4797_v27, %v4796_v47 }
 0xc6a   :  { %v4763_v17 = vpop.f32.mrf.mxu2 }
 0xc6b   :  { %v4764_v54 = vadd.f32 %v4763_v17, %v4675_v28 }
 0xc6d   :  { %v4798_v53 = vmax.f32 %v4764_v54, 0.0 }
 0xc72   :  { %v4765_v26 = vpop.f32.mrf.mxu2 }
 0xc73   :  { %v4766_v2 = vadd.f32 %v4765_v26, %v4677_v30 }
 0xc75   :  { %v4799_v5 = vmax.f32 %v4766_v2, 0.0 }
 0xc77   :  { %v4816_v25 = vpack.c.bf16 %v4799_v5, %v4798_v53 }
 0xc79   :  { %4843 = vmatpush.bf16.msrb.mxu3 %v4816_v25 }
 0xc7d   :  { %4844 = vmatpush.bf16.msrb.mxu3 %v4815_v37 }
 0xc81   :  { %4845 = vmatpush.bf16.msrb.mxu3 %v4814_v24 }
 0xc85   :  { %4846 = vmatpush.bf16.msrb.mxu3 %v4813_v1 }
 0xc89   :  { %4847 = vmatpush.bf16.msrb.mxu3 %v4812_v12 }
 0xc8d   :  { %4848 = vmatpush.bf16.msrb.mxu3 %v4811_v48 }
 0xc91   :  { %4849 = vmatpush.bf16.msrb.mxu3 %v9913_v21 }
 0xc95   :  { %4850 = vmatpush.bf16.msrb.mxu3 %v9901_v10 }
 0xc98   :  { %4851 = vmatmul.bf16.vlgmr.msrb.gmra.mxu3 %v4827_v39 }
 0xc9b   :  { %v4839_v6 = vpop.f32.mrf.mxu3 }
 0xc9c   :  { %v4840_v57 = vadd.f32 %v4839_v6, %v4821_v8 }
 0xca3   :  { %v4841_v13 = vpop.f32.mrf.mxu3 }
 0xd1b   :  { %v4852_v23 = vpop.f32.mrf.mxu3 }
 0xd1c   :  { %v4853_v45 = vadd.f32 %v4852_v23, %v4840_v57 }
 0xd1e   :  { %v4856_v20 = vsub.f32 0.0, %v4853_v45 }
 0xd20   :  { %v4857_v40 = vmul.f32 1.442695, %v4856_v20 }
 0xd22   :  { %6511 = vpow2.f32 %v4857_v40 }
 0xd23   :  { %v4854_v9 = vpop.f32.mrf.mxu3 }
 0xd28   :  { %v6512_v46 = vpop.eup %6511 }
 0xd29   :  { %v4859_v48 = vadd.f32 1.0, %v6512_v46 }
 0xd2b   :  { %6513 = vrcp.f32 %v4859_v48 }
 0xd31   :  { %v6514_v10 = vpop.eup %6513 }
 0xd32   :  { %4861 = vst [vmem:[#allocation2] sm:$0xff] %v6514_v10 }
 0xd33   :  { %4872 = dma.vmem_to_hbm [thread:$0]  %s4868_s22, 128, %s4870_s25, [#allocation3]  }
 0xd34   :  { %6539 = dma.done.wait [#allocation3], 128  }
 0xd35   :  { %6540 = vsyncadd [#allocation3], 4294967168 }
 0xd36   :  { %4877 = vsyncpa [#allocation3], 1 }

</bundles_post_ra>
